<compile_context>
chip_gen: v6e
topology: v6e:2x2x1
jax: 0.10.0
libtpu: 0.0.40
codegen_flags: <defaults>
</compile_context>

<pallas_src>
import functools

import jax
import jax.numpy as jnp
from jax.experimental import pallas as pl
from jax.experimental.pallas import tpu as pltpu

# ----------------------- scaled-down DINOv2-like config -----------------------
HIDDEN = 32
NUM_HEADS = 4
HEAD_DIM = HIDDEN // NUM_HEADS
MLP_DIM = 4 * HIDDEN
NUM_LAYERS = 2
PATCH = 4
IMG = 16
CHANNELS = 3
NUM_OUTPUTS = 37
HEAD_PAD = 128          # lane-dense padded width for the head output store
LN_EPS = 1e-6           # Dinov2 layer_norm_eps
BN_EPS = 1e-5           # nn.BatchNorm1d default eps
SEQ = (IMG // PATCH) ** 2 + 1   # 1 CLS + 16 patch tokens = 17


def _layernorm(v, g, b, eps=LN_EPS):
    mu = jnp.mean(v, axis=-1, keepdims=True)
    var = jnp.mean((v - mu) ** 2, axis=-1, keepdims=True)
    return (v - mu) * jax.lax.rsqrt(var + eps) * g + b


# --------------------- single fused forward kernel (no grid) -------------------
def _fused_forward_kernel(patches_ref, ebias_ref, pw_ref,
                          ln1g_ref, ln1b_ref, wqkv_ref, bqkv_ref, wo_ref, bo_ref,
                          ln2g_ref, ln2b_ref, wfc1_ref, bfc1_ref, wfc2_ref, bfc2_ref,
                          flng_ref, flnb_ref, poolw_ref, poolb_ref,
                          hw1_ref, hb1_ref, hw2_ref, hb2_ref, hw3_ref, hb3_ref,
                          o_ref, *, batch, seq):
    # ---- patch embedding: one aligned matmul over the [B*T, C*P*P] slab.
    # Row 0 of each batch is a zero patch row; cls_token/patch_b/pos_emb are folded into ebias.
    x = jnp.dot(patches_ref[...], pw_ref[...], preferred_element_type=jnp.float32)
    x = x + ebias_ref[...]                                        # [B*T, H]

    # ---- encoder layers (unrolled; per-layer params stacked along leading axis).
    for l in range(NUM_LAYERS):
        # attention block (pre-LN; 1/sqrt(dh) folded into Q weights; ls1 folded into wo/bo)
        h = _layernorm(x, ln1g_ref[l], ln1b_ref[l])
        qkv = jnp.dot(h, wqkv_ref[l], preferred_element_type=jnp.float32) + bqkv_ref[l]  # [B*T, 3H]

        attn_rows = []
        for b in range(batch):                                     # static, unrolled
            r0 = b * seq
            qkv_b = qkv[r0:r0 + seq, :]                            # [T, 3H]
            head_outs = []
            for hh in range(NUM_HEADS):                            # static, unrolled
                c = hh * HEAD_DIM
                q = qkv_b[:, c:c + HEAD_DIM]
                k = qkv_b[:, HIDDEN + c:HIDDEN + c + HEAD_DIM]
                v = qkv_b[:, 2 * HIDDEN + c:2 * HIDDEN + c + HEAD_DIM]
                s = jax.lax.dot_general(q, k, (((1,), (1,)), ((), ())),
                                        preferred_element_type=jnp.float32)   # [T, T]
                m = jnp.max(s, axis=-1, keepdims=True)
                p = jnp.exp(s - m)
                p = p * pl.reciprocal(jnp.sum(p, axis=-1, keepdims=True), approx=True)
                head_outs.append(jnp.dot(p, v, preferred_element_type=jnp.float32))  # [T, dH]
            attn_rows.append(jnp.concatenate(head_outs, axis=-1))  # [T, H]
        attn = jnp.concatenate(attn_rows, axis=0)                  # [B*T, H]
        # single output projection for all batches/heads (ls1 pre-folded)
        x = x + jnp.dot(attn, wo_ref[l], preferred_element_type=jnp.float32) + bo_ref[l]

        # MLP block (pre-LN, GELU, ls2 pre-folded into w_fc2/b_fc2)
        h2 = _layernorm(x, ln2g_ref[l], ln2b_ref[l])
        h2 = jnp.dot(h2, wfc1_ref[l], preferred_element_type=jnp.float32) + bfc1_ref[l]
        # TODO(synk): HF Dinov2 uses exact (erf) GELU; tanh-approx GELU used here for TPU lowering.
        h2 = jax.nn.gelu(h2, approximate=True)
        x = x + jnp.dot(h2, wfc2_ref[l], preferred_element_type=jnp.float32) + bfc2_ref[l]

    # ---- final LayerNorm on the CLS tokens only (LN is per-token, so this is exact),
    #      then pooler (Linear+Tanh) and the morphology head (BN folded, Dropout=identity).
    cls = jnp.concatenate([x[b * seq:b * seq + 1, :] for b in range(batch)], axis=0)  # [B, H]
    g = _layernorm(cls, flng_ref[...], flnb_ref[...])
    g = jnp.tanh(jnp.dot(g, poolw_ref[...], preferred_element_type=jnp.float32) + poolb_ref[...])
    g = jnp.maximum(jnp.dot(g, hw1_ref[...], preferred_element_type=jnp.float32) + hb1_ref[...], 0.0)
    g = jnp.maximum(jnp.dot(g, hw2_ref[...], preferred_element_type=jnp.float32) + hb2_ref[...], 0.0)
    g = jnp.dot(g, hw3_ref[...], preferred_element_type=jnp.float32) + hb3_ref[...]   # [B, 128]
    o_ref[...] = jax.nn.sigmoid(g).astype(o_ref.dtype)


def fused_forward_pallas(patches_slab, embed_bias_slab, prep, *, batch, seq):
    hp = prep["head"]
    lp = prep["layers"]
    args = [
        patches_slab, embed_bias_slab, prep["patch_w"],
        lp["ln1_g"], lp["ln1_b"], lp["w_qkv"], lp["b_qkv"], lp["wo"], lp["bo"],
        lp["ln2_g"], lp["ln2_b"], lp["w_fc1"], lp["b_fc1"], lp["w_fc2"], lp["b_fc2"],
        prep["final_ln_g"], prep["final_ln_b"], prep["pooler_w"], prep["pooler_b"],
        hp["w1"], hp["b1"], hp["w2"], hp["b2"], hp["w3"], hp["b3"],
    ]
    vmem_spec = pl.BlockSpec(memory_space=pltpu.MemorySpace.VMEM)
    return pl.pallas_call(
        functools.partial(_fused_forward_kernel, batch=batch, seq=seq),
        out_shape=jax.ShapeDtypeStruct((batch, HEAD_PAD), jnp.float32),
        in_specs=[vmem_spec] * len(args),
        out_specs=vmem_spec,
    )(*args)


# ------------------------------- model forward --------------------------------
def galaxy_sommelier_forward(prepared, pixel_values):
    """pixel_values: NCHW [B, C, H, W]. Returns sigmoid vote fractions [B, 37]."""
    B, C, H, W = pixel_values.shape
    nP = H // PATCH
    T = nP * nP + 1

    # Patch extraction: Conv2d(C, HIDDEN, kernel=PATCH, stride=PATCH) == patch-flatten
    # (C,P,P row-major, matching Conv2d weight layout) + matmul.  A zero row is prepended
    # per batch for the CLS slot so the embed matmul + bias-add are fully aligned.
    patches = (pixel_values.reshape(B, C, nP, PATCH, nP, PATCH)
               .transpose(0, 2, 4, 1, 3, 5)
               .reshape(B, nP * nP, C * PATCH * PATCH))
    zero_row = jnp.zeros((B, 1, C * PATCH * PATCH), patches.dtype)
    patches_slab = jnp.concatenate([zero_row, patches], axis=1).reshape(B * T, -1)

    # Per-token embed bias (cls_token / patch_b / pos_emb folded at prep), tiled over batch.
    embed_bias_slab = jnp.tile(prepared["embed_bias"], (B, 1))      # [B*T, H]

    out = fused_forward_pallas(patches_slab, embed_bias_slab, prepared,
                               batch=B, seq=T)                      # [B, 128] lane-dense
    return out[:, :NUM_OUTPUTS]


# ------------------------- inference-time param folding ------------------------
def prepare_inference_params(params):
    """Fold attention scale into Q weights, layer-scale into wo/w_fc2, merge+stack QKV and all
    per-layer params, fold cls/patch-bias/pos-emb into one embed bias, fold BatchNorm
    (running stats) into the head linears, and pad the 37-wide output to 128 lanes."""
    r = lambda a: a.reshape(1, -1)
    scale = 1.0 / float(HEAD_DIM) ** 0.5

    # embed bias: row 0 = cls + pos[0]; rows t>=1 = patch_b + pos[t]  (zero CLS patch row).
    pos = params["pos_emb"][0]                                      # [T, H]
    cls = params["cls_token"][0, 0]                                 # [H]
    embed_bias = jnp.concatenate(
        [(cls + pos[0])[None, :], params["patch_b"][None, :] + pos[1:]], axis=0)   # [T, H]

    prep = {
        "patch_w": params["patch_w"],
        "embed_bias": embed_bias,
        "final_ln_g": r(params["final_ln_g"]), "final_ln_b": r(params["final_ln_b"]),
        "pooler_w": params["pooler_w"], "pooler_b": r(params["pooler_b"]),
    }

    stacked = {k: [] for k in ("ln1_g", "ln1_b", "w_qkv", "b_qkv", "wo", "bo",
                               "ln2_g", "ln2_b", "w_fc1", "b_fc1", "w_fc2", "b_fc2")}
    for p in params["layers"]:
        stacked["ln1_g"].append(r(p["ln1_g"]))
        stacked["ln1_b"].append(r(p["ln1_b"]))
        stacked["w_qkv"].append(jnp.concatenate([p["wq"] * scale, p["wk"], p["wv"]], axis=1))
        stacked["b_qkv"].append(r(jnp.concatenate([p["bq"] * scale, p["bk"], p["bv"]])))
        stacked["wo"].append(p["wo"] * p["ls1"][None, :])
        stacked["bo"].append(r(p["bo"] * p["ls1"]))
        stacked["ln2_g"].append(r(p["ln2_g"]))
        stacked["ln2_b"].append(r(p["ln2_b"]))
        stacked["w_fc1"].append(p["w_fc1"])
        stacked["b_fc1"].append(r(p["b_fc1"]))
        stacked["w_fc2"].append(p["w_fc2"] * p["ls2"][None, :])
        stacked["b_fc2"].append(r(p["b_fc2"] * p["ls2"]))
    prep["layers"] = {k: jnp.stack(v, axis=0) for k, v in stacked.items()}

    hp = params["head"]
    s1 = hp["g1"] * jax.lax.rsqrt(hp["v1"] + BN_EPS)
    s2 = hp["g2"] * jax.lax.rsqrt(hp["v2"] + BN_EPS)
    w3 = jnp.zeros((256, HEAD_PAD), jnp.float32).at[:, :NUM_OUTPUTS].set(hp["w3"])
    b3 = jnp.zeros((HEAD_PAD,), jnp.float32).at[:NUM_OUTPUTS].set(hp["b3"])
    prep["head"] = {
        "w1": hp["w1"] * s1[None, :], "b1": r((hp["b1"] - hp["m1"]) * s1 + hp["be1"]),
        "w2": hp["w2"] * s2[None, :], "b2": r((hp["b2"] - hp["m2"]) * s2 + hp["be2"]),
        "w3": w3, "b3": r(b3),
    }
    return prep


# ------------------------------ parameter init --------------------------------
def init_params(key):
    keys = iter(jax.random.split(key, 64))

    def nrm(shape, std=0.02):
        return std * jax.random.normal(next(keys), shape, jnp.float32)

    def xavier(fan_in, fan_out):
        lim = (6.0 / (fan_in + fan_out)) ** 0.5
        return jax.random.uniform(next(keys), (fan_in, fan_out), jnp.float32, -lim, lim)

    zeros = lambda n: jnp.zeros((n,), jnp.float32)
    ones = lambda n: jnp.ones((n,), jnp.float32)

    params = {
        "patch_w": nrm((CHANNELS * PATCH * PATCH, HIDDEN)),
        "patch_b": zeros(HIDDEN),
        "cls_token": nrm((1, 1, HIDDEN)),
        "pos_emb": nrm((1, SEQ, HIDDEN)),
        "final_ln_g": ones(HIDDEN),
        "final_ln_b": zeros(HIDDEN),
        "pooler_w": nrm((HIDDEN, HIDDEN)),
        "pooler_b": zeros(HIDDEN),
        "layers": [],
    }
    for _ in range(NUM_LAYERS):
        params["layers"].append({
            "ln1_g": ones(HIDDEN), "ln1_b": zeros(HIDDEN),
            "wq": nrm((HIDDEN, HIDDEN)), "bq": zeros(HIDDEN),
            "wk": nrm((HIDDEN, HIDDEN)), "bk": zeros(HIDDEN),
            "wv": nrm((HIDDEN, HIDDEN)), "bv": zeros(HIDDEN),
            "wo": nrm((HIDDEN, HIDDEN)), "bo": zeros(HIDDEN),
            "ls1": ones(HIDDEN),          # Dinov2 layer scale (init 1.0)
            "ln2_g": ones(HIDDEN), "ln2_b": zeros(HIDDEN),
            "w_fc1": nrm((HIDDEN, MLP_DIM)), "b_fc1": zeros(MLP_DIM),
            "w_fc2": nrm((MLP_DIM, HIDDEN)), "b_fc2": zeros(HIDDEN),
            "ls2": ones(HIDDEN),
        })
    # Morphology head: Xavier-uniform weights, zero biases (matches _init_weights);
    # BN gamma=1, beta=0, running_mean=0, running_var=1 (eval mode).
    params["head"] = {
        "w1": xavier(HIDDEN, 512), "b1": zeros(512),
        "g1": ones(512), "be1": zeros(512), "m1": zeros(512), "v1": ones(512),
        "w2": xavier(512, 256), "b2": zeros(256),
        "g2": ones(256), "be2": zeros(256), "m2": zeros(256), "v2": ones(256),
        "w3": xavier(256, NUM_OUTPUTS), "b3": zeros(NUM_OUTPUTS),
    }
    return params


# ------------------------------------ main -------------------------------------
if __name__ == "__main__":
    key = jax.random.PRNGKey(0)
    pkey, xkey = jax.random.split(key)
    params = init_params(pkey)
    prepared = prepare_inference_params(params)
    pixel_values = jax.random.normal(xkey, (2, CHANNELS, IMG, IMG), jnp.float32)

    fwd = jax.jit(galaxy_sommelier_forward)
    preds = fwd(prepared, pixel_values)
    preds = jax.block_until_ready(preds)

    assert preds.shape == (2, NUM_OUTPUTS), preds.shape
    assert bool(jnp.all(jnp.isfinite(preds)))
    assert bool(jnp.all((preds >= 0.0) & (preds <= 1.0)))   # sigmoid outputs
    print("KERNEL_OK")
</pallas_src>

<mosaic_0001>
module attributes {stable_mosaic.version = 11 : i64} {
  func.func @_fused_forward_kernel(%arg0: memref<34x48xf32, #tpu.memory_space<vmem>>, %arg1: memref<34x32xf32, #tpu.memory_space<vmem>>, %arg2: memref<48x32xf32, #tpu.memory_space<vmem>>, %arg3: memref<2x1x32xf32, #tpu.memory_space<vmem>>, %arg4: memref<2x1x32xf32, #tpu.memory_space<vmem>>, %arg5: memref<2x32x96xf32, #tpu.memory_space<vmem>>, %arg6: memref<2x1x96xf32, #tpu.memory_space<vmem>>, %arg7: memref<2x32x32xf32, #tpu.memory_space<vmem>>, %arg8: memref<2x1x32xf32, #tpu.memory_space<vmem>>, %arg9: memref<2x1x32xf32, #tpu.memory_space<vmem>>, %arg10: memref<2x1x32xf32, #tpu.memory_space<vmem>>, %arg11: memref<2x32x128xf32, #tpu.memory_space<vmem>>, %arg12: memref<2x1x128xf32, #tpu.memory_space<vmem>>, %arg13: memref<2x128x32xf32, #tpu.memory_space<vmem>>, %arg14: memref<2x1x32xf32, #tpu.memory_space<vmem>>, %arg15: memref<1x32xf32, #tpu.memory_space<vmem>>, %arg16: memref<1x32xf32, #tpu.memory_space<vmem>>, %arg17: memref<32x32xf32, #tpu.memory_space<vmem>>, %arg18: memref<1x32xf32, #tpu.memory_space<vmem>>, %arg19: memref<32x512xf32, #tpu.memory_space<vmem>>, %arg20: memref<1x512xf32, #tpu.memory_space<vmem>>, %arg21: memref<512x256xf32, #tpu.memory_space<vmem>>, %arg22: memref<1x256xf32, #tpu.memory_space<vmem>>, %arg23: memref<256x128xf32, #tpu.memory_space<vmem>>, %arg24: memref<1x128xf32, #tpu.memory_space<vmem>>, %arg25: memref<2x128xf32, #tpu.memory_space<vmem>>) attributes {dimension_semantics = [], scalar_prefetch = 0 : i64, scratch_operands = 0 : i64, tpu.core_type = #tpu.core_type<tc>} {
    %c0 = arith.constant 0 : index
    %c0_0 = arith.constant 0 : index
    %0 = vector.load %arg0[%c0, %c0_0] : memref<34x48xf32, #tpu.memory_space<vmem>>, vector<34x48xf32>
    %c0_1 = arith.constant 0 : index
    %c0_2 = arith.constant 0 : index
    %1 = vector.load %arg2[%c0_1, %c0_2] : memref<48x32xf32, #tpu.memory_space<vmem>>, vector<48x32xf32>
    %cst = arith.constant dense<0.000000e+00> : vector<34x32xf32>
    %2 = tpu.matmul %0, %1, %cst {dimension_numbers = #tpu.dot_dimension_numbers<[1], [0], [0], [1], [0, 0, 1, 1], [], []>} : vector<34x48xf32>, vector<48x32xf32>, vector<34x32xf32> -> vector<34x32xf32>
    %c0_3 = arith.constant 0 : index
    %c0_4 = arith.constant 0 : index
    %3 = vector.load %arg1[%c0_3, %c0_4] : memref<34x32xf32, #tpu.memory_space<vmem>>, vector<34x32xf32>
    %4 = arith.addf %2, %3 : vector<34x32xf32>
    %c0_5 = arith.constant 0 : index
    %c0_6 = arith.constant 0 : index
    %c0_7 = arith.constant 0 : index
    %5 = vector.load %arg3[%c0_5, %c0_6, %c0_7] : memref<2x1x32xf32, #tpu.memory_space<vmem>>, vector<1x1x32xf32>
    %6 = vector.shape_cast %5 : vector<1x1x32xf32> to vector<1x32xf32>
    %c0_8 = arith.constant 0 : index
    %c0_9 = arith.constant 0 : index
    %c0_10 = arith.constant 0 : index
    %7 = vector.load %arg4[%c0_8, %c0_9, %c0_10] : memref<2x1x32xf32, #tpu.memory_space<vmem>>, vector<1x1x32xf32>
    %8 = vector.shape_cast %7 : vector<1x1x32xf32> to vector<1x32xf32>
    %cst_11 = arith.constant dense<0.000000e+00> : vector<34xf32>
    %9 = vector.multi_reduction <add>, %4, %cst_11 [1] : vector<34x32xf32> to vector<34xf32>
    %10 = vector.shape_cast %9 : vector<34xf32> to vector<34x1xf32>
    %cst_12 = arith.constant 3.200000e+01 : f32
    %11 = vector.broadcast %cst_12 : f32 to vector<34x1xf32>
    %12 = arith.divf %10, %11 : vector<34x1xf32>
    %13 = vector.broadcast %12 : vector<34x1xf32> to vector<34x32xf32>
    %14 = arith.subf %4, %13 : vector<34x32xf32>
    %15 = arith.mulf %14, %14 : vector<34x32xf32>
    %cst_13 = arith.constant dense<0.000000e+00> : vector<34xf32>
    %16 = vector.multi_reduction <add>, %15, %cst_13 [1] : vector<34x32xf32> to vector<34xf32>
    %17 = vector.shape_cast %16 : vector<34xf32> to vector<34x1xf32>
    %cst_14 = arith.constant 3.200000e+01 : f32
    %18 = vector.broadcast %cst_14 : f32 to vector<34x1xf32>
    %19 = arith.divf %17, %18 : vector<34x1xf32>
    %20 = vector.broadcast %12 : vector<34x1xf32> to vector<34x32xf32>
    %21 = arith.subf %4, %20 : vector<34x32xf32>
    %cst_15 = arith.constant 9.99999997E-7 : f32
    %22 = vector.broadcast %cst_15 : f32 to vector<34x1xf32>
    %23 = arith.addf %19, %22 : vector<34x1xf32>
    %24 = math.rsqrt %23 : vector<34x1xf32>
    %25 = vector.broadcast %24 : vector<34x1xf32> to vector<34x32xf32>
    %26 = arith.mulf %21, %25 : vector<34x32xf32>
    %27 = vector.broadcast %6 : vector<1x32xf32> to vector<34x32xf32>
    %28 = arith.mulf %26, %27 : vector<34x32xf32>
    %29 = vector.broadcast %8 : vector<1x32xf32> to vector<34x32xf32>
    %30 = arith.addf %28, %29 : vector<34x32xf32>
    %c0_16 = arith.constant 0 : index
    %c0_17 = arith.constant 0 : index
    %c0_18 = arith.constant 0 : index
    %31 = vector.load %arg5[%c0_16, %c0_17, %c0_18] : memref<2x32x96xf32, #tpu.memory_space<vmem>>, vector<1x32x96xf32>
    %32 = vector.shape_cast %31 : vector<1x32x96xf32> to vector<32x96xf32>
    %cst_19 = arith.constant dense<0.000000e+00> : vector<34x96xf32>
    %33 = tpu.matmul %30, %32, %cst_19 {dimension_numbers = #tpu.dot_dimension_numbers<[1], [0], [0], [1], [0, 0, 1, 1], [], []>} : vector<34x32xf32>, vector<32x96xf32>, vector<34x96xf32> -> vector<34x96xf32>
    %c0_20 = arith.constant 0 : index
    %c0_21 = arith.constant 0 : index
    %c0_22 = arith.constant 0 : index
    %34 = vector.load %arg6[%c0_20, %c0_21, %c0_22] : memref<2x1x96xf32, #tpu.memory_space<vmem>>, vector<1x1x96xf32>
    %35 = vector.shape_cast %34 : vector<1x1x96xf32> to vector<1x96xf32>
    %36 = vector.broadcast %35 : vector<1x96xf32> to vector<34x96xf32>
    %37 = arith.addf %33, %36 : vector<34x96xf32>
    %38 = vector.extract_strided_slice %37 {offsets = [0, 0], sizes = [17, 96], strides = [1, 1]} : vector<34x96xf32> to vector<17x96xf32>
    %39 = vector.extract_strided_slice %38 {offsets = [0, 0], sizes = [17, 8], strides = [1, 1]} : vector<17x96xf32> to vector<17x8xf32>
    %40 = vector.extract_strided_slice %38 {offsets = [0, 32], sizes = [17, 8], strides = [1, 1]} : vector<17x96xf32> to vector<17x8xf32>
    %41 = vector.extract_strided_slice %38 {offsets = [0, 64], sizes = [17, 8], strides = [1, 1]} : vector<17x96xf32> to vector<17x8xf32>
    %cst_23 = arith.constant dense<0.000000e+00> : vector<17x17xf32>
    %42 = tpu.matmul %39, %40, %cst_23 {dimension_numbers = #tpu.dot_dimension_numbers<[1], [1], [0], [0], [0, 0, 1, 0], [], []>} : vector<17x8xf32>, vector<17x8xf32>, vector<17x17xf32> -> vector<17x17xf32>
    %cst_24 = arith.constant dense<0xFF800000> : vector<17xf32>
    %43 = vector.multi_reduction <maximumf>, %42, %cst_24 [1] : vector<17x17xf32> to vector<17xf32>
    %44 = vector.shape_cast %43 : vector<17xf32> to vector<17x1xf32>
    %45 = vector.broadcast %44 : vector<17x1xf32> to vector<17x17xf32>
    %46 = arith.subf %42, %45 : vector<17x17xf32>
    %47 = math.exp %46 : vector<17x17xf32>
    %cst_25 = arith.constant dense<0.000000e+00> : vector<17xf32>
    %48 = vector.multi_reduction <add>, %47, %cst_25 [1] : vector<17x17xf32> to vector<17xf32>
    %49 = vector.shape_cast %48 : vector<17xf32> to vector<17x1xf32>
    %50 = tpu.reciprocal %49 {approx = true} : vector<17x1xf32> -> vector<17x1xf32>
    %51 = vector.broadcast %50 : vector<17x1xf32> to vector<17x17xf32>
    %52 = arith.mulf %47, %51 : vector<17x17xf32>
    %cst_26 = arith.constant dense<0.000000e+00> : vector<17x8xf32>
    %53 = tpu.matmul %52, %41, %cst_26 {dimension_numbers = #tpu.dot_dimension_numbers<[1], [0], [0], [1], [0, 0, 1, 1], [], []>} : vector<17x17xf32>, vector<17x8xf32>, vector<17x8xf32> -> vector<17x8xf32>
    %54 = vector.extract_strided_slice %38 {offsets = [0, 8], sizes = [17, 8], strides = [1, 1]} : vector<17x96xf32> to vector<17x8xf32>
    %55 = vector.extract_strided_slice %38 {offsets = [0, 40], sizes = [17, 8], strides = [1, 1]} : vector<17x96xf32> to vector<17x8xf32>
    %56 = vector.extract_strided_slice %38 {offsets = [0, 72], sizes = [17, 8], strides = [1, 1]} : vector<17x96xf32> to vector<17x8xf32>
    %cst_27 = arith.constant dense<0.000000e+00> : vector<17x17xf32>
    %57 = tpu.matmul %54, %55, %cst_27 {dimension_numbers = #tpu.dot_dimension_numbers<[1], [1], [0], [0], [0, 0, 1, 0], [], []>} : vector<17x8xf32>, vector<17x8xf32>, vector<17x17xf32> -> vector<17x17xf32>
    %cst_28 = arith.constant dense<0xFF800000> : vector<17xf32>
    %58 = vector.multi_reduction <maximumf>, %57, %cst_28 [1] : vector<17x17xf32> to vector<17xf32>
    %59 = vector.shape_cast %58 : vector<17xf32> to vector<17x1xf32>
    %60 = vector.broadcast %59 : vector<17x1xf32> to vector<17x17xf32>
    %61 = arith.subf %57, %60 : vector<17x17xf32>
    %62 = math.exp %61 : vector<17x17xf32>
    %cst_29 = arith.constant dense<0.000000e+00> : vector<17xf32>
    %63 = vector.multi_reduction <add>, %62, %cst_29 [1] : vector<17x17xf32> to vector<17xf32>
    %64 = vector.shape_cast %63 : vector<17xf32> to vector<17x1xf32>
    %65 = tpu.reciprocal %64 {approx = true} : vector<17x1xf32> -> vector<17x1xf32>
    %66 = vector.broadcast %65 : vector<17x1xf32> to vector<17x17xf32>
    %67 = arith.mulf %62, %66 : vector<17x17xf32>
    %cst_30 = arith.constant dense<0.000000e+00> : vector<17x8xf32>
    %68 = tpu.matmul %67, %56, %cst_30 {dimension_numbers = #tpu.dot_dimension_numbers<[1], [0], [0], [1], [0, 0, 1, 1], [], []>} : vector<17x17xf32>, vector<17x8xf32>, vector<17x8xf32> -> vector<17x8xf32>
    %69 = vector.extract_strided_slice %38 {offsets = [0, 16], sizes = [17, 8], strides = [1, 1]} : vector<17x96xf32> to vector<17x8xf32>
    %70 = vector.extract_strided_slice %38 {offsets = [0, 48], sizes = [17, 8], strides = [1, 1]} : vector<17x96xf32> to vector<17x8xf32>
    %71 = vector.extract_strided_slice %38 {offsets = [0, 80], sizes = [17, 8], strides = [1, 1]} : vector<17x96xf32> to vector<17x8xf32>
    %cst_31 = arith.constant dense<0.000000e+00> : vector<17x17xf32>
    %72 = tpu.matmul %69, %70, %cst_31 {dimension_numbers = #tpu.dot_dimension_numbers<[1], [1], [0], [0], [0, 0, 1, 0], [], []>} : vector<17x8xf32>, vector<17x8xf32>, vector<17x17xf32> -> vector<17x17xf32>
    %cst_32 = arith.constant dense<0xFF800000> : vector<17xf32>
    %73 = vector.multi_reduction <maximumf>, %72, %cst_32 [1] : vector<17x17xf32> to vector<17xf32>
    %74 = vector.shape_cast %73 : vector<17xf32> to vector<17x1xf32>
    %75 = vector.broadcast %74 : vector<17x1xf32> to vector<17x17xf32>
    %76 = arith.subf %72, %75 : vector<17x17xf32>
    %77 = math.exp %76 : vector<17x17xf32>
    %cst_33 = arith.constant dense<0.000000e+00> : vector<17xf32>
    %78 = vector.multi_reduction <add>, %77, %cst_33 [1] : vector<17x17xf32> to vector<17xf32>
    %79 = vector.shape_cast %78 : vector<17xf32> to vector<17x1xf32>
    %80 = tpu.reciprocal %79 {approx = true} : vector<17x1xf32> -> vector<17x1xf32>
    %81 = vector.broadcast %80 : vector<17x1xf32> to vector<17x17xf32>
    %82 = arith.mulf %77, %81 : vector<17x17xf32>
    %cst_34 = arith.constant dense<0.000000e+00> : vector<17x8xf32>
    %83 = tpu.matmul %82, %71, %cst_34 {dimension_numbers = #tpu.dot_dimension_numbers<[1], [0], [0], [1], [0, 0, 1, 1], [], []>} : vector<17x17xf32>, vector<17x8xf32>, vector<17x8xf32> -> vector<17x8xf32>
    %84 = vector.extract_strided_slice %38 {offsets = [0, 24], sizes = [17, 8], strides = [1, 1]} : vector<17x96xf32> to vector<17x8xf32>
    %85 = vector.extract_strided_slice %38 {offsets = [0, 56], sizes = [17, 8], strides = [1, 1]} : vector<17x96xf32> to vector<17x8xf32>
    %86 = vector.extract_strided_slice %38 {offsets = [0, 88], sizes = [17, 8], strides = [1, 1]} : vector<17x96xf32> to vector<17x8xf32>
    %cst_35 = arith.constant dense<0.000000e+00> : vector<17x17xf32>
    %87 = tpu.matmul %84, %85, %cst_35 {dimension_numbers = #tpu.dot_dimension_numbers<[1], [1], [0], [0], [0, 0, 1, 0], [], []>} : vector<17x8xf32>, vector<17x8xf32>, vector<17x17xf32> -> vector<17x17xf32>
    %cst_36 = arith.constant dense<0xFF800000> : vector<17xf32>
    %88 = vector.multi_reduction <maximumf>, %87, %cst_36 [1] : vector<17x17xf32> to vector<17xf32>
    %89 = vector.shape_cast %88 : vector<17xf32> to vector<17x1xf32>
    %90 = vector.broadcast %89 : vector<17x1xf32> to vector<17x17xf32>
    %91 = arith.subf %87, %90 : vector<17x17xf32>
    %92 = math.exp %91 : vector<17x17xf32>
    %cst_37 = arith.constant dense<0.000000e+00> : vector<17xf32>
    %93 = vector.multi_reduction <add>, %92, %cst_37 [1] : vector<17x17xf32> to vector<17xf32>
    %94 = vector.shape_cast %93 : vector<17xf32> to vector<17x1xf32>
    %95 = tpu.reciprocal %94 {approx = true} : vector<17x1xf32> -> vector<17x1xf32>
    %96 = vector.broadcast %95 : vector<17x1xf32> to vector<17x17xf32>
    %97 = arith.mulf %92, %96 : vector<17x17xf32>
    %cst_38 = arith.constant dense<0.000000e+00> : vector<17x8xf32>
    %98 = tpu.matmul %97, %86, %cst_38 {dimension_numbers = #tpu.dot_dimension_numbers<[1], [0], [0], [1], [0, 0, 1, 1], [], []>} : vector<17x17xf32>, vector<17x8xf32>, vector<17x8xf32> -> vector<17x8xf32>
    %99 = tpu.concatenate %53, %68, %83, %98 in 1 : vector<17x8xf32>, vector<17x8xf32>, vector<17x8xf32>, vector<17x8xf32> -> vector<17x32xf32>
    %100 = vector.extract_strided_slice %37 {offsets = [17, 0], sizes = [17, 96], strides = [1, 1]} : vector<34x96xf32> to vector<17x96xf32>
    %101 = vector.extract_strided_slice %100 {offsets = [0, 0], sizes = [17, 8], strides = [1, 1]} : vector<17x96xf32> to vector<17x8xf32>
    %102 = vector.extract_strided_slice %100 {offsets = [0, 32], sizes = [17, 8], strides = [1, 1]} : vector<17x96xf32> to vector<17x8xf32>
    %103 = vector.extract_strided_slice %100 {offsets = [0, 64], sizes = [17, 8], strides = [1, 1]} : vector<17x96xf32> to vector<17x8xf32>
    %cst_39 = arith.constant dense<0.000000e+00> : vector<17x17xf32>
    %104 = tpu.matmul %101, %102, %cst_39 {dimension_numbers = #tpu.dot_dimension_numbers<[1], [1], [0], [0], [0, 0, 1, 0], [], []>} : vector<17x8xf32>, vector<17x8xf32>, vector<17x17xf32> -> vector<17x17xf32>
    %cst_40 = arith.constant dense<0xFF800000> : vector<17xf32>
    %105 = vector.multi_reduction <maximumf>, %104, %cst_40 [1] : vector<17x17xf32> to vector<17xf32>
    %106 = vector.shape_cast %105 : vector<17xf32> to vector<17x1xf32>
    %107 = vector.broadcast %106 : vector<17x1xf32> to vector<17x17xf32>
    %108 = arith.subf %104, %107 : vector<17x17xf32>
    %109 = math.exp %108 : vector<17x17xf32>
    %cst_41 = arith.constant dense<0.000000e+00> : vector<17xf32>
    %110 = vector.multi_reduction <add>, %109, %cst_41 [1] : vector<17x17xf32> to vector<17xf32>
    %111 = vector.shape_cast %110 : vector<17xf32> to vector<17x1xf32>
    %112 = tpu.reciprocal %111 {approx = true} : vector<17x1xf32> -> vector<17x1xf32>
    %113 = vector.broadcast %112 : vector<17x1xf32> to vector<17x17xf32>
    %114 = arith.mulf %109, %113 : vector<17x17xf32>
    %cst_42 = arith.constant dense<0.000000e+00> : vector<17x8xf32>
    %115 = tpu.matmul %114, %103, %cst_42 {dimension_numbers = #tpu.dot_dimension_numbers<[1], [0], [0], [1], [0, 0, 1, 1], [], []>} : vector<17x17xf32>, vector<17x8xf32>, vector<17x8xf32> -> vector<17x8xf32>
    %116 = vector.extract_strided_slice %100 {offsets = [0, 8], sizes = [17, 8], strides = [1, 1]} : vector<17x96xf32> to vector<17x8xf32>
    %117 = vector.extract_strided_slice %100 {offsets = [0, 40], sizes = [17, 8], strides = [1, 1]} : vector<17x96xf32> to vector<17x8xf32>
    %118 = vector.extract_strided_slice %100 {offsets = [0, 72], sizes = [17, 8], strides = [1, 1]} : vector<17x96xf32> to vector<17x8xf32>
    %cst_43 = arith.constant dense<0.000000e+00> : vector<17x17xf32>
    %119 = tpu.matmul %116, %117, %cst_43 {dimension_numbers = #tpu.dot_dimension_numbers<[1], [1], [0], [0], [0, 0, 1, 0], [], []>} : vector<17x8xf32>, vector<17x8xf32>, vector<17x17xf32> -> vector<17x17xf32>
    %cst_44 = arith.constant dense<0xFF800000> : vector<17xf32>
    %120 = vector.multi_reduction <maximumf>, %119, %cst_44 [1] : vector<17x17xf32> to vector<17xf32>
    %121 = vector.shape_cast %120 : vector<17xf32> to vector<17x1xf32>
    %122 = vector.broadcast %121 : vector<17x1xf32> to vector<17x17xf32>
    %123 = arith.subf %119, %122 : vector<17x17xf32>
    %124 = math.exp %123 : vector<17x17xf32>
    %cst_45 = arith.constant dense<0.000000e+00> : vector<17xf32>
    %125 = vector.multi_reduction <add>, %124, %cst_45 [1] : vector<17x17xf32> to vector<17xf32>
    %126 = vector.shape_cast %125 : vector<17xf32> to vector<17x1xf32>
    %127 = tpu.reciprocal %126 {approx = true} : vector<17x1xf32> -> vector<17x1xf32>
    %128 = vector.broadcast %127 : vector<17x1xf32> to vector<17x17xf32>
    %129 = arith.mulf %124, %128 : vector<17x17xf32>
    %cst_46 = arith.constant dense<0.000000e+00> : vector<17x8xf32>
    %130 = tpu.matmul %129, %118, %cst_46 {dimension_numbers = #tpu.dot_dimension_numbers<[1], [0], [0], [1], [0, 0, 1, 1], [], []>} : vector<17x17xf32>, vector<17x8xf32>, vector<17x8xf32> -> vector<17x8xf32>
    %131 = vector.extract_strided_slice %100 {offsets = [0, 16], sizes = [17, 8], strides = [1, 1]} : vector<17x96xf32> to vector<17x8xf32>
    %132 = vector.extract_strided_slice %100 {offsets = [0, 48], sizes = [17, 8], strides = [1, 1]} : vector<17x96xf32> to vector<17x8xf32>
    %133 = vector.extract_strided_slice %100 {offsets = [0, 80], sizes = [17, 8], strides = [1, 1]} : vector<17x96xf32> to vector<17x8xf32>
    %cst_47 = arith.constant dense<0.000000e+00> : vector<17x17xf32>
    %134 = tpu.matmul %131, %132, %cst_47 {dimension_numbers = #tpu.dot_dimension_numbers<[1], [1], [0], [0], [0, 0, 1, 0], [], []>} : vector<17x8xf32>, vector<17x8xf32>, vector<17x17xf32> -> vector<17x17xf32>
    %cst_48 = arith.constant dense<0xFF800000> : vector<17xf32>
    %135 = vector.multi_reduction <maximumf>, %134, %cst_48 [1] : vector<17x17xf32> to vector<17xf32>
    %136 = vector.shape_cast %135 : vector<17xf32> to vector<17x1xf32>
    %137 = vector.broadcast %136 : vector<17x1xf32> to vector<17x17xf32>
    %138 = arith.subf %134, %137 : vector<17x17xf32>
    %139 = math.exp %138 : vector<17x17xf32>
    %cst_49 = arith.constant dense<0.000000e+00> : vector<17xf32>
    %140 = vector.multi_reduction <add>, %139, %cst_49 [1] : vector<17x17xf32> to vector<17xf32>
    %141 = vector.shape_cast %140 : vector<17xf32> to vector<17x1xf32>
    %142 = tpu.reciprocal %141 {approx = true} : vector<17x1xf32> -> vector<17x1xf32>
    %143 = vector.broadcast %142 : vector<17x1xf32> to vector<17x17xf32>
    %144 = arith.mulf %139, %143 : vector<17x17xf32>
    %cst_50 = arith.constant dense<0.000000e+00> : vector<17x8xf32>
    %145 = tpu.matmul %144, %133, %cst_50 {dimension_numbers = #tpu.dot_dimension_numbers<[1], [0], [0], [1], [0, 0, 1, 1], [], []>} : vector<17x17xf32>, vector<17x8xf32>, vector<17x8xf32> -> vector<17x8xf32>
    %146 = vector.extract_strided_slice %100 {offsets = [0, 24], sizes = [17, 8], strides = [1, 1]} : vector<17x96xf32> to vector<17x8xf32>
    %147 = vector.extract_strided_slice %100 {offsets = [0, 56], sizes = [17, 8], strides = [1, 1]} : vector<17x96xf32> to vector<17x8xf32>
    %148 = vector.extract_strided_slice %100 {offsets = [0, 88], sizes = [17, 8], strides = [1, 1]} : vector<17x96xf32> to vector<17x8xf32>
    %cst_51 = arith.constant dense<0.000000e+00> : vector<17x17xf32>
    %149 = tpu.matmul %146, %147, %cst_51 {dimension_numbers = #tpu.dot_dimension_numbers<[1], [1], [0], [0], [0, 0, 1, 0], [], []>} : vector<17x8xf32>, vector<17x8xf32>, vector<17x17xf32> -> vector<17x17xf32>
    %cst_52 = arith.constant dense<0xFF800000> : vector<17xf32>
    %150 = vector.multi_reduction <maximumf>, %149, %cst_52 [1] : vector<17x17xf32> to vector<17xf32>
    %151 = vector.shape_cast %150 : vector<17xf32> to vector<17x1xf32>
    %152 = vector.broadcast %151 : vector<17x1xf32> to vector<17x17xf32>
    %153 = arith.subf %149, %152 : vector<17x17xf32>
    %154 = math.exp %153 : vector<17x17xf32>
    %cst_53 = arith.constant dense<0.000000e+00> : vector<17xf32>
    %155 = vector.multi_reduction <add>, %154, %cst_53 [1] : vector<17x17xf32> to vector<17xf32>
    %156 = vector.shape_cast %155 : vector<17xf32> to vector<17x1xf32>
    %157 = tpu.reciprocal %156 {approx = true} : vector<17x1xf32> -> vector<17x1xf32>
    %158 = vector.broadcast %157 : vector<17x1xf32> to vector<17x17xf32>
    %159 = arith.mulf %154, %158 : vector<17x17xf32>
    %cst_54 = arith.constant dense<0.000000e+00> : vector<17x8xf32>
    %160 = tpu.matmul %159, %148, %cst_54 {dimension_numbers = #tpu.dot_dimension_numbers<[1], [0], [0], [1], [0, 0, 1, 1], [], []>} : vector<17x17xf32>, vector<17x8xf32>, vector<17x8xf32> -> vector<17x8xf32>
    %161 = tpu.concatenate %115, %130, %145, %160 in 1 : vector<17x8xf32>, vector<17x8xf32>, vector<17x8xf32>, vector<17x8xf32> -> vector<17x32xf32>
    %162 = tpu.concatenate %99, %161 in 0 : vector<17x32xf32>, vector<17x32xf32> -> vector<34x32xf32>
    %c0_55 = arith.constant 0 : index
    %c0_56 = arith.constant 0 : index
    %c0_57 = arith.constant 0 : index
    %163 = vector.load %arg7[%c0_55, %c0_56, %c0_57] : memref<2x32x32xf32, #tpu.memory_space<vmem>>, vector<1x32x32xf32>
    %164 = vector.shape_cast %163 : vector<1x32x32xf32> to vector<32x32xf32>
    %cst_58 = arith.constant dense<0.000000e+00> : vector<34x32xf32>
    %165 = tpu.matmul %162, %164, %cst_58 {dimension_numbers = #tpu.dot_dimension_numbers<[1], [0], [0], [1], [0, 0, 1, 1], [], []>} : vector<34x32xf32>, vector<32x32xf32>, vector<34x32xf32> -> vector<34x32xf32>
    %166 = arith.addf %4, %165 : vector<34x32xf32>
    %c0_59 = arith.constant 0 : index
    %c0_60 = arith.constant 0 : index
    %c0_61 = arith.constant 0 : index
    %167 = vector.load %arg8[%c0_59, %c0_60, %c0_61] : memref<2x1x32xf32, #tpu.memory_space<vmem>>, vector<1x1x32xf32>
    %168 = vector.shape_cast %167 : vector<1x1x32xf32> to vector<1x32xf32>
    %169 = vector.broadcast %168 : vector<1x32xf32> to vector<34x32xf32>
    %170 = arith.addf %166, %169 : vector<34x32xf32>
    %c0_62 = arith.constant 0 : index
    %c0_63 = arith.constant 0 : index
    %c0_64 = arith.constant 0 : index
    %171 = vector.load %arg9[%c0_62, %c0_63, %c0_64] : memref<2x1x32xf32, #tpu.memory_space<vmem>>, vector<1x1x32xf32>
    %172 = vector.shape_cast %171 : vector<1x1x32xf32> to vector<1x32xf32>
    %c0_65 = arith.constant 0 : index
    %c0_66 = arith.constant 0 : index
    %c0_67 = arith.constant 0 : index
    %173 = vector.load %arg10[%c0_65, %c0_66, %c0_67] : memref<2x1x32xf32, #tpu.memory_space<vmem>>, vector<1x1x32xf32>
    %174 = vector.shape_cast %173 : vector<1x1x32xf32> to vector<1x32xf32>
    %cst_68 = arith.constant dense<0.000000e+00> : vector<34xf32>
    %175 = vector.multi_reduction <add>, %170, %cst_68 [1] : vector<34x32xf32> to vector<34xf32>
    %176 = vector.shape_cast %175 : vector<34xf32> to vector<34x1xf32>
    %cst_69 = arith.constant 3.200000e+01 : f32
    %177 = vector.broadcast %cst_69 : f32 to vector<34x1xf32>
    %178 = arith.divf %176, %177 : vector<34x1xf32>
    %179 = vector.broadcast %178 : vector<34x1xf32> to vector<34x32xf32>
    %180 = arith.subf %170, %179 : vector<34x32xf32>
    %181 = arith.mulf %180, %180 : vector<34x32xf32>
    %cst_70 = arith.constant dense<0.000000e+00> : vector<34xf32>
    %182 = vector.multi_reduction <add>, %181, %cst_70 [1] : vector<34x32xf32> to vector<34xf32>
    %183 = vector.shape_cast %182 : vector<34xf32> to vector<34x1xf32>
    %cst_71 = arith.constant 3.200000e+01 : f32
    %184 = vector.broadcast %cst_71 : f32 to vector<34x1xf32>
    %185 = arith.divf %183, %184 : vector<34x1xf32>
    %186 = vector.broadcast %178 : vector<34x1xf32> to vector<34x32xf32>
    %187 = arith.subf %170, %186 : vector<34x32xf32>
    %cst_72 = arith.constant 9.99999997E-7 : f32
    %188 = vector.broadcast %cst_72 : f32 to vector<34x1xf32>
    %189 = arith.addf %185, %188 : vector<34x1xf32>
    %190 = math.rsqrt %189 : vector<34x1xf32>
    %191 = vector.broadcast %190 : vector<34x1xf32> to vector<34x32xf32>
    %192 = arith.mulf %187, %191 : vector<34x32xf32>
    %193 = vector.broadcast %172 : vector<1x32xf32> to vector<34x32xf32>
    %194 = arith.mulf %192, %193 : vector<34x32xf32>
    %195 = vector.broadcast %174 : vector<1x32xf32> to vector<34x32xf32>
    %196 = arith.addf %194, %195 : vector<34x32xf32>
    %c0_73 = arith.constant 0 : index
    %c0_74 = arith.constant 0 : index
    %c0_75 = arith.constant 0 : index
    %197 = vector.load %arg11[%c0_73, %c0_74, %c0_75] : memref<2x32x128xf32, #tpu.memory_space<vmem>>, vector<1x32x128xf32>
    %198 = vector.shape_cast %197 : vector<1x32x128xf32> to vector<32x128xf32>
    %cst_76 = arith.constant dense<0.000000e+00> : vector<34x128xf32>
    %199 = tpu.matmul %196, %198, %cst_76 {dimension_numbers = #tpu.dot_dimension_numbers<[1], [0], [0], [1], [0, 0, 1, 1], [], []>} : vector<34x32xf32>, vector<32x128xf32>, vector<34x128xf32> -> vector<34x128xf32>
    %c0_77 = arith.constant 0 : index
    %c0_78 = arith.constant 0 : index
    %c0_79 = arith.constant 0 : index
    %200 = vector.load %arg12[%c0_77, %c0_78, %c0_79] : memref<2x1x128xf32, #tpu.memory_space<vmem>>, vector<1x1x128xf32>
    %201 = vector.shape_cast %200 : vector<1x1x128xf32> to vector<1x128xf32>
    %202 = vector.broadcast %201 : vector<1x128xf32> to vector<34x128xf32>
    %203 = arith.addf %199, %202 : vector<34x128xf32>
    %204 = arith.mulf %203, %203 : vector<34x128xf32>
    %205 = arith.mulf %203, %204 : vector<34x128xf32>
    %cst_80 = arith.constant 4.471500e-02 : f32
    %206 = vector.broadcast %cst_80 : f32 to vector<34x128xf32>
    %207 = arith.mulf %206, %205 : vector<34x128xf32>
    %208 = arith.addf %203, %207 : vector<34x128xf32>
    %cst_81 = arith.constant 0.797884583 : f32
    %209 = vector.broadcast %cst_81 : f32 to vector<34x128xf32>
    %210 = arith.mulf %209, %208 : vector<34x128xf32>
    %211 = math.tanh %210 : vector<34x128xf32>
    %cst_82 = arith.constant 1.000000e+00 : f32
    %212 = vector.broadcast %cst_82 : f32 to vector<34x128xf32>
    %213 = arith.addf %212, %211 : vector<34x128xf32>
    %cst_83 = arith.constant 5.000000e-01 : f32
    %214 = vector.broadcast %cst_83 : f32 to vector<34x128xf32>
    %215 = arith.mulf %214, %213 : vector<34x128xf32>
    %216 = arith.mulf %203, %215 : vector<34x128xf32>
    %c0_84 = arith.constant 0 : index
    %c0_85 = arith.constant 0 : index
    %c0_86 = arith.constant 0 : index
    %217 = vector.load %arg13[%c0_84, %c0_85, %c0_86] : memref<2x128x32xf32, #tpu.memory_space<vmem>>, vector<1x128x32xf32>
    %218 = vector.shape_cast %217 : vector<1x128x32xf32> to vector<128x32xf32>
    %cst_87 = arith.constant dense<0.000000e+00> : vector<34x32xf32>
    %219 = tpu.matmul %216, %218, %cst_87 {dimension_numbers = #tpu.dot_dimension_numbers<[1], [0], [0], [1], [0, 0, 1, 1], [], []>} : vector<34x128xf32>, vector<128x32xf32>, vector<34x32xf32> -> vector<34x32xf32>
    %220 = arith.addf %170, %219 : vector<34x32xf32>
    %c0_88 = arith.constant 0 : index
    %c0_89 = arith.constant 0 : index
    %c0_90 = arith.constant 0 : index
    %221 = vector.load %arg14[%c0_88, %c0_89, %c0_90] : memref<2x1x32xf32, #tpu.memory_space<vmem>>, vector<1x1x32xf32>
    %222 = vector.shape_cast %221 : vector<1x1x32xf32> to vector<1x32xf32>
    %223 = vector.broadcast %222 : vector<1x32xf32> to vector<34x32xf32>
    %224 = arith.addf %220, %223 : vector<34x32xf32>
    %c1 = arith.constant 1 : index
    %c0_91 = arith.constant 0 : index
    %c0_92 = arith.constant 0 : index
    %225 = vector.load %arg3[%c1, %c0_91, %c0_92] : memref<2x1x32xf32, #tpu.memory_space<vmem>>, vector<1x1x32xf32>
    %226 = vector.shape_cast %225 : vector<1x1x32xf32> to vector<1x32xf32>
    %c1_93 = arith.constant 1 : index
    %c0_94 = arith.constant 0 : index
    %c0_95 = arith.constant 0 : index
    %227 = vector.load %arg4[%c1_93, %c0_94, %c0_95] : memref<2x1x32xf32, #tpu.memory_space<vmem>>, vector<1x1x32xf32>
    %228 = vector.shape_cast %227 : vector<1x1x32xf32> to vector<1x32xf32>
    %cst_96 = arith.constant dense<0.000000e+00> : vector<34xf32>
    %229 = vector.multi_reduction <add>, %224, %cst_96 [1] : vector<34x32xf32> to vector<34xf32>
    %230 = vector.shape_cast %229 : vector<34xf32> to vector<34x1xf32>
    %cst_97 = arith.constant 3.200000e+01 : f32
    %231 = vector.broadcast %cst_97 : f32 to vector<34x1xf32>
    %232 = arith.divf %230, %231 : vector<34x1xf32>
    %233 = vector.broadcast %232 : vector<34x1xf32> to vector<34x32xf32>
    %234 = arith.subf %224, %233 : vector<34x32xf32>
    %235 = arith.mulf %234, %234 : vector<34x32xf32>
    %cst_98 = arith.constant dense<0.000000e+00> : vector<34xf32>
    %236 = vector.multi_reduction <add>, %235, %cst_98 [1] : vector<34x32xf32> to vector<34xf32>
    %237 = vector.shape_cast %236 : vector<34xf32> to vector<34x1xf32>
    %cst_99 = arith.constant 3.200000e+01 : f32
    %238 = vector.broadcast %cst_99 : f32 to vector<34x1xf32>
    %239 = arith.divf %237, %238 : vector<34x1xf32>
    %240 = vector.broadcast %232 : vector<34x1xf32> to vector<34x32xf32>
    %241 = arith.subf %224, %240 : vector<34x32xf32>
    %cst_100 = arith.constant 9.99999997E-7 : f32
    %242 = vector.broadcast %cst_100 : f32 to vector<34x1xf32>
    %243 = arith.addf %239, %242 : vector<34x1xf32>
    %244 = math.rsqrt %243 : vector<34x1xf32>
    %245 = vector.broadcast %244 : vector<34x1xf32> to vector<34x32xf32>
    %246 = arith.mulf %241, %245 : vector<34x32xf32>
    %247 = vector.broadcast %226 : vector<1x32xf32> to vector<34x32xf32>
    %248 = arith.mulf %246, %247 : vector<34x32xf32>
    %249 = vector.broadcast %228 : vector<1x32xf32> to vector<34x32xf32>
    %250 = arith.addf %248, %249 : vector<34x32xf32>
    %c1_101 = arith.constant 1 : index
    %c0_102 = arith.constant 0 : index
    %c0_103 = arith.constant 0 : index
    %251 = vector.load %arg5[%c1_101, %c0_102, %c0_103] : memref<2x32x96xf32, #tpu.memory_space<vmem>>, vector<1x32x96xf32>
    %252 = vector.shape_cast %251 : vector<1x32x96xf32> to vector<32x96xf32>
    %cst_104 = arith.constant dense<0.000000e+00> : vector<34x96xf32>
    %253 = tpu.matmul %250, %252, %cst_104 {dimension_numbers = #tpu.dot_dimension_numbers<[1], [0], [0], [1], [0, 0, 1, 1], [], []>} : vector<34x32xf32>, vector<32x96xf32>, vector<34x96xf32> -> vector<34x96xf32>
    %c1_105 = arith.constant 1 : index
    %c0_106 = arith.constant 0 : index
    %c0_107 = arith.constant 0 : index
    %254 = vector.load %arg6[%c1_105, %c0_106, %c0_107] : memref<2x1x96xf32, #tpu.memory_space<vmem>>, vector<1x1x96xf32>
    %255 = vector.shape_cast %254 : vector<1x1x96xf32> to vector<1x96xf32>
    %256 = vector.broadcast %255 : vector<1x96xf32> to vector<34x96xf32>
    %257 = arith.addf %253, %256 : vector<34x96xf32>
    %258 = vector.extract_strided_slice %257 {offsets = [0, 0], sizes = [17, 96], strides = [1, 1]} : vector<34x96xf32> to vector<17x96xf32>
    %259 = vector.extract_strided_slice %258 {offsets = [0, 0], sizes = [17, 8], strides = [1, 1]} : vector<17x96xf32> to vector<17x8xf32>
    %260 = vector.extract_strided_slice %258 {offsets = [0, 32], sizes = [17, 8], strides = [1, 1]} : vector<17x96xf32> to vector<17x8xf32>
    %261 = vector.extract_strided_slice %258 {offsets = [0, 64], sizes = [17, 8], strides = [1, 1]} : vector<17x96xf32> to vector<17x8xf32>
    %cst_108 = arith.constant dense<0.000000e+00> : vector<17x17xf32>
    %262 = tpu.matmul %259, %260, %cst_108 {dimension_numbers = #tpu.dot_dimension_numbers<[1], [1], [0], [0], [0, 0, 1, 0], [], []>} : vector<17x8xf32>, vector<17x8xf32>, vector<17x17xf32> -> vector<17x17xf32>
    %cst_109 = arith.constant dense<0xFF800000> : vector<17xf32>
    %263 = vector.multi_reduction <maximumf>, %262, %cst_109 [1] : vector<17x17xf32> to vector<17xf32>
    %264 = vector.shape_cast %263 : vector<17xf32> to vector<17x1xf32>
    %265 = vector.broadcast %264 : vector<17x1xf32> to vector<17x17xf32>
    %266 = arith.subf %262, %265 : vector<17x17xf32>
    %267 = math.exp %266 : vector<17x17xf32>
    %cst_110 = arith.constant dense<0.000000e+00> : vector<17xf32>
    %268 = vector.multi_reduction <add>, %267, %cst_110 [1] : vector<17x17xf32> to vector<17xf32>
    %269 = vector.shape_cast %268 : vector<17xf32> to vector<17x1xf32>
    %270 = tpu.reciprocal %269 {approx = true} : vector<17x1xf32> -> vector<17x1xf32>
    %271 = vector.broadcast %270 : vector<17x1xf32> to vector<17x17xf32>
    %272 = arith.mulf %267, %271 : vector<17x17xf32>
    %cst_111 = arith.constant dense<0.000000e+00> : vector<17x8xf32>
    %273 = tpu.matmul %272, %261, %cst_111 {dimension_numbers = #tpu.dot_dimension_numbers<[1], [0], [0], [1], [0, 0, 1, 1], [], []>} : vector<17x17xf32>, vector<17x8xf32>, vector<17x8xf32> -> vector<17x8xf32>
    %274 = vector.extract_strided_slice %258 {offsets = [0, 8], sizes = [17, 8], strides = [1, 1]} : vector<17x96xf32> to vector<17x8xf32>
    %275 = vector.extract_strided_slice %258 {offsets = [0, 40], sizes = [17, 8], strides = [1, 1]} : vector<17x96xf32> to vector<17x8xf32>
    %276 = vector.extract_strided_slice %258 {offsets = [0, 72], sizes = [17, 8], strides = [1, 1]} : vector<17x96xf32> to vector<17x8xf32>
    %cst_112 = arith.constant dense<0.000000e+00> : vector<17x17xf32>
    %277 = tpu.matmul %274, %275, %cst_112 {dimension_numbers = #tpu.dot_dimension_numbers<[1], [1], [0], [0], [0, 0, 1, 0], [], []>} : vector<17x8xf32>, vector<17x8xf32>, vector<17x17xf32> -> vector<17x17xf32>
    %cst_113 = arith.constant dense<0xFF800000> : vector<17xf32>
    %278 = vector.multi_reduction <maximumf>, %277, %cst_113 [1] : vector<17x17xf32> to vector<17xf32>
    %279 = vector.shape_cast %278 : vector<17xf32> to vector<17x1xf32>
    %280 = vector.broadcast %279 : vector<17x1xf32> to vector<17x17xf32>
    %281 = arith.subf %277, %280 : vector<17x17xf32>
    %282 = math.exp %281 : vector<17x17xf32>
    %cst_114 = arith.constant dense<0.000000e+00> : vector<17xf32>
    %283 = vector.multi_reduction <add>, %282, %cst_114 [1] : vector<17x17xf32> to vector<17xf32>
    %284 = vector.shape_cast %283 : vector<17xf32> to vector<17x1xf32>
    %285 = tpu.reciprocal %284 {approx = true} : vector<17x1xf32> -> vector<17x1xf32>
    %286 = vector.broadcast %285 : vector<17x1xf32> to vector<17x17xf32>
    %287 = arith.mulf %282, %286 : vector<17x17xf32>
    %cst_115 = arith.constant dense<0.000000e+00> : vector<17x8xf32>
    %288 = tpu.matmul %287, %276, %cst_115 {dimension_numbers = #tpu.dot_dimension_numbers<[1], [0], [0], [1], [0, 0, 1, 1], [], []>} : vector<17x17xf32>, vector<17x8xf32>, vector<17x8xf32> -> vector<17x8xf32>
    %289 = vector.extract_strided_slice %258 {offsets = [0, 16], sizes = [17, 8], strides = [1, 1]} : vector<17x96xf32> to vector<17x8xf32>
    %290 = vector.extract_strided_slice %258 {offsets = [0, 48], sizes = [17, 8], strides = [1, 1]} : vector<17x96xf32> to vector<17x8xf32>
    %291 = vector.extract_strided_slice %258 {offsets = [0, 80], sizes = [17, 8], strides = [1, 1]} : vector<17x96xf32> to vector<17x8xf32>
    %cst_116 = arith.constant dense<0.000000e+00> : vector<17x17xf32>
    %292 = tpu.matmul %289, %290, %cst_116 {dimension_numbers = #tpu.dot_dimension_numbers<[1], [1], [0], [0], [0, 0, 1, 0], [], []>} : vector<17x8xf32>, vector<17x8xf32>, vector<17x17xf32> -> vector<17x17xf32>
    %cst_117 = arith.constant dense<0xFF800000> : vector<17xf32>
    %293 = vector.multi_reduction <maximumf>, %292, %cst_117 [1] : vector<17x17xf32> to vector<17xf32>
    %294 = vector.shape_cast %293 : vector<17xf32> to vector<17x1xf32>
    %295 = vector.broadcast %294 : vector<17x1xf32> to vector<17x17xf32>
    %296 = arith.subf %292, %295 : vector<17x17xf32>
    %297 = math.exp %296 : vector<17x17xf32>
    %cst_118 = arith.constant dense<0.000000e+00> : vector<17xf32>
    %298 = vector.multi_reduction <add>, %297, %cst_118 [1] : vector<17x17xf32> to vector<17xf32>
    %299 = vector.shape_cast %298 : vector<17xf32> to vector<17x1xf32>
    %300 = tpu.reciprocal %299 {approx = true} : vector<17x1xf32> -> vector<17x1xf32>
    %301 = vector.broadcast %300 : vector<17x1xf32> to vector<17x17xf32>
    %302 = arith.mulf %297, %301 : vector<17x17xf32>
    %cst_119 = arith.constant dense<0.000000e+00> : vector<17x8xf32>
    %303 = tpu.matmul %302, %291, %cst_119 {dimension_numbers = #tpu.dot_dimension_numbers<[1], [0], [0], [1], [0, 0, 1, 1], [], []>} : vector<17x17xf32>, vector<17x8xf32>, vector<17x8xf32> -> vector<17x8xf32>
    %304 = vector.extract_strided_slice %258 {offsets = [0, 24], sizes = [17, 8], strides = [1, 1]} : vector<17x96xf32> to vector<17x8xf32>
    %305 = vector.extract_strided_slice %258 {offsets = [0, 56], sizes = [17, 8], strides = [1, 1]} : vector<17x96xf32> to vector<17x8xf32>
    %306 = vector.extract_strided_slice %258 {offsets = [0, 88], sizes = [17, 8], strides = [1, 1]} : vector<17x96xf32> to vector<17x8xf32>
    %cst_120 = arith.constant dense<0.000000e+00> : vector<17x17xf32>
    %307 = tpu.matmul %304, %305, %cst_120 {dimension_numbers = #tpu.dot_dimension_numbers<[1], [1], [0], [0], [0, 0, 1, 0], [], []>} : vector<17x8xf32>, vector<17x8xf32>, vector<17x17xf32> -> vector<17x17xf32>
    %cst_121 = arith.constant dense<0xFF800000> : vector<17xf32>
    %308 = vector.multi_reduction <maximumf>, %307, %cst_121 [1] : vector<17x17xf32> to vector<17xf32>
    %309 = vector.shape_cast %308 : vector<17xf32> to vector<17x1xf32>
    %310 = vector.broadcast %309 : vector<17x1xf32> to vector<17x17xf32>
    %311 = arith.subf %307, %310 : vector<17x17xf32>
    %312 = math.exp %311 : vector<17x17xf32>
    %cst_122 = arith.constant dense<0.000000e+00> : vector<17xf32>
    %313 = vector.multi_reduction <add>, %312, %cst_122 [1] : vector<17x17xf32> to vector<17xf32>
    %314 = vector.shape_cast %313 : vector<17xf32> to vector<17x1xf32>
    %315 = tpu.reciprocal %314 {approx = true} : vector<17x1xf32> -> vector<17x1xf32>
    %316 = vector.broadcast %315 : vector<17x1xf32> to vector<17x17xf32>
    %317 = arith.mulf %312, %316 : vector<17x17xf32>
    %cst_123 = arith.constant dense<0.000000e+00> : vector<17x8xf32>
    %318 = tpu.matmul %317, %306, %cst_123 {dimension_numbers = #tpu.dot_dimension_numbers<[1], [0], [0], [1], [0, 0, 1, 1], [], []>} : vector<17x17xf32>, vector<17x8xf32>, vector<17x8xf32> -> vector<17x8xf32>
    %319 = tpu.concatenate %273, %288, %303, %318 in 1 : vector<17x8xf32>, vector<17x8xf32>, vector<17x8xf32>, vector<17x8xf32> -> vector<17x32xf32>
    %320 = vector.extract_strided_slice %257 {offsets = [17, 0], sizes = [17, 96], strides = [1, 1]} : vector<34x96xf32> to vector<17x96xf32>
    %321 = vector.extract_strided_slice %320 {offsets = [0, 0], sizes = [17, 8], strides = [1, 1]} : vector<17x96xf32> to vector<17x8xf32>
    %322 = vector.extract_strided_slice %320 {offsets = [0, 32], sizes = [17, 8], strides = [1, 1]} : vector<17x96xf32> to vector<17x8xf32>
    %323 = vector.extract_strided_slice %320 {offsets = [0, 64], sizes = [17, 8], strides = [1, 1]} : vector<17x96xf32> to vector<17x8xf32>
    %cst_124 = arith.constant dense<0.000000e+00> : vector<17x17xf32>
    %324 = tpu.matmul %321, %322, %cst_124 {dimension_numbers = #tpu.dot_dimension_numbers<[1], [1], [0], [0], [0, 0, 1, 0], [], []>} : vector<17x8xf32>, vector<17x8xf32>, vector<17x17xf32> -> vector<17x17xf32>
    %cst_125 = arith.constant dense<0xFF800000> : vector<17xf32>
    %325 = vector.multi_reduction <maximumf>, %324, %cst_125 [1] : vector<17x17xf32> to vector<17xf32>
    %326 = vector.shape_cast %325 : vector<17xf32> to vector<17x1xf32>
    %327 = vector.broadcast %326 : vector<17x1xf32> to vector<17x17xf32>
    %328 = arith.subf %324, %327 : vector<17x17xf32>
    %329 = math.exp %328 : vector<17x17xf32>
    %cst_126 = arith.constant dense<0.000000e+00> : vector<17xf32>
    %330 = vector.multi_reduction <add>, %329, %cst_126 [1] : vector<17x17xf32> to vector<17xf32>
    %331 = vector.shape_cast %330 : vector<17xf32> to vector<17x1xf32>
    %332 = tpu.reciprocal %331 {approx = true} : vector<17x1xf32> -> vector<17x1xf32>
    %333 = vector.broadcast %332 : vector<17x1xf32> to vector<17x17xf32>
    %334 = arith.mulf %329, %333 : vector<17x17xf32>
    %cst_127 = arith.constant dense<0.000000e+00> : vector<17x8xf32>
    %335 = tpu.matmul %334, %323, %cst_127 {dimension_numbers = #tpu.dot_dimension_numbers<[1], [0], [0], [1], [0, 0, 1, 1], [], []>} : vector<17x17xf32>, vector<17x8xf32>, vector<17x8xf32> -> vector<17x8xf32>
    %336 = vector.extract_strided_slice %320 {offsets = [0, 8], sizes = [17, 8], strides = [1, 1]} : vector<17x96xf32> to vector<17x8xf32>
    %337 = vector.extract_strided_slice %320 {offsets = [0, 40], sizes = [17, 8], strides = [1, 1]} : vector<17x96xf32> to vector<17x8xf32>
    %338 = vector.extract_strided_slice %320 {offsets = [0, 72], sizes = [17, 8], strides = [1, 1]} : vector<17x96xf32> to vector<17x8xf32>
    %cst_128 = arith.constant dense<0.000000e+00> : vector<17x17xf32>
    %339 = tpu.matmul %336, %337, %cst_128 {dimension_numbers = #tpu.dot_dimension_numbers<[1], [1], [0], [0], [0, 0, 1, 0], [], []>} : vector<17x8xf32>, vector<17x8xf32>, vector<17x17xf32> -> vector<17x17xf32>
    %cst_129 = arith.constant dense<0xFF800000> : vector<17xf32>
    %340 = vector.multi_reduction <maximumf>, %339, %cst_129 [1] : vector<17x17xf32> to vector<17xf32>
    %341 = vector.shape_cast %340 : vector<17xf32> to vector<17x1xf32>
    %342 = vector.broadcast %341 : vector<17x1xf32> to vector<17x17xf32>
    %343 = arith.subf %339, %342 : vector<17x17xf32>
    %344 = math.exp %343 : vector<17x17xf32>
    %cst_130 = arith.constant dense<0.000000e+00> : vector<17xf32>
    %345 = vector.multi_reduction <add>, %344, %cst_130 [1] : vector<17x17xf32> to vector<17xf32>
    %346 = vector.shape_cast %345 : vector<17xf32> to vector<17x1xf32>
    %347 = tpu.reciprocal %346 {approx = true} : vector<17x1xf32> -> vector<17x1xf32>
    %348 = vector.broadcast %347 : vector<17x1xf32> to vector<17x17xf32>
    %349 = arith.mulf %344, %348 : vector<17x17xf32>
    %cst_131 = arith.constant dense<0.000000e+00> : vector<17x8xf32>
    %350 = tpu.matmul %349, %338, %cst_131 {dimension_numbers = #tpu.dot_dimension_numbers<[1], [0], [0], [1], [0, 0, 1, 1], [], []>} : vector<17x17xf32>, vector<17x8xf32>, vector<17x8xf32> -> vector<17x8xf32>
    %351 = vector.extract_strided_slice %320 {offsets = [0, 16], sizes = [17, 8], strides = [1, 1]} : vector<17x96xf32> to vector<17x8xf32>
    %352 = vector.extract_strided_slice %320 {offsets = [0, 48], sizes = [17, 8], strides = [1, 1]} : vector<17x96xf32> to vector<17x8xf32>
    %353 = vector.extract_strided_slice %320 {offsets = [0, 80], sizes = [17, 8], strides = [1, 1]} : vector<17x96xf32> to vector<17x8xf32>
    %cst_132 = arith.constant dense<0.000000e+00> : vector<17x17xf32>
    %354 = tpu.matmul %351, %352, %cst_132 {dimension_numbers = #tpu.dot_dimension_numbers<[1], [1], [0], [0], [0, 0, 1, 0], [], []>} : vector<17x8xf32>, vector<17x8xf32>, vector<17x17xf32> -> vector<17x17xf32>
    %cst_133 = arith.constant dense<0xFF800000> : vector<17xf32>
    %355 = vector.multi_reduction <maximumf>, %354, %cst_133 [1] : vector<17x17xf32> to vector<17xf32>
    %356 = vector.shape_cast %355 : vector<17xf32> to vector<17x1xf32>
    %357 = vector.broadcast %356 : vector<17x1xf32> to vector<17x17xf32>
    %358 = arith.subf %354, %357 : vector<17x17xf32>
    %359 = math.exp %358 : vector<17x17xf32>
    %cst_134 = arith.constant dense<0.000000e+00> : vector<17xf32>
    %360 = vector.multi_reduction <add>, %359, %cst_134 [1] : vector<17x17xf32> to vector<17xf32>
    %361 = vector.shape_cast %360 : vector<17xf32> to vector<17x1xf32>
    %362 = tpu.reciprocal %361 {approx = true} : vector<17x1xf32> -> vector<17x1xf32>
    %363 = vector.broadcast %362 : vector<17x1xf32> to vector<17x17xf32>
    %364 = arith.mulf %359, %363 : vector<17x17xf32>
    %cst_135 = arith.constant dense<0.000000e+00> : vector<17x8xf32>
    %365 = tpu.matmul %364, %353, %cst_135 {dimension_numbers = #tpu.dot_dimension_numbers<[1], [0], [0], [1], [0, 0, 1, 1], [], []>} : vector<17x17xf32>, vector<17x8xf32>, vector<17x8xf32> -> vector<17x8xf32>
    %366 = vector.extract_strided_slice %320 {offsets = [0, 24], sizes = [17, 8], strides = [1, 1]} : vector<17x96xf32> to vector<17x8xf32>
    %367 = vector.extract_strided_slice %320 {offsets = [0, 56], sizes = [17, 8], strides = [1, 1]} : vector<17x96xf32> to vector<17x8xf32>
    %368 = vector.extract_strided_slice %320 {offsets = [0, 88], sizes = [17, 8], strides = [1, 1]} : vector<17x96xf32> to vector<17x8xf32>
    %cst_136 = arith.constant dense<0.000000e+00> : vector<17x17xf32>
    %369 = tpu.matmul %366, %367, %cst_136 {dimension_numbers = #tpu.dot_dimension_numbers<[1], [1], [0], [0], [0, 0, 1, 0], [], []>} : vector<17x8xf32>, vector<17x8xf32>, vector<17x17xf32> -> vector<17x17xf32>
    %cst_137 = arith.constant dense<0xFF800000> : vector<17xf32>
    %370 = vector.multi_reduction <maximumf>, %369, %cst_137 [1] : vector<17x17xf32> to vector<17xf32>
    %371 = vector.shape_cast %370 : vector<17xf32> to vector<17x1xf32>
    %372 = vector.broadcast %371 : vector<17x1xf32> to vector<17x17xf32>
    %373 = arith.subf %369, %372 : vector<17x17xf32>
    %374 = math.exp %373 : vector<17x17xf32>
    %cst_138 = arith.constant dense<0.000000e+00> : vector<17xf32>
    %375 = vector.multi_reduction <add>, %374, %cst_138 [1] : vector<17x17xf32> to vector<17xf32>
    %376 = vector.shape_cast %375 : vector<17xf32> to vector<17x1xf32>
    %377 = tpu.reciprocal %376 {approx = true} : vector<17x1xf32> -> vector<17x1xf32>
    %378 = vector.broadcast %377 : vector<17x1xf32> to vector<17x17xf32>
    %379 = arith.mulf %374, %378 : vector<17x17xf32>
    %cst_139 = arith.constant dense<0.000000e+00> : vector<17x8xf32>
    %380 = tpu.matmul %379, %368, %cst_139 {dimension_numbers = #tpu.dot_dimension_numbers<[1], [0], [0], [1], [0, 0, 1, 1], [], []>} : vector<17x17xf32>, vector<17x8xf32>, vector<17x8xf32> -> vector<17x8xf32>
    %381 = tpu.concatenate %335, %350, %365, %380 in 1 : vector<17x8xf32>, vector<17x8xf32>, vector<17x8xf32>, vector<17x8xf32> -> vector<17x32xf32>
    %382 = tpu.concatenate %319, %381 in 0 : vector<17x32xf32>, vector<17x32xf32> -> vector<34x32xf32>
    %c1_140 = arith.constant 1 : index
    %c0_141 = arith.constant 0 : index
    %c0_142 = arith.constant 0 : index
    %383 = vector.load %arg7[%c1_140, %c0_141, %c0_142] : memref<2x32x32xf32, #tpu.memory_space<vmem>>, vector<1x32x32xf32>
    %384 = vector.shape_cast %383 : vector<1x32x32xf32> to vector<32x32xf32>
    %cst_143 = arith.constant dense<0.000000e+00> : vector<34x32xf32>
    %385 = tpu.matmul %382, %384, %cst_143 {dimension_numbers = #tpu.dot_dimension_numbers<[1], [0], [0], [1], [0, 0, 1, 1], [], []>} : vector<34x32xf32>, vector<32x32xf32>, vector<34x32xf32> -> vector<34x32xf32>
    %386 = arith.addf %224, %385 : vector<34x32xf32>
    %c1_144 = arith.constant 1 : index
    %c0_145 = arith.constant 0 : index
    %c0_146 = arith.constant 0 : index
    %387 = vector.load %arg8[%c1_144, %c0_145, %c0_146] : memref<2x1x32xf32, #tpu.memory_space<vmem>>, vector<1x1x32xf32>
    %388 = vector.shape_cast %387 : vector<1x1x32xf32> to vector<1x32xf32>
    %389 = vector.broadcast %388 : vector<1x32xf32> to vector<34x32xf32>
    %390 = arith.addf %386, %389 : vector<34x32xf32>
    %c1_147 = arith.constant 1 : index
    %c0_148 = arith.constant 0 : index
    %c0_149 = arith.constant 0 : index
    %391 = vector.load %arg9[%c1_147, %c0_148, %c0_149] : memref<2x1x32xf32, #tpu.memory_space<vmem>>, vector<1x1x32xf32>
    %392 = vector.shape_cast %391 : vector<1x1x32xf32> to vector<1x32xf32>
    %c1_150 = arith.constant 1 : index
    %c0_151 = arith.constant 0 : index
    %c0_152 = arith.constant 0 : index
    %393 = vector.load %arg10[%c1_150, %c0_151, %c0_152] : memref<2x1x32xf32, #tpu.memory_space<vmem>>, vector<1x1x32xf32>
    %394 = vector.shape_cast %393 : vector<1x1x32xf32> to vector<1x32xf32>
    %cst_153 = arith.constant dense<0.000000e+00> : vector<34xf32>
    %395 = vector.multi_reduction <add>, %390, %cst_153 [1] : vector<34x32xf32> to vector<34xf32>
    %396 = vector.shape_cast %395 : vector<34xf32> to vector<34x1xf32>
    %cst_154 = arith.constant 3.200000e+01 : f32
    %397 = vector.broadcast %cst_154 : f32 to vector<34x1xf32>
    %398 = arith.divf %396, %397 : vector<34x1xf32>
    %399 = vector.broadcast %398 : vector<34x1xf32> to vector<34x32xf32>
    %400 = arith.subf %390, %399 : vector<34x32xf32>
    %401 = arith.mulf %400, %400 : vector<34x32xf32>
    %cst_155 = arith.constant dense<0.000000e+00> : vector<34xf32>
    %402 = vector.multi_reduction <add>, %401, %cst_155 [1] : vector<34x32xf32> to vector<34xf32>
    %403 = vector.shape_cast %402 : vector<34xf32> to vector<34x1xf32>
    %cst_156 = arith.constant 3.200000e+01 : f32
    %404 = vector.broadcast %cst_156 : f32 to vector<34x1xf32>
    %405 = arith.divf %403, %404 : vector<34x1xf32>
    %406 = vector.broadcast %398 : vector<34x1xf32> to vector<34x32xf32>
    %407 = arith.subf %390, %406 : vector<34x32xf32>
    %cst_157 = arith.constant 9.99999997E-7 : f32
    %408 = vector.broadcast %cst_157 : f32 to vector<34x1xf32>
    %409 = arith.addf %405, %408 : vector<34x1xf32>
    %410 = math.rsqrt %409 : vector<34x1xf32>
    %411 = vector.broadcast %410 : vector<34x1xf32> to vector<34x32xf32>
    %412 = arith.mulf %407, %411 : vector<34x32xf32>
    %413 = vector.broadcast %392 : vector<1x32xf32> to vector<34x32xf32>
    %414 = arith.mulf %412, %413 : vector<34x32xf32>
    %415 = vector.broadcast %394 : vector<1x32xf32> to vector<34x32xf32>
    %416 = arith.addf %414, %415 : vector<34x32xf32>
    %c1_158 = arith.constant 1 : index
    %c0_159 = arith.constant 0 : index
    %c0_160 = arith.constant 0 : index
    %417 = vector.load %arg11[%c1_158, %c0_159, %c0_160] : memref<2x32x128xf32, #tpu.memory_space<vmem>>, vector<1x32x128xf32>
    %418 = vector.shape_cast %417 : vector<1x32x128xf32> to vector<32x128xf32>
    %cst_161 = arith.constant dense<0.000000e+00> : vector<34x128xf32>
    %419 = tpu.matmul %416, %418, %cst_161 {dimension_numbers = #tpu.dot_dimension_numbers<[1], [0], [0], [1], [0, 0, 1, 1], [], []>} : vector<34x32xf32>, vector<32x128xf32>, vector<34x128xf32> -> vector<34x128xf32>
    %c1_162 = arith.constant 1 : index
    %c0_163 = arith.constant 0 : index
    %c0_164 = arith.constant 0 : index
    %420 = vector.load %arg12[%c1_162, %c0_163, %c0_164] : memref<2x1x128xf32, #tpu.memory_space<vmem>>, vector<1x1x128xf32>
    %421 = vector.shape_cast %420 : vector<1x1x128xf32> to vector<1x128xf32>
    %422 = vector.broadcast %421 : vector<1x128xf32> to vector<34x128xf32>
    %423 = arith.addf %419, %422 : vector<34x128xf32>
    %424 = arith.mulf %423, %423 : vector<34x128xf32>
    %425 = arith.mulf %423, %424 : vector<34x128xf32>
    %cst_165 = arith.constant 4.471500e-02 : f32
    %426 = vector.broadcast %cst_165 : f32 to vector<34x128xf32>
    %427 = arith.mulf %426, %425 : vector<34x128xf32>
    %428 = arith.addf %423, %427 : vector<34x128xf32>
    %cst_166 = arith.constant 0.797884583 : f32
    %429 = vector.broadcast %cst_166 : f32 to vector<34x128xf32>
    %430 = arith.mulf %429, %428 : vector<34x128xf32>
    %431 = math.tanh %430 : vector<34x128xf32>
    %cst_167 = arith.constant 1.000000e+00 : f32
    %432 = vector.broadcast %cst_167 : f32 to vector<34x128xf32>
    %433 = arith.addf %432, %431 : vector<34x128xf32>
    %cst_168 = arith.constant 5.000000e-01 : f32
    %434 = vector.broadcast %cst_168 : f32 to vector<34x128xf32>
    %435 = arith.mulf %434, %433 : vector<34x128xf32>
    %436 = arith.mulf %423, %435 : vector<34x128xf32>
    %c1_169 = arith.constant 1 : index
    %c0_170 = arith.constant 0 : index
    %c0_171 = arith.constant 0 : index
    %437 = vector.load %arg13[%c1_169, %c0_170, %c0_171] : memref<2x128x32xf32, #tpu.memory_space<vmem>>, vector<1x128x32xf32>
    %438 = vector.shape_cast %437 : vector<1x128x32xf32> to vector<128x32xf32>
    %cst_172 = arith.constant dense<0.000000e+00> : vector<34x32xf32>
    %439 = tpu.matmul %436, %438, %cst_172 {dimension_numbers = #tpu.dot_dimension_numbers<[1], [0], [0], [1], [0, 0, 1, 1], [], []>} : vector<34x128xf32>, vector<128x32xf32>, vector<34x32xf32> -> vector<34x32xf32>
    %440 = arith.addf %390, %439 : vector<34x32xf32>
    %c1_173 = arith.constant 1 : index
    %c0_174 = arith.constant 0 : index
    %c0_175 = arith.constant 0 : index
    %441 = vector.load %arg14[%c1_173, %c0_174, %c0_175] : memref<2x1x32xf32, #tpu.memory_space<vmem>>, vector<1x1x32xf32>
    %442 = vector.shape_cast %441 : vector<1x1x32xf32> to vector<1x32xf32>
    %443 = vector.broadcast %442 : vector<1x32xf32> to vector<34x32xf32>
    %444 = arith.addf %440, %443 : vector<34x32xf32>
    %445 = vector.extract_strided_slice %444 {offsets = [0, 0], sizes = [1, 32], strides = [1, 1]} : vector<34x32xf32> to vector<1x32xf32>
    %446 = vector.extract_strided_slice %444 {offsets = [17, 0], sizes = [1, 32], strides = [1, 1]} : vector<34x32xf32> to vector<1x32xf32>
    %447 = tpu.concatenate %445, %446 in 0 : vector<1x32xf32>, vector<1x32xf32> -> vector<2x32xf32>
    %c0_176 = arith.constant 0 : index
    %c0_177 = arith.constant 0 : index
    %448 = vector.load %arg15[%c0_176, %c0_177] : memref<1x32xf32, #tpu.memory_space<vmem>>, vector<1x32xf32>
    %c0_178 = arith.constant 0 : index
    %c0_179 = arith.constant 0 : index
    %449 = vector.load %arg16[%c0_178, %c0_179] : memref<1x32xf32, #tpu.memory_space<vmem>>, vector<1x32xf32>
    %cst_180 = arith.constant dense<0.000000e+00> : vector<2xf32>
    %450 = vector.multi_reduction <add>, %447, %cst_180 [1] : vector<2x32xf32> to vector<2xf32>
    %451 = vector.shape_cast %450 : vector<2xf32> to vector<2x1xf32>
    %cst_181 = arith.constant 3.200000e+01 : f32
    %452 = vector.broadcast %cst_181 : f32 to vector<2x1xf32>
    %453 = arith.divf %451, %452 : vector<2x1xf32>
    %454 = vector.broadcast %453 : vector<2x1xf32> to vector<2x32xf32>
    %455 = arith.subf %447, %454 : vector<2x32xf32>
    %456 = arith.mulf %455, %455 : vector<2x32xf32>
    %cst_182 = arith.constant dense<0.000000e+00> : vector<2xf32>
    %457 = vector.multi_reduction <add>, %456, %cst_182 [1] : vector<2x32xf32> to vector<2xf32>
    %458 = vector.shape_cast %457 : vector<2xf32> to vector<2x1xf32>
    %cst_183 = arith.constant 3.200000e+01 : f32
    %459 = vector.broadcast %cst_183 : f32 to vector<2x1xf32>
    %460 = arith.divf %458, %459 : vector<2x1xf32>
    %461 = vector.broadcast %453 : vector<2x1xf32> to vector<2x32xf32>
    %462 = arith.subf %447, %461 : vector<2x32xf32>
    %cst_184 = arith.constant 9.99999997E-7 : f32
    %463 = vector.broadcast %cst_184 : f32 to vector<2x1xf32>
    %464 = arith.addf %460, %463 : vector<2x1xf32>
    %465 = math.rsqrt %464 : vector<2x1xf32>
    %466 = vector.broadcast %465 : vector<2x1xf32> to vector<2x32xf32>
    %467 = arith.mulf %462, %466 : vector<2x32xf32>
    %468 = vector.broadcast %448 : vector<1x32xf32> to vector<2x32xf32>
    %469 = arith.mulf %467, %468 : vector<2x32xf32>
    %470 = vector.broadcast %449 : vector<1x32xf32> to vector<2x32xf32>
    %471 = arith.addf %469, %470 : vector<2x32xf32>
    %c0_185 = arith.constant 0 : index
    %c0_186 = arith.constant 0 : index
    %472 = vector.load %arg17[%c0_185, %c0_186] : memref<32x32xf32, #tpu.memory_space<vmem>>, vector<32x32xf32>
    %cst_187 = arith.constant dense<0.000000e+00> : vector<2x32xf32>
    %473 = tpu.matmul %471, %472, %cst_187 {dimension_numbers = #tpu.dot_dimension_numbers<[1], [0], [0], [1], [0, 0, 1, 1], [], []>} : vector<2x32xf32>, vector<32x32xf32>, vector<2x32xf32> -> vector<2x32xf32>
    %c0_188 = arith.constant 0 : index
    %c0_189 = arith.constant 0 : index
    %474 = vector.load %arg18[%c0_188, %c0_189] : memref<1x32xf32, #tpu.memory_space<vmem>>, vector<1x32xf32>
    %475 = vector.broadcast %474 : vector<1x32xf32> to vector<2x32xf32>
    %476 = arith.addf %473, %475 : vector<2x32xf32>
    %477 = math.tanh %476 : vector<2x32xf32>
    %c0_190 = arith.constant 0 : index
    %c0_191 = arith.constant 0 : index
    %478 = vector.load %arg19[%c0_190, %c0_191] : memref<32x512xf32, #tpu.memory_space<vmem>>, vector<32x512xf32>
    %cst_192 = arith.constant dense<0.000000e+00> : vector<2x512xf32>
    %479 = tpu.matmul %477, %478, %cst_192 {dimension_numbers = #tpu.dot_dimension_numbers<[1], [0], [0], [1], [0, 0, 1, 1], [], []>} : vector<2x32xf32>, vector<32x512xf32>, vector<2x512xf32> -> vector<2x512xf32>
    %c0_193 = arith.constant 0 : index
    %c0_194 = arith.constant 0 : index
    %480 = vector.load %arg20[%c0_193, %c0_194] : memref<1x512xf32, #tpu.memory_space<vmem>>, vector<1x512xf32>
    %481 = vector.broadcast %480 : vector<1x512xf32> to vector<2x512xf32>
    %482 = arith.addf %479, %481 : vector<2x512xf32>
    %cst_195 = arith.constant 0.000000e+00 : f32
    %483 = vector.broadcast %cst_195 : f32 to vector<2x512xf32>
    %484 = arith.maximumf %482, %483 : vector<2x512xf32>
    %c0_196 = arith.constant 0 : index
    %c0_197 = arith.constant 0 : index
    %485 = vector.load %arg21[%c0_196, %c0_197] : memref<512x256xf32, #tpu.memory_space<vmem>>, vector<512x256xf32>
    %cst_198 = arith.constant dense<0.000000e+00> : vector<2x256xf32>
    %486 = tpu.matmul %484, %485, %cst_198 {dimension_numbers = #tpu.dot_dimension_numbers<[1], [0], [0], [1], [0, 0, 1, 1], [], []>} : vector<2x512xf32>, vector<512x256xf32>, vector<2x256xf32> -> vector<2x256xf32>
    %c0_199 = arith.constant 0 : index
    %c0_200 = arith.constant 0 : index
    %487 = vector.load %arg22[%c0_199, %c0_200] : memref<1x256xf32, #tpu.memory_space<vmem>>, vector<1x256xf32>
    %488 = vector.broadcast %487 : vector<1x256xf32> to vector<2x256xf32>
    %489 = arith.addf %486, %488 : vector<2x256xf32>
    %cst_201 = arith.constant 0.000000e+00 : f32
    %490 = vector.broadcast %cst_201 : f32 to vector<2x256xf32>
    %491 = arith.maximumf %489, %490 : vector<2x256xf32>
    %c0_202 = arith.constant 0 : index
    %c0_203 = arith.constant 0 : index
    %492 = vector.load %arg23[%c0_202, %c0_203] : memref<256x128xf32, #tpu.memory_space<vmem>>, vector<256x128xf32>
    %cst_204 = arith.constant dense<0.000000e+00> : vector<2x128xf32>
    %493 = tpu.matmul %491, %492, %cst_204 {dimension_numbers = #tpu.dot_dimension_numbers<[1], [0], [0], [1], [0, 0, 1, 1], [], []>} : vector<2x256xf32>, vector<256x128xf32>, vector<2x128xf32> -> vector<2x128xf32>
    %c0_205 = arith.constant 0 : index
    %c0_206 = arith.constant 0 : index
    %494 = vector.load %arg24[%c0_205, %c0_206] : memref<1x128xf32, #tpu.memory_space<vmem>>, vector<1x128xf32>
    %495 = vector.broadcast %494 : vector<1x128xf32> to vector<2x128xf32>
    %496 = arith.addf %493, %495 : vector<2x128xf32>
    %497 = arith.negf %496 : vector<2x128xf32>
    %498 = math.exp %497 : vector<2x128xf32>
    %cst_207 = arith.constant 1.000000e+00 : f32
    %499 = vector.broadcast %cst_207 : f32 to vector<2x128xf32>
    %500 = arith.addf %499, %498 : vector<2x128xf32>
    %501 = arith.divf %499, %500 : vector<2x128xf32>
    %c0_208 = arith.constant 0 : index
    %c0_209 = arith.constant 0 : index
    %502 = vector.load %arg25[%c0_208, %c0_209] : memref<2x128xf32, #tpu.memory_space<vmem>>, vector<2x128xf32>
    tpu.vector_store %arg25[%c0_208, %c0_209], %501 {strides = array<i32>} : memref<2x128xf32, #tpu.memory_space<vmem>>, vector<2x128xf32>,
    return
  }
}

</mosaic_0001>

<bundles_post_ra>
// kernel: tile.9
= control target key start
LH: loop header
LB: loop body
LE: loop exit
PB: predicated region body
PF: predicated region fallthrough
CT: control target
= control target key end

     0   :  { %vm3_vm0 = vcmask 261120   ;;  %s11_s6 = smov 3  ;;  %s74_s0 = inlined_call_operand.vmem [shape: f32[2,17,32], index: 0, kind: input, shape index: {}]   ;;  %s75_s1 = inlined_call_operand.vmem [shape: f32[34,32], index: 1, kind: output, shape index: {}]  }
   0x1   :  { %v2_v0 = vld [vmem:[%s74_s0] sm:$0xff]   ;;  %v26_v1 = vld [vmem:[%s74_s0 + $0x8] sm:$0xff]  }
   0x2   :  { %v28_v2 = vld [vmem:[%s74_s0 + $0x10] ss:$8 sm:%s11_s6]   ;;  %4 = vst.msk [vmem:[%s75_s1] sm:$0xff] %vm3_vm0, %v2_v0   ;;  %27 = vst.msk [vmem:[%s75_s1 + $0x8] sm:$0xff] %vm3_vm0, %v26_v1  }
   0x3   :  { %29 = vst.msk [vmem:[%s75_s1 + $0x10] sm:$0x3] %vm3_vm0, %v28_v2   ;;  %v30_v3 = vld [vmem:[%s74_s0 + $0x19] sm:$0xff]   ;;  %v32_v4 = vld [vmem:[%s74_s0 + $0x21] sm:$0xff]  }
   0x4   :  { %31 = vst.msk [vmem:[%s75_s1 + $0x12] sm:$0xff] %vm3_vm0, %v30_v3   ;;  %33 = vst.msk [vmem:[%s75_s1 + $0x1a] sm:$0xff] %vm3_vm0, %v32_v4  }

// kernel: galaxy_sommelier_forward.1
= control target key start
LH: loop header
LB: loop body
LE: loop exit
PB: predicated region body
PF: predicated region fallthrough
CT: control target
= control target key end

     0   :  { %s10796_s0 = inlined_call_operand.vmem [shape: f32[34,48], index: 0, kind: input, shape index: {}]   ;;  %s10797_s1 = inlined_call_operand.vmem [shape: f32[34,32], index: 1, kind: input, shape index: {}]   ;;  %s10798_s2 = inlined_call_operand.vmem [shape: f32[48,32], index: 2, kind: input, shape index: {}]   ;;  %s10799_s3 = inlined_call_operand.vmem [shape: f32[2,1,32], index: 3, kind: input, shape index: {}]   ;;  %s10800_s4 = inlined_call_operand.vmem [shape: f32[2,1,32], index: 4, kind: input, shape index: {}]   ;;  %s10801_s5 = inlined_call_operand.vmem [shape: f32[2,32,96], index: 5, kind: input, shape index: {}]   ;;  %s10802_s6 = inlined_call_operand.vmem [shape: f32[2,1,96], index: 6, kind: input, shape index: {}]   ;;  %s10803_s7 = inlined_call_operand.vmem [shape: f32[2,32,32], index: 7, kind: input, shape index: {}]   ;;  %s10804_s8 = inlined_call_operand.vmem [shape: f32[2,1,32], index: 8, kind: input, shape index: {}]   ;;  %s10805_s9 = inlined_call_operand.vmem [shape: f32[2,1,32], index: 9, kind: input, shape index: {}]   ;;  %s10806_s10 = inlined_call_operand.vmem [shape: f32[2,1,32], index: 10, kind: input, shape index: {}]   ;;  %s10807_s11 = inlined_call_operand.vmem [shape: f32[2,32,128], index: 11, kind: input, shape index: {}]   ;;  %s10808_s12 = inlined_call_operand.vmem [shape: f32[2,1,128], index: 12, kind: input, shape index: {}]   ;;  %s10809_s13 = inlined_call_operand.vmem [shape: f32[2,128,32], index: 13, kind: input, shape index: {}]   ;;  %s10810_s14 = inlined_call_operand.vmem [shape: f32[2,1,32], index: 14, kind: input, shape index: {}]   ;;  %s10811_s15 = inlined_call_operand.vmem [shape: f32[1,32], index: 15, kind: input, shape index: {}]   ;;  %s10812_s16 = inlined_call_operand.vmem [shape: f32[1,32], index: 16, kind: input, shape index: {}]   ;;  %s10813_s17 = inlined_call_operand.vmem [shape: f32[32,32], index: 17, kind: input, shape index: {}]   ;;  %s10814_s18 = inlined_call_operand.vmem [shape: f32[1,32], index: 18, kind: input, shape index: {}]   ;;  %s10815_s19 = inlined_call_operand.vmem [shape: f32[32,512], index: 19, kind: input, shape index: {}]   ;;  %s10816_s20 = inlined_call_operand.vmem [shape: f32[1,512], index: 20, kind: input, shape index: {}]   ;;  %s10817_s21 = inlined_call_operand.vmem [shape: f32[512,256], index: 21, kind: input, shape index: {}]   ;;  %s10818_s22 = inlined_call_operand.vmem [shape: f32[1,256], index: 22, kind: input, shape index: {}]   ;;  %s10819_s23 = inlined_call_operand.vmem [shape: f32[256,128], index: 23, kind: input, shape index: {}]   ;;  %s10820_s24 = inlined_call_operand.vmem [shape: f32[1,128], index: 24, kind: input, shape index: {}]   ;;  %s10821_s25 = inlined_call_operand.hbm [shape: f32[2,128], index: 25, kind: output, shape index: {}]  }
   0x1   :  { %10860 = sst [smem:[#allocation5_spill]] %s10796_s0 }
   0x2   :  { %10861 = sst [smem:[#allocation6_spill]] %s10797_s1 }
   0x3   :  { %10862 = sst [smem:[#allocation7_spill]] %s10798_s2 }
   0x4   :  { %10863 = sst [smem:[#allocation8_spill]] %s10799_s3 }
   0x5   :  { %10864 = sst [smem:[#allocation9_spill]] %s10800_s4 }
   0x6   :  { %10865 = sst [smem:[#allocation10_spill]] %s10801_s5 }
   0x7   :  { %10866 = sst [smem:[#allocation11_spill]] %s10802_s6 }
   0x8   :  { %10867 = sst [smem:[#allocation12_spill]] %s10803_s7 }
   0x9   :  { %10868 = sst [smem:[#allocation13_spill]] %s10804_s8 }
   0xa   :  { %10869 = sst [smem:[#allocation14_spill]] %s10805_s9 }
   0xb   :  { %s10870_s6 = sld [smem:[#allocation7_spill]]  ;;  %v7963_v1 = vmov 0.0  }
   0xc   :  { %6902 = vmatprep.subr.mxu0 %v7963_v1  ;;  %7652 = vmatprep.subr.mxu1 %v7963_v1 }
  0x11   :  { %v91_v0 = vld [vmem:[%s10870_s6 + $0x28] sm:$0xff]  ;;  %v90_v2 = vld [vmem:[%s10870_s6 + $0x20] sm:$0xff]  ;;  %v89_v3 = vld [vmem:[%s10870_s6 + $0x18] sm:$0xff] }
  0x12   :  { %6903 = vmatpush3.msra.mxu0 %v91_v0  ;;  %7658 = vmatpush3.msra.mxu1 %v91_v0 }
  0x13   :  { %6904 = vmatprep.subr.mxu0 %v7963_v1  ;;  %7653 = vmatprep.subr.mxu1 %v7963_v1 }
  0x14   :  { %6905 = vmatpush3.msra.mxu0 %v90_v2  ;;  %7659 = vmatpush3.msra.mxu1 %v90_v2 }
  0x15   :  { %30 = vsyncpa [#allocation3], 0  ;;  %6906 = vmatprep.subr.mxu0 %v7963_v1  ;;  %v88_v4 = vld [vmem:[%s10870_s6 + $0x10] sm:$0xff]  ;;  %7654 = vmatprep.subr.mxu1 %v7963_v1  ;;  %v87_v5 = vld [vmem:[%s10870_s6 + $0x8] sm:$0xff]  ;;  %vm7964_vm0 = vmmov 0   ;;  %s10871_s29 = sld [smem:[#allocation5_spill]] }
  0x16   :  { %6907 = vmatpush3.msra.mxu0 %v89_v3  ;;  %7660 = vmatpush3.msra.mxu1 %v89_v3  ;;  %v86_v6 = vld [vmem:[%s10870_s6] sm:$0xff]  ;;  %vm97_vm1 = vcmask 392192   ;;  %s10872_s28 = sld [smem:[#allocation6_spill]]  ;;  %vm205_vm2 = vcmask 261120   ;;  %vm218_vm3 = vcmask 254976   ;;  %s10858_s27 = smov 96  }
  0x17   :  { %6908 = vmatprep.subr.mxu0 %v7963_v1  ;;  %7655 = vmatprep.subr.mxu1 %v7963_v1  ;;  %s10873_s1 = sld [smem:[#allocation10_spill]]  ;;  %s10856_s4 = smov 88   ;;  %vm1405_vm4 = vcmask 1046528   ;;  %vm420_vm5 = vcmask 64512   ;;  %vm565_vm6 = vcmask 1040384   ;;  %vm513_vm7 = vcmask 138240  }
  0x18   :  { %6909 = vmatpush3.msra.mxu0 %v88_v4  ;;  %7661 = vmatpush3.msra.mxu1 %v88_v4  ;;  %s10874_s2 = sld [smem:[#allocation8_spill]]  ;;  %s10854_s9 = smov 80   ;;  %vm520_vm8 = vcmask 131072   ;;  %vm1395_vm9 = vcmask 130048   ;;  %vm1399_vm10 = vcmask 195584  }
  0x19   :  { %6910 = vmatprep.subr.mxu0 %v7963_v1  ;;  %6914 = vmatprep.mubr.msk.f32.mxu0 %vm7964_vm0, %v7963_v1  ;;  %s10875_s7 = sld [smem:[#allocation9_spill]]  ;;  %s10842_s5 = smov 112  }
  0x1a   :  { %6911 = vmatpush3.msra.mxu0 %v87_v5  ;;  %7656 = vmatprep.subr.mxu1 %v7963_v1  ;;  %s10876_s8 = sld [smem:[#allocation11_spill]]  ;;  %s10844_s0 = smov 72  }
  0x1b   :  { %v81_v7 = vld [vmem:[%s10871_s29] sm:$0xff]  ;;  %6912 = vmatprep.subr.mxu0 %v7963_v1  ;;  %7662 = vmatpush3.msra.mxu1 %v87_v5  ;;  %v84_v8 = vld [vmem:[%s10871_s29 + $0x18] sm:$0xff]  ;;  %v82_v9 = vld [vmem:[%s10871_s29 + $0x8] sm:$0xff]  ;;  %s10838_s6 = smov 64   ;;  %s10836_s30 = smov 56  }
  0x1c   :  { %6913 = vmatpush3.msra.mxu0 %v86_v6  ;;  %7657 = vmatprep.subr.mxu1 %v7963_v1  ;;  %v85_v10 = vld [vmem:[%s10871_s29 + $0x20] sm:$0x3]  ;;  %v83_v11 = vld [vmem:[%s10871_s29 + $0x10] sm:$0xff]  ;;  %v93_v17 = vld [vmem:[%s10872_s28 + $0x8] sm:$0xff]  ;;  %s10840_s29 = smov 104   ;;  %s10834_s3 = smov 48  }
  0x1d   :  { %6915 = vmatmul.mubr.msk.f32.vlgmr.msra.gmra.mxu0 %vm97_vm1, %v81_v7  ;;  %7663 = vmatpush3.msra.mxu1 %v86_v6  ;;  %v92_v12 = vld [vmem:[%s10872_s28] sm:$0xff]  ;;  %v95_v23 = vld [vmem:[%s10872_s28 + $0x18] sm:$0xff]  ;;  %v94_v26 = vld [vmem:[%s10872_s28 + $0x10] sm:$0xff]  ;;  %s10832_s26 = smov 40  }
  0x1e   :  { %6917 = vmatprep.mubr.msk.f32.mxu0 %vm7964_vm0, %v7963_v1  ;;  %6923 = vmatprep.mubr.msk.f32.mxu1 %vm7964_vm0, %v7963_v1  ;;  %v96_v21 = vld [vmem:[%s10872_s28 + $0x20] sm:$0x3]  ;;  %v298_v62 = vld [vmem:[%s10873_s1 + $0x18] sm:$0xff]  ;;  %v297_v63 = vld [vmem:[%s10873_s1 + $0x10] sm:$0xff]  ;;  %s10846_s28 = smov 120  }
  0x1f   :  { %6924 = vmatmul.mubr.msk.f32.vlgmr.msra.gmra.mxu1 %vm97_vm1, %v84_v8  ;;  %6929 = vmatprep.subr.mxu1 %v7963_v1  ;;  %v296_v0 = vld [vmem:[%s10873_s1 + $0x8] sm:$0xff]  ;;  %v295_v2 = vld [vmem:[%s10873_s1] sm:$0xff] }
  0x20   :  { %6926 = vmatprep.mubr.msk.f32.mxu1 %vm7964_vm0, %v7963_v1  ;;  %6967 = vmatprep.subr.mxu0 %v7963_v1 }
  0x21   :  { %6918 = vmatmul.mubr.msk.f32.gmra.mxu0 %vm97_vm1, %v82_v9  ;;  %6930 = vmatpush3.msra.mxu1 %v298_v62 }
  0x22   :  { %6920 = vmatprep.mubr.msk.f32.mxu0 %vm7964_vm0, %v7963_v1  ;;  %6931 = vmatprep.subr.mxu1 %v7963_v1 }
  0x23   :  { %6927 = vmatmul.mubr.msk.f32.gmra.mxu1 %vm97_vm1, %v85_v10 }
  0x24   :  { %6937 = vmatprep.mubr.msk.f32.mxu1 %vm7964_vm0, %v7963_v1  ;;  %6932 = vmatpush3.msra.mxu1 %v297_v63 }
  0x25   :  { %6921 = vmatmul.mubr.msk.f32.gmra.mxu0 %vm97_vm1, %v83_v11  ;;  %6933 = vmatprep.subr.mxu1 %v7963_v1 }
  0x26   :  { %6973 = vmatprep.mubr.msk.f32.mxu0 %vm7964_vm0, %v7963_v1  ;;  %6934 = vmatpush3.msra.mxu1 %v296_v0 }
  0x27   :  { %6935 = vmatprep.subr.mxu1 %v7963_v1 }
  0x28   :  { %6936 = vmatpush3.msra.mxu1 %v295_v2 }
  0x29   :  { %6952 = vmatprep.subr.mxu1 %v7963_v1 }
  0xdd   :  { %v179_v13 = vpop.f32.mrf.mxu0 }
  0xde   :  { %v8179_v14 = vadd.f32 %v179_v13, %v92_v12 }
  0xdf   :  { %v6916_v15 = vpop.f32.mrf.mxu0  ;;  %v194_v16 = vpop.f32.mrf.mxu1 }
  0xe0   :  { %v206_v18 = vsel %vm205_vm2, %v8179_v14, 0.0  ;;  %v8201_v31 = vadd.f32 %v194_v16, %v95_v23  ;;  %v6314_v23 = vld [vmem:[%s10875_s7] ss:$0 sm:$0xff] }
  0xe1   :  { %207 = vadd.xlane.f32.xlu0 %v206_v18  ;;  %v184_v19 = vpop.f32.mrf.mxu0  ;;  %v6925_v20 = vpop.f32.mrf.mxu1 }
  0xe2   :  { %v8189_v22 = vadd.f32 %v184_v19, %v93_v17  ;;  %v215_v36 = vsel %vm205_vm2, %v8201_v31, 0.0  ;;  %v6313_v20 = vld [vmem:[%s10874_s2] ss:$0 sm:$0xff] }
  0xe3   :  { %v6919_v24 = vpop.f32.mrf.mxu0  ;;  %v199_v25 = vpop.f32.mrf.mxu1 }
  0xe4   :  { %v8197_v27 = vadd.f32 %v199_v25, %v96_v21  ;;  %v209_v28 = vsel %vm205_vm2, %v8189_v22, 0.0 }
  0xe5   :  { %210 = vadd.xlane.f32.xlu0 %v209_v28  ;;  %v189_v29 = vpop.f32.mrf.mxu0  ;;  %v6928_v30 = vpop.f32.mrf.mxu1 }
  0xe6   :  { %v8203_v32 = vadd.f32 %v189_v29, %v94_v26  ;;  %v219_v33 = vsel %vm218_vm3, %v8197_v27, 0.0 }
  0xe7   :  { %v6922_v34 = vpop.f32.mrf.mxu0 }
  0xe8   :  { %v212_v35 = vsel %vm205_vm2, %v8203_v32, 0.0 }
  0xe9   :  { %220 = vadd.xlane.f32.xlu0 %v219_v33  ;;  %213 = vadd.xlane.f32.xlu1 %v212_v35 }
  0xed   :  { %216 = vadd.xlane.f32.xlu1 %v215_v36 }
 0x16a   :  { %v208_v37 = vpop.xlane.xlu0 %207 }
 0x16b   :  { %v223_v38 = vmul.f32 0.03125, %v208_v37 }
 0x16d   :  { %v228_v39 = vsub.f32 %v8179_v14, %v223_v38 }
 0x16e   :  { %v211_v40 = vpop.xlane.xlu0 %210 }
 0x16f   :  { %v224_v41 = vmul.f32 0.03125, %v211_v40  ;;  %v233_v42 = vmul.f32 %v228_v39, %v228_v39 }
 0x171   :  { %v8213_v43 = vsub.f32 %v8189_v22, %v224_v41  ;;  %v238_v44 = vsel %vm205_vm2, %v233_v42, 0.0 }
 0x172   :  { %v221_v45 = vpop.xlane.xlu0 %220  ;;  %239 = vadd.xlane.f32.xlu1 %v238_v44  ;;  %v214_v46 = vpop.xlane.xlu1 %213 }
 0x173   :  { %v227_v47 = vmul.f32 0.03125, %v221_v45  ;;  %v225_v48 = vmul.f32 0.03125, %v214_v46  ;;  %v234_v49 = vmul.f32 %v8213_v43, %v8213_v43 }
 0x175   :  { %v8219_v50 = vsub.f32 %v8197_v27, %v227_v47  ;;  %v230_v51 = vsub.f32 %v8203_v32, %v225_v48  ;;  %v241_v52 = vsel %vm205_vm2, %v234_v49, 0.0  ;;  %v6315_v47 = vld [vmem:[%s10876_s8] ss:$0 sm:$0xff] }
 0x176   :  { %242 = vadd.xlane.f32.xlu0 %v241_v52  ;;  %v217_v53 = vpop.xlane.xlu1 %216 }
 0x177   :  { %v226_v54 = vmul.f32 0.03125, %v217_v53  ;;  %v235_v55 = vmul.f32 %v230_v51, %v230_v51  ;;  %v237_v58 = vmul.f32 %v8219_v50, %v8219_v50 }
 0x179   :  { %v231_v56 = vsub.f32 %v8201_v31, %v226_v54  ;;  %v244_v57 = vsel %vm205_vm2, %v235_v55, 0.0  ;;  %v250_v60 = vsel %vm218_vm3, %v237_v58, 0.0 }
 0x17a   :  { %245 = vadd.xlane.f32.xlu1 %v244_v57 }
 0x17b   :  { %v236_v59 = vmul.f32 %v231_v56, %v231_v56 }
 0x17d   :  { %v247_v61 = vsel %vm205_vm2, %v236_v59, 0.0 }
 0x17e   :  { %251 = vadd.xlane.f32.xlu1 %v250_v60  ;;  %248 = vadd.xlane.f32.xlu0 %v247_v61 }
 0x1fb   :  { %v240_v3 = vpop.xlane.xlu1 %239 }
 0x1fc   :  { %v253_v4 = vmul.f32 0.03125, %v240_v3 }
 0x1fe   :  { %v258_v5 = vadd.f32 1e-06, %v253_v4 }
 0x1ff   :  { %v243_v6 = vpop.xlane.xlu0 %242 }
 0x200   :  { %7681 = vrsqrt.f32 %v258_v5  ;;  %v254_v7 = vmul.f32 0.03125, %v243_v6 }
 0x202   :  { %v259_v8 = vadd.f32 1e-06, %v254_v7 }
 0x203   :  { %v246_v9 = vpop.xlane.xlu1 %245 }
 0x204   :  { %7683 = vrsqrt.f32 %v259_v8  ;;  %v255_v10 = vmul.f32 0.03125, %v246_v9 }
 0x206   :  { %v260_v11 = vadd.f32 1e-06, %v255_v10 }
 0x207   :  { %v249_v12 = vpop.xlane.xlu0 %248  ;;  %v252_v13 = vpop.xlane.xlu1 %251 }
 0x208   :  { %7685 = vrsqrt.f32 %v260_v11  ;;  %v256_v15 = vmul.f32 0.03125, %v249_v12  ;;  %v257_v16 = vmul.f32 0.03125, %v252_v13 }
 0x20a   :  { %v261_v17 = vadd.f32 1e-06, %v256_v15  ;;  %v262_v18 = vadd.f32 1e-06, %v257_v16 }
 0x20c   :  { %7687 = vrsqrt.f32 %v261_v17 }
 0x20d   :  { %v7682_v19 = vpop.eup %7681  ;;  %7689 = vrsqrt.f32 %v262_v18 }
 0x20e   :  { %v268_v21 = vmul.f32 %v7682_v19, %v228_v39 }
 0x210   :  { %v279_v24 = vmul.f32 %v6313_v20, %v268_v21 }
 0x211   :  { %v7684_v25 = vpop.eup %7683 }
 0x212   :  { %v290_v26 = vadd.f32 %v6314_v23, %v279_v24  ;;  %v269_v28 = vmul.f32 %v7684_v25, %v8213_v43 }
 0x214   :  { %6938 = vmatmul.mubr.msk.f32.vlgmr.msra.gmra.mxu1 %vm205_vm2, %v290_v26  ;;  %v280_v29 = vmul.f32 %v6313_v20, %v269_v28 }
 0x215   :  { %v7686_v30 = vpop.eup %7685  ;;  %6940 = vmatprep.mubr.msk.f32.mxu1 %vm7964_vm0, %v7963_v1 }
 0x216   :  { %v291_v33 = vadd.f32 %v6314_v23, %v280_v29  ;;  %v270_v34 = vmul.f32 %v7686_v30, %v230_v51 }
 0x218   :  { %6941 = vmatmul.mubr.msk.f32.gmra.mxu1 %vm205_vm2, %v291_v33  ;;  %v281_v35 = vmul.f32 %v6313_v20, %v270_v34 }
 0x219   :  { %v7688_v36 = vpop.eup %7687  ;;  %6943 = vmatprep.mubr.msk.f32.mxu1 %vm7964_vm0, %v7963_v1 }
 0x21a   :  { %v7690_v37 = vpop.eup %7689  ;;  %v292_v38 = vadd.f32 %v6314_v23, %v281_v35  ;;  %v271_v39 = vmul.f32 %v7688_v36, %v231_v56 }
 0x21b   :  { %v272_v40 = vmul.f32 %v7690_v37, %v8219_v50 }
 0x21c   :  { %6944 = vmatmul.mubr.msk.f32.gmra.mxu1 %vm205_vm2, %v292_v38  ;;  %v282_v41 = vmul.f32 %v6313_v20, %v271_v39 }
 0x21d   :  { %6946 = vmatprep.mubr.msk.f32.mxu1 %vm7964_vm0, %v7963_v1  ;;  %v283_v43 = vmul.f32 %v6313_v20, %v272_v40 }
 0x21e   :  { %v293_v42 = vadd.f32 %v6314_v23, %v282_v41 }
 0x21f   :  { %v294_v44 = vadd.f32 %v6314_v23, %v283_v43 }
 0x220   :  { %6947 = vmatmul.mubr.msk.f32.gmra.mxu1 %vm205_vm2, %v293_v42 }
 0x221   :  { %6949 = vmatprep.mubr.msk.f32.mxu1 %vm7964_vm0, %v7963_v1 }
 0x224   :  { %6950 = vmatmul.mubr.msk.f32.gmra.mxu1 %vm205_vm2, %v294_v44 }
 0x225   :  { %6958 = vmatprep.mubr.msk.f32.mxu1 %vm7964_vm0, %v7963_v1 }
 0x2d4   :  { %v387_v45 = vpop.f32.mrf.mxu1 }
 0x2d5   :  { %v8275_v52 = vadd.f32 %v6315_v47, %v387_v45 }
 0x2d6   :  { %v6939_v46 = vpop.f32.mrf.mxu1 }
 0x2d8   :  { %v392_v48 = vpop.f32.mrf.mxu1 }
 0x2d9   :  { %v8271_v49 = vadd.f32 %v6315_v47, %v392_v48 }
 0x2da   :  { %v6942_v50 = vpop.f32.mrf.mxu1 }
 0x2db   :  { %416 = vrot.lane.b32.xlu1 %v8271_v49, %s10858_s27 }
 0x2dc   :  { %v397_v51 = vpop.f32.mrf.mxu1 }
 0x2dd   :  { %v8277_v53 = vadd.f32 %v6315_v47, %v397_v51 }
 0x2de   :  { %v6945_v54 = vpop.f32.mrf.mxu1 }
 0x2df   :  { %414 = vrot.lane.b32.xlu1 %v8275_v52, %s10858_s27  ;;  %418 = vrot.lane.b32.xlu0 %v8277_v53, %s10858_s27  ;;  %v1406_v0 = vrot.slane %v8277_v53, 1 }
 0x2e0   :  { %v402_v55 = vpop.f32.mrf.mxu1 }
 0x2e1   :  { %v403_v60 = vadd.f32 %v6315_v47, %v402_v55 }
 0x2e2   :  { %v6948_v56 = vpop.f32.mrf.mxu1 }
 0x2e3   :  { %658 = vrot.lane.b32.xlu1 %v8277_v53, %s10856_s4  ;;  %656 = vrot.lane.b32.xlu0 %v8271_v49, %s10856_s4  ;;  %v1407_v62 = vrot.slane %v403_v60, 1 }
 0x2e4   :  { %v407_v57 = vpop.f32.mrf.mxu1 }
 0x2e5   :  { %v408_v59 = vadd.f32 %v6315_v47, %v407_v57  ;;  %v8331_v2 = vsel %vm1405_vm4, %v1406_v0, %v1407_v62 }
 0x2e6   :  { %v6951_v58 = vpop.f32.mrf.mxu1 }
 0x2e7   :  { %654 = vrot.lane.b32.xlu1 %v8275_v52, %s10856_s4  ;;  %648 = vrot.lane.b32.xlu0 %v8275_v52, %s10846_s28  ;;  %v8315_v61 = vrot.slane %v408_v59, 1 }
 0x2e9   :  { %v8323_v63 = vsel %vm1405_vm4, %v1407_v62, %v8315_v61 }
 0x2eb   :  { %894 = vrot.lane.b32.xlu1 %v8277_v53, %s10854_s9  ;;  %650 = vrot.lane.b32.xlu0 %v8271_v49, %s10846_s28 }
 0x2ef   :  { %892 = vrot.lane.b32.xlu1 %v8271_v49, %s10854_s9  ;;  %652 = vrot.lane.b32.xlu0 %v8277_v53, %s10846_s28 }
 0x2f3   :  { %890 = vrot.lane.b32.xlu1 %v8275_v52, %s10854_s9  ;;  %884 = vrot.lane.b32.xlu0 %v8275_v52, %s10842_s5 }
 0x2f7   :  { %1130 = vrot.lane.b32.xlu1 %v8277_v53, %s10844_s0  ;;  %886 = vrot.lane.b32.xlu0 %v8271_v49, %s10842_s5 }
 0x2fb   :  { %1128 = vrot.lane.b32.xlu1 %v8271_v49, %s10844_s0  ;;  %888 = vrot.lane.b32.xlu0 %v8277_v53, %s10842_s5 }
 0x2ff   :  { %1126 = vrot.lane.b32.xlu1 %v8275_v52, %s10844_s0  ;;  %1120 = vrot.lane.b32.xlu0 %v8275_v52, %s10840_s29 }
 0x303   :  { %1122 = vrot.lane.b32.xlu0 %v8271_v49, %s10840_s29  ;;  %1415 = vrot.lane.b32.xlu1 %v8315_v61, %s10858_s27 }
 0x307   :  { %1124 = vrot.lane.b32.xlu0 %v8277_v53, %s10840_s29  ;;  %1413 = vrot.lane.b32.xlu1 %v8323_v63, %s10858_s27 }
 0x30b   :  { %1651 = vrot.lane.b32.xlu0 %v8315_v61, %s10856_s4  ;;  %1411 = vrot.lane.b32.xlu1 %v8331_v2, %s10858_s27  ;;  %s10887_s27 = smov 64  }
 0x30f   :  { %1647 = vrot.lane.b32.xlu0 %v8331_v2, %s10856_s4  ;;  %1649 = vrot.lane.b32.xlu1 %v8323_v63, %s10856_s4  ;;  %s10880_s4 = smov 96  }
 0x313   :  { %1887 = vrot.lane.b32.xlu0 %v8315_v61, %s10854_s9  ;;  %1641 = vrot.lane.b32.xlu1 %v8331_v2, %s10846_s28 }
 0x317   :  { %1885 = vrot.lane.b32.xlu0 %v8323_v63, %s10854_s9  ;;  %1643 = vrot.lane.b32.xlu1 %v8323_v63, %s10846_s28 }
 0x31b   :  { %1883 = vrot.lane.b32.xlu0 %v8331_v2, %s10854_s9  ;;  %1645 = vrot.lane.b32.xlu1 %v8315_v61, %s10846_s28  ;;  %s10848_s28 = smov 24   ;;  %s10881_s9 = smov 88  }
 0x31f   :  { %2123 = vrot.lane.b32.xlu0 %v8315_v61, %s10844_s0  ;;  %1877 = vrot.lane.b32.xlu1 %v8331_v2, %s10842_s5 }
 0x323   :  { %2121 = vrot.lane.b32.xlu0 %v8323_v63, %s10844_s0  ;;  %1879 = vrot.lane.b32.xlu1 %v8323_v63, %s10842_s5 }
 0x327   :  { %2119 = vrot.lane.b32.xlu0 %v8331_v2, %s10844_s0  ;;  %1881 = vrot.lane.b32.xlu1 %v8315_v61, %s10842_s5  ;;  %s10878_s5 = sld [smem:[#allocation13_spill]]  ;;  %s10888_s0 = smov 56  }
 0x32b   :  { %2115 = vrot.lane.b32.xlu0 %v8323_v63, %s10840_s29  ;;  %2113 = vrot.lane.b32.xlu1 %v8331_v2, %s10840_s29 }
 0x32f   :  { %552 = vrot.lane.b32.xlu0 %v8277_v53, %s10838_s6  ;;  %2117 = vrot.lane.b32.xlu1 %v8315_v61, %s10840_s29  ;;  %s10885_s29 = smov 112  }
 0x333   :  { %789 = vrot.lane.b32.xlu0 %v8277_v53, %s10836_s30  ;;  %550 = vrot.lane.b32.xlu1 %v8271_v49, %s10838_s6 }
 0x337   :  { %1025 = vrot.lane.b32.xlu0 %v8277_v53, %s10834_s3  ;;  %548 = vrot.lane.b32.xlu1 %v8275_v52, %s10838_s6 }
 0x33b   :  { %1021 = vrot.lane.b32.xlu0 %v8275_v52, %s10834_s3  ;;  %787 = vrot.lane.b32.xlu1 %v8271_v49, %s10836_s30 }
 0x33f   :  { %1261 = vrot.lane.b32.xlu0 %v8277_v53, %s10832_s26  ;;  %785 = vrot.lane.b32.xlu1 %v8275_v52, %s10836_s30 }
 0x343   :  { %1257 = vrot.lane.b32.xlu0 %v8275_v52, %s10832_s26  ;;  %1023 = vrot.lane.b32.xlu1 %v8271_v49, %s10834_s3 }
 0x347   :  { %1546 = vrot.lane.b32.xlu0 %v8315_v61, %s10838_s6  ;;  %1259 = vrot.lane.b32.xlu1 %v8271_v49, %s10832_s26 }
 0x34b   :  { %1542 = vrot.lane.b32.xlu0 %v8331_v2, %s10838_s6  ;;  %1544 = vrot.lane.b32.xlu1 %v8323_v63, %s10838_s6  ;;  %s10877_s6 = sld [smem:[#allocation12_spill]] }
 0x34d   :  { %v417_v3 = vpop.permute.xlu1 %416 }
 0x34f   :  { %1782 = vrot.lane.b32.xlu0 %v8315_v61, %s10836_s30  ;;  %1780 = vrot.lane.b32.xlu1 %v8323_v63, %s10836_s30 }
 0x351   :  { %v419_v4 = vpop.permute.xlu0 %418  ;;  %v415_v5 = vpop.permute.xlu1 %414 }
 0x352   :  { %6953 = vmatpush3.xpose.msk.msra.mxu1 %vm420_vm5, %v419_v4 }
 0x353   :  { %1778 = vrot.lane.b32.xlu0 %v8331_v2, %s10836_s30  ;;  %6954 = vmatprep.subr.mxu1 %v7963_v1  ;;  %s10850_s30 = smov 16  }
 0x355   :  { %v657_v6 = vpop.permute.xlu0 %656  ;;  %v659_v7 = vpop.permute.xlu1 %658 }
 0x356   :  { %6955 = vmatpush3.xpose.msk.msra.mxu1 %vm420_vm5, %v417_v3 }
 0x357   :  { %6956 = vmatprep.subr.mxu1 %v7963_v1 }
 0x359   :  { %v649_v8 = vpop.permute.xlu0 %648  ;;  %v655_v9 = vpop.permute.xlu1 %654 }
 0x35a   :  { %6957 = vmatpush3.xpose.msk.msra.mxu1 %vm420_vm5, %v415_v5 }
 0x35b   :  { %6982 = vmatprep.subr.mxu1 %v7963_v1 }
 0x35d   :  { %v651_v10 = vpop.permute.xlu0 %650  ;;  %6959 = vmatmul.mubr.msk.f32.vlgmr.msra.gmra.mxu1 %vm420_vm5, %v8275_v52  ;;  %v895_v11 = vpop.permute.xlu1 %894 }
 0x35e   :  { %6983 = vmatpush3.xpose.msk.msra.mxu1 %vm420_vm5, %v659_v7  ;;  %6961 = vmatprep.mubr.msk.f32.mxu1 %vm7964_vm0, %v7963_v1 }
 0x35f   :  { %6984 = vmatprep.subr.mxu1 %v7963_v1 }
 0x361   :  { %v653_v12 = vpop.permute.xlu0 %652  ;;  %6962 = vmatmul.mubr.msk.f32.gmra.mxu1 %vm420_vm5, %v8271_v49  ;;  %v893_v13 = vpop.permute.xlu1 %892 }
 0x362   :  { %6985 = vmatpush3.xpose.msk.msra.mxu1 %vm420_vm5, %v657_v6  ;;  %6964 = vmatprep.mubr.msk.f32.mxu1 %vm7964_vm0, %v7963_v1 }
 0x363   :  { %6986 = vmatprep.subr.mxu1 %v7963_v1 }
 0x365   :  { %v885_v15 = vpop.permute.xlu0 %884  ;;  %6965 = vmatmul.mubr.msk.f32.gmra.mxu1 %vm420_vm5, %v8277_v53  ;;  %v891_v16 = vpop.permute.xlu1 %890 }
 0x366   :  { %6987 = vmatpush3.xpose.msk.msra.mxu1 %vm420_vm5, %v655_v9  ;;  %6988 = vmatprep.mubr.msk.f32.mxu1 %vm7964_vm0, %v7963_v1 }
 0x367   :  { %7012 = vmatprep.subr.mxu1 %v7963_v1 }
 0x369   :  { %v887_v17 = vpop.permute.xlu0 %886  ;;  %6989 = vmatmul.mubr.msk.f32.vlgmr.msra.gmra.mxu1 %vm420_vm5, %v649_v8  ;;  %v1131_v18 = vpop.permute.xlu1 %1130 }
 0x36a   :  { %7013 = vmatpush3.xpose.msk.msra.mxu1 %vm420_vm5, %v895_v11  ;;  %6991 = vmatprep.mubr.msk.f32.mxu1 %vm7964_vm0, %v7963_v1 }
 0x36b   :  { %7014 = vmatprep.subr.mxu1 %v7963_v1 }
 0x36d   :  { %v889_v19 = vpop.permute.xlu0 %888  ;;  %6992 = vmatmul.mubr.msk.f32.gmra.mxu1 %vm420_vm5, %v651_v10  ;;  %v1129_v20 = vpop.permute.xlu1 %1128 }
 0x36e   :  { %7015 = vmatpush3.xpose.msk.msra.mxu1 %vm420_vm5, %v893_v13  ;;  %6994 = vmatprep.mubr.msk.f32.mxu1 %vm7964_vm0, %v7963_v1 }
 0x36f   :  { %7016 = vmatprep.subr.mxu1 %v7963_v1 }
 0x371   :  { %v1121_v21 = vpop.permute.xlu0 %1120  ;;  %6995 = vmatmul.mubr.msk.f32.gmra.mxu1 %vm420_vm5, %v653_v12  ;;  %v1127_v23 = vpop.permute.xlu1 %1126 }
 0x372   :  { %7017 = vmatpush3.xpose.msk.msra.mxu1 %vm420_vm5, %v891_v16  ;;  %7018 = vmatprep.mubr.msk.f32.mxu1 %vm7964_vm0, %v7963_v1 }
 0x373   :  { %7042 = vmatprep.subr.mxu1 %v7963_v1 }
 0x375   :  { %v1123_v24 = vpop.permute.xlu0 %1122  ;;  %7019 = vmatmul.mubr.msk.f32.vlgmr.msra.gmra.mxu1 %vm420_vm5, %v885_v15  ;;  %v1416_v25 = vpop.permute.xlu1 %1415 }
 0x376   :  { %7043 = vmatpush3.xpose.msk.msra.mxu1 %vm420_vm5, %v1131_v18  ;;  %7021 = vmatprep.mubr.msk.f32.mxu1 %vm7964_vm0, %v7963_v1 }
 0x377   :  { %7044 = vmatprep.subr.mxu1 %v7963_v1 }
 0x379   :  { %v1125_v26 = vpop.permute.xlu0 %1124  ;;  %7022 = vmatmul.mubr.msk.f32.gmra.mxu1 %vm420_vm5, %v887_v17  ;;  %v1414_v28 = vpop.permute.xlu1 %1413 }
 0x37a   :  { %7045 = vmatpush3.xpose.msk.msra.mxu1 %vm420_vm5, %v1129_v20  ;;  %7024 = vmatprep.mubr.msk.f32.mxu1 %vm7964_vm0, %v7963_v1 }
 0x37b   :  { %7046 = vmatprep.subr.mxu1 %v7963_v1 }
 0x37d   :  { %v1652_v29 = vpop.permute.xlu0 %1651  ;;  %7025 = vmatmul.mubr.msk.f32.gmra.mxu1 %vm420_vm5, %v889_v19  ;;  %v1412_v30 = vpop.permute.xlu1 %1411 }
 0x37e   :  { %7047 = vmatpush3.xpose.msk.msra.mxu1 %vm420_vm5, %v1127_v23  ;;  %7048 = vmatprep.mubr.msk.f32.mxu1 %vm7964_vm0, %v7963_v1 }
 0x37f   :  { %7072 = vmatprep.subr.mxu1 %v7963_v1 }
 0x381   :  { %v1648_v33 = vpop.permute.xlu0 %1647  ;;  %7049 = vmatmul.mubr.msk.f32.vlgmr.msra.gmra.mxu1 %vm420_vm5, %v1121_v21  ;;  %v1650_v34 = vpop.permute.xlu1 %1649 }
 0x382   :  { %7073 = vmatpush3.xpose.msk.msra.mxu1 %vm420_vm5, %v1416_v25  ;;  %7051 = vmatprep.mubr.msk.f32.mxu1 %vm7964_vm0, %v7963_v1 }
 0x383   :  { %7074 = vmatprep.subr.mxu1 %v7963_v1 }
 0x385   :  { %v1888_v35 = vpop.permute.xlu0 %1887  ;;  %7052 = vmatmul.mubr.msk.f32.gmra.mxu1 %vm420_vm5, %v1123_v24  ;;  %v1642_v36 = vpop.permute.xlu1 %1641 }
 0x386   :  { %7075 = vmatpush3.xpose.msk.msra.mxu1 %vm420_vm5, %v1414_v28  ;;  %7054 = vmatprep.mubr.msk.f32.mxu1 %vm7964_vm0, %v7963_v1 }
 0x387   :  { %7076 = vmatprep.subr.mxu1 %v7963_v1 }
 0x389   :  { %v1886_v37 = vpop.permute.xlu0 %1885  ;;  %7055 = vmatmul.mubr.msk.f32.gmra.mxu1 %vm420_vm5, %v1125_v26  ;;  %v1644_v38 = vpop.permute.xlu1 %1643 }
 0x38a   :  { %7077 = vmatpush3.xpose.msk.msra.mxu1 %vm420_vm5, %v1412_v30  ;;  %7078 = vmatprep.mubr.msk.f32.mxu1 %vm7964_vm0, %v7963_v1 }
 0x38b   :  { %7102 = vmatprep.subr.mxu1 %v7963_v1 }
 0x38d   :  { %v1884_v39 = vpop.permute.xlu0 %1883  ;;  %7079 = vmatmul.mubr.msk.f32.vlgmr.msra.gmra.mxu1 %vm420_vm5, %v8331_v2  ;;  %v1646_v40 = vpop.permute.xlu1 %1645 }
 0x38e   :  { %7103 = vmatpush3.xpose.msk.msra.mxu1 %vm420_vm5, %v1652_v29  ;;  %7081 = vmatprep.mubr.msk.f32.mxu1 %vm7964_vm0, %v7963_v1 }
 0x38f   :  { %7104 = vmatprep.subr.mxu1 %v7963_v1 }
 0x391   :  { %v2124_v41 = vpop.permute.xlu0 %2123  ;;  %7082 = vmatmul.mubr.msk.f32.gmra.mxu1 %vm420_vm5, %v8323_v63  ;;  %v1878_v42 = vpop.permute.xlu1 %1877 }
 0x392   :  { %7105 = vmatpush3.xpose.msk.msra.mxu1 %vm420_vm5, %v1650_v34  ;;  %7084 = vmatprep.mubr.msk.f32.mxu1 %vm7964_vm0, %v7963_v1 }
 0x393   :  { %7106 = vmatprep.subr.mxu1 %v7963_v1 }
 0x395   :  { %v2122_v43 = vpop.permute.xlu0 %2121  ;;  %7085 = vmatmul.mubr.msk.f32.gmra.mxu1 %vm420_vm5, %v8315_v61  ;;  %v1880_v44 = vpop.permute.xlu1 %1879 }
 0x396   :  { %7107 = vmatpush3.xpose.msk.msra.mxu1 %vm420_vm5, %v1648_v33  ;;  %7108 = vmatprep.mubr.msk.f32.mxu1 %vm7964_vm0, %v7963_v1 }
 0x397   :  { %7132 = vmatprep.subr.mxu1 %v7963_v1 }
 0x399   :  { %v2120_v45 = vpop.permute.xlu0 %2119  ;;  %7109 = vmatmul.mubr.msk.f32.vlgmr.msra.gmra.mxu1 %vm420_vm5, %v1642_v36  ;;  %v1882_v46 = vpop.permute.xlu1 %1881 }
 0x39a   :  { %7133 = vmatpush3.xpose.msk.msra.mxu1 %vm420_vm5, %v1888_v35  ;;  %7111 = vmatprep.mubr.msk.f32.mxu1 %vm7964_vm0, %v7963_v1 }
 0x39b   :  { %7134 = vmatprep.subr.mxu1 %v7963_v1 }
 0x39d   :  { %v2116_v47 = vpop.permute.xlu0 %2115  ;;  %7112 = vmatmul.mubr.msk.f32.gmra.mxu1 %vm420_vm5, %v1644_v38  ;;  %v2114_v48 = vpop.permute.xlu1 %2113 }
 0x39e   :  { %7135 = vmatpush3.xpose.msk.msra.mxu1 %vm420_vm5, %v1886_v37  ;;  %7114 = vmatprep.mubr.msk.f32.mxu1 %vm7964_vm0, %v7963_v1 }
 0x39f   :  { %7136 = vmatprep.subr.mxu1 %v7963_v1 }
 0x3a1   :  { %v553_v49 = vpop.permute.xlu0 %552  ;;  %7115 = vmatmul.mubr.msk.f32.gmra.mxu1 %vm420_vm5, %v1646_v40  ;;  %v2118_v50 = vpop.permute.xlu1 %2117 }
 0x3a2   :  { %6968 = vmatpush3.msk.msra.mxu0 %vm565_vm6, %v553_v49  ;;  %7137 = vmatpush3.xpose.msk.msra.mxu1 %vm420_vm5, %v1884_v39 }
 0x3a3   :  { %7138 = vmatprep.mubr.msk.f32.mxu1 %vm7964_vm0, %v7963_v1  ;;  %6969 = vmatprep.subr.mxu0 %v7963_v1 }
 0x3a4   :  { %7162 = vmatprep.subr.mxu1 %v7963_v1 }
 0x3a5   :  { %7139 = vmatmul.mubr.msk.f32.vlgmr.msra.gmra.mxu1 %vm420_vm5, %v1878_v42  ;;  %v551_v51 = vpop.permute.xlu1 %550 }
 0x3a6   :  { %6970 = vmatpush3.msra.mxu0 %v551_v51  ;;  %7163 = vmatpush3.xpose.msk.msra.mxu1 %vm420_vm5, %v2124_v41 }
 0x3a7   :  { %7141 = vmatprep.mubr.msk.f32.mxu1 %vm7964_vm0, %v7963_v1  ;;  %6971 = vmatprep.subr.mxu0 %v7963_v1 }
 0x3a8   :  { %7164 = vmatprep.subr.mxu1 %v7963_v1 }
 0x3a9   :  { %7142 = vmatmul.mubr.msk.f32.gmra.mxu1 %vm420_vm5, %v1880_v44  ;;  %v549_v52 = vpop.permute.xlu1 %548 }
 0x3aa   :  { %6972 = vmatpush3.msra.mxu0 %v549_v52  ;;  %7165 = vmatpush3.xpose.msk.msra.mxu1 %vm420_vm5, %v2122_v43 }
 0x3ab   :  { %7144 = vmatprep.mubr.msk.f32.mxu1 %vm7964_vm0, %v7963_v1  ;;  %7166 = vmatprep.subr.mxu1 %v7963_v1 }
 0x3ac   :  { %6997 = vmatprep.subr.mxu0 %v7963_v1 }
 0x3ad   :  { %7145 = vmatmul.mubr.msk.f32.gmra.mxu1 %vm420_vm5, %v1882_v46 }
 0x3ae   :  { %7167 = vmatpush3.xpose.msk.msra.mxu1 %vm420_vm5, %v2120_v45  ;;  %7168 = vmatprep.mubr.msk.f32.mxu1 %vm7964_vm0, %v7963_v1 }
 0x3af   :  { %7192 = vmatprep.subr.mxu1 %v7963_v1 }
 0x3b1   :  { %7169 = vmatmul.mubr.msk.f32.vlgmr.msra.gmra.mxu1 %vm420_vm5, %v2114_v48 }
 0x3b2   :  { %7171 = vmatprep.mubr.msk.f32.mxu1 %vm7964_vm0, %v7963_v1 }
 0x3b5   :  { %7172 = vmatmul.mubr.msk.f32.gmra.mxu1 %vm420_vm5, %v2116_v47 }
 0x3b6   :  { %7174 = vmatprep.mubr.msk.f32.mxu1 %vm7964_vm0, %v7963_v1 }
 0x3b9   :  { %7175 = vmatmul.mubr.msk.f32.gmra.mxu1 %vm420_vm5, %v2118_v50 }
 0x3ba   :  { %7200 = vmatprep.mubr.msk.f32.mxu1 %vm7964_vm0, %v7963_v1 }
 0x41d   :  { %v8537_v53 = vpop.f32.mrf.mxu1 }
 0x41e   :  { %v514_v54 = vsel %vm513_vm7, %v8537_v53, -inf }
 0x41f   :  { %515 = vmax.xlane.f32.xlu0 %v514_v54  ;;  %v6960_v55 = vpop.f32.mrf.mxu1 }
 0x421   :  { %v8541_v56 = vpop.f32.mrf.mxu1 }
 0x422   :  { %v517_v57 = vsel %vm513_vm7, %v8541_v56, -inf }
 0x423   :  { %518 = vmax.xlane.f32.xlu1 %v517_v57  ;;  %v6963_v58 = vpop.f32.mrf.mxu1 }
 0x425   :  { %v8545_v59 = vpop.f32.mrf.mxu1 }
 0x426   :  { %v521_v60 = vsel %vm520_vm8, %v8545_v59, -inf }
 0x427   :  { %522 = vmax.xlane.f32.xlu0 %v521_v60  ;;  %v6966_v62 = vpop.f32.mrf.mxu1 }
 0x429   :  { %v8549_v0 = vpop.f32.mrf.mxu1 }
 0x42a   :  { %v752_v3 = vsel %vm513_vm7, %v8549_v0, -inf }
 0x42b   :  { %753 = vmax.xlane.f32.xlu0 %v752_v3  ;;  %v6990_v4 = vpop.f32.mrf.mxu1  ;;  %v8617_v3 = vpop.permute.xlu0 %789 }
 0x42d   :  { %v8553_v5 = vpop.f32.mrf.mxu1 }
 0x42e   :  { %v755_v6 = vsel %vm513_vm7, %v8553_v5, -inf }
 0x42f   :  { %756 = vmax.xlane.f32.xlu0 %v755_v6  ;;  %v6993_v7 = vpop.f32.mrf.mxu1 }
 0x431   :  { %v8557_v8 = vpop.f32.mrf.mxu1 }
 0x432   :  { %v758_v9 = vsel %vm520_vm8, %v8557_v8, -inf }
 0x433   :  { %759 = vmax.xlane.f32.xlu1 %v758_v9  ;;  %v6996_v10 = vpop.f32.mrf.mxu1  ;;  %v8625_v9 = vpop.permute.xlu0 %1025 }
 0x435   :  { %v8561_v11 = vpop.f32.mrf.mxu1 }
 0x436   :  { %v988_v12 = vsel %vm513_vm7, %v8561_v11, -inf }
 0x437   :  { %989 = vmax.xlane.f32.xlu0 %v988_v12  ;;  %v7020_v13 = vpop.f32.mrf.mxu1  ;;  %v8627_v12 = vpop.permute.xlu0 %1021 }
 0x439   :  { %v8565_v15 = vpop.f32.mrf.mxu1 }
 0x43a   :  { %v991_v16 = vsel %vm513_vm7, %v8565_v15, -inf }
 0x43b   :  { %992 = vmax.xlane.f32.xlu1 %v991_v16  ;;  %v7023_v17 = vpop.f32.mrf.mxu1  ;;  %v8629_v13 = vpop.permute.xlu0 %1261 }
 0x43c   :  { %v8631_v16 = vpop.permute.xlu1 %787 }
 0x43d   :  { %v8569_v18 = vpop.f32.mrf.mxu1 }
 0x43e   :  { %v994_v19 = vsel %vm520_vm8, %v8569_v18, -inf }
 0x43f   :  { %995 = vmax.xlane.f32.xlu0 %v994_v19  ;;  %v7026_v20 = vpop.f32.mrf.mxu1  ;;  %v8633_v17 = vpop.permute.xlu0 %1257 }
 0x440   :  { %v8637_v20 = vpop.permute.xlu1 %785 }
 0x441   :  { %v8573_v21 = vpop.f32.mrf.mxu1 }
 0x442   :  { %v1224_v23 = vsel %vm513_vm7, %v8573_v21, -inf }
 0x443   :  { %1225 = vmax.xlane.f32.xlu1 %v1224_v23  ;;  %v7050_v24 = vpop.f32.mrf.mxu1  ;;  %v8639_v23 = vpop.permute.xlu0 %1546 }
 0x445   :  { %v8577_v25 = vpop.f32.mrf.mxu1 }
 0x446   :  { %v1227_v26 = vsel %vm513_vm7, %v8577_v25, -inf }
 0x447   :  { %1228 = vmax.xlane.f32.xlu0 %v1227_v26  ;;  %v7053_v28 = vpop.f32.mrf.mxu1 }
 0x448   :  { %v8645_v28 = vpop.permute.xlu1 %1023 }
 0x449   :  { %v8581_v29 = vpop.f32.mrf.mxu1 }
 0x44a   :  { %v1230_v30 = vsel %vm520_vm8, %v8581_v29, -inf }
 0x44b   :  { %1231 = vmax.xlane.f32.xlu1 %v1230_v30  ;;  %v7056_v33 = vpop.f32.mrf.mxu1 }
 0x44d   :  { %v8585_v34 = vpop.f32.mrf.mxu1 }
 0x44e   :  { %v1509_v35 = vsel %vm513_vm7, %v8585_v34, -inf }
 0x44f   :  { %1510 = vmax.xlane.f32.xlu0 %v1509_v35  ;;  %v7080_v36 = vpop.f32.mrf.mxu1  ;;  %v8651_v35 = vpop.permute.xlu0 %1542 }
 0x451   :  { %v8589_v37 = vpop.f32.mrf.mxu1 }
 0x452   :  { %v1512_v38 = vsel %vm513_vm7, %v8589_v37, -inf }
 0x453   :  { %1513 = vmax.xlane.f32.xlu1 %v1512_v38  ;;  %v7083_v39 = vpop.f32.mrf.mxu1  ;;  %v8655_v38 = vpop.permute.xlu1 %1259 }
 0x454   :  { %v8657_v39 = vpop.permute.xlu0 %1782 }
 0x455   :  { %v8593_v40 = vpop.f32.mrf.mxu1 }
 0x456   :  { %v1515_v41 = vsel %vm520_vm8, %v8593_v40, -inf }
 0x457   :  { %1516 = vmax.xlane.f32.xlu0 %v1515_v41  ;;  %v7086_v42 = vpop.f32.mrf.mxu1 }
 0x458   :  { %v8661_v42 = vpop.permute.xlu1 %1544 }
 0x459   :  { %v8597_v43 = vpop.f32.mrf.mxu1 }
 0x45a   :  { %v1745_v44 = vsel %vm513_vm7, %v8597_v43, -inf }
 0x45b   :  { %1746 = vmax.xlane.f32.xlu1 %v1745_v44  ;;  %v7110_v45 = vpop.f32.mrf.mxu1  ;;  %v8663_v44 = vpop.permute.xlu0 %1778 }
 0x45c   :  { %v8665_v45 = vpop.permute.xlu1 %1780 }
 0x45d   :  { %v8601_v46 = vpop.f32.mrf.mxu1 }
 0x45e   :  { %v1748_v47 = vsel %vm513_vm7, %v8601_v46, -inf }
 0x45f   :  { %1749 = vmax.xlane.f32.xlu0 %v1748_v47  ;;  %v7113_v48 = vpop.f32.mrf.mxu1 }
 0x461   :  { %v8605_v49 = vpop.f32.mrf.mxu1 }
 0x462   :  { %v1751_v19 = vsel %vm520_vm8, %v8605_v49, -inf }
 0x463   :  { %v7116_v50 = vpop.f32.mrf.mxu1 }
 0x465   :  { %v8607_v51 = vpop.f32.mrf.mxu1 }
 0x466   :  { %v1981_v24 = vsel %vm513_vm7, %v8607_v51, -inf }
 0x467   :  { %v7140_v52 = vpop.f32.mrf.mxu1 }
 0x469   :  { %v8609_v54 = vpop.f32.mrf.mxu1 }
 0x46a   :  { %v1984_v26 = vsel %vm513_vm7, %v8609_v54, -inf }
 0x46b   :  { %v7143_v55 = vpop.f32.mrf.mxu1 }
 0x46c   :  { %2016 = vrot.lane.b32.xlu1 %v8323_v63, %s10834_s3 }
 0x46d   :  { %v8613_v57 = vpop.f32.mrf.mxu1 }
 0x46e   :  { %v1987_v30 = vsel %vm520_vm8, %v8613_v57, -inf }
 0x46f   :  { %v7146_v58 = vpop.f32.mrf.mxu1 }
 0x471   :  { %v8615_v60 = vpop.f32.mrf.mxu1 }
 0x472   :  { %v2217_v33 = vsel %vm513_vm7, %v8615_v60, -inf }
 0x473   :  { %v7170_v62 = vpop.f32.mrf.mxu1 }
 0x475   :  { %2018 = vrot.lane.b32.xlu0 %v8315_v61, %s10834_s3  ;;  %v8621_v4 = vpop.f32.mrf.mxu1 }
 0x476   :  { %v2220_v36 = vsel %vm513_vm7, %v8621_v4, -inf }
 0x477   :  { %v7173_v6 = vpop.f32.mrf.mxu1 }
 0x479   :  { %v8623_v7 = vpop.f32.mrf.mxu1 }
 0x47a   :  { %v2223_v41 = vsel %vm520_vm8, %v8623_v7, -inf }
 0x47b   :  { %v7176_v10 = vpop.f32.mrf.mxu1 }
 0x490   :  { %1752 = vmax.xlane.f32.xlu1 %v1751_v19 }
 0x494   :  { %1982 = vmax.xlane.f32.xlu0 %v1981_v24  ;;  %1985 = vmax.xlane.f32.xlu1 %v1984_v26 }
 0x498   :  { %1988 = vmax.xlane.f32.xlu0 %v1987_v30  ;;  %2218 = vmax.xlane.f32.xlu1 %v2217_v33 }
 0x49c   :  { %2221 = vmax.xlane.f32.xlu0 %v2220_v36 }
 0x4a0   :  { %2224 = vmax.xlane.f32.xlu0 %v2223_v41 }
 0x4a8   :  { %v516_v47 = vpop.xlane.xlu0 %515 }
 0x4a9   :  { %v524_v48 = vsub.f32 %v8537_v53, %v516_v47 }
 0x4ab   :  { %v527_v50 = vmul.f32 1.442695, %v524_v48 }
 0x4ac   :  { %v519_v52 = vpop.xlane.xlu1 %518 }
 0x4ad   :  { %7691 = vpow2.f32 %v527_v50  ;;  %v525_v55 = vsub.f32 %v8541_v56, %v519_v52 }
 0x4af   :  { %v529_v58 = vmul.f32 1.442695, %v525_v55 }
 0x4b0   :  { %v523_v62 = vpop.xlane.xlu0 %522 }
 0x4b1   :  { %7693 = vpow2.f32 %v529_v58  ;;  %v526_v6 = vsub.f32 %v8545_v59, %v523_v62 }
 0x4b3   :  { %v531_v10 = vmul.f32 1.442695, %v526_v6 }
 0x4b4   :  { %v754_v19 = vpop.xlane.xlu0 %753 }
 0x4b5   :  { %7695 = vpow2.f32 %v531_v10  ;;  %v761_v24 = vsub.f32 %v8549_v0, %v754_v19 }
 0x4b7   :  { %v764_v26 = vmul.f32 1.442695, %v761_v24 }
 0x4b8   :  { %v757_v30 = vpop.xlane.xlu0 %756 }
 0x4b9   :  { %7697 = vpow2.f32 %v764_v26  ;;  %v762_v53 = vsub.f32 %v8553_v5, %v757_v30 }
 0x4ba   :  { %v8672_v33 = vpop.eup %7691 }
 0x4bb   :  { %v766_v36 = vmul.f32 1.442695, %v762_v53  ;;  %v533_v56 = vsel %vm513_vm7, %v8672_v33, 0.0 }
 0x4bc   :  { %534 = vadd.xlane.f32.xlu0 %v533_v56  ;;  %v760_v41 = vpop.xlane.xlu1 %759 }
 0x4bd   :  { %7699 = vpow2.f32 %v766_v36  ;;  %v763_v59 = vsub.f32 %v8557_v8, %v760_v41 }
 0x4be   :  { %v8677_v47 = vpop.eup %7693 }
 0x4bf   :  { %v768_v48 = vmul.f32 1.442695, %v763_v59  ;;  %v536_v0 = vsel %vm513_vm7, %v8677_v47, 0.0 }
 0x4c0   :  { %v990_v50 = vpop.xlane.xlu0 %989  ;;  %537 = vadd.xlane.f32.xlu1 %v536_v0 }
 0x4c1   :  { %7701 = vpow2.f32 %v768_v48  ;;  %v997_v5 = vsub.f32 %v8561_v11, %v990_v50 }
 0x4c2   :  { %v8682_v52 = vpop.eup %7695 }
 0x4c3   :  { %v1000_v55 = vmul.f32 1.442695, %v997_v5  ;;  %v539_v58 = vsel %vm520_vm8, %v8682_v52, 0.0 }
 0x4c4   :  { %540 = vadd.xlane.f32.xlu0 %v539_v58  ;;  %v993_v62 = vpop.xlane.xlu1 %992 }
 0x4c5   :  { %7703 = vpow2.f32 %v1000_v55  ;;  %v998_v8 = vsub.f32 %v8565_v15, %v993_v62 }
 0x4c6   :  { %v8687_v6 = vpop.eup %7697 }
 0x4c7   :  { %v1002_v10 = vmul.f32 1.442695, %v998_v8  ;;  %v770_v19 = vsel %vm513_vm7, %v8687_v6, 0.0 }
 0x4c8   :  { %v996_v24 = vpop.xlane.xlu0 %995  ;;  %771 = vadd.xlane.f32.xlu1 %v770_v19 }
 0x4c9   :  { %7705 = vpow2.f32 %v1002_v10  ;;  %v999_v11 = vsub.f32 %v8569_v18, %v996_v24 }
 0x4ca   :  { %v8692_v26 = vpop.eup %7699 }
 0x4cb   :  { %v1004_v30 = vmul.f32 1.442695, %v999_v11  ;;  %v773_v53 = vsel %vm513_vm7, %v8692_v26, 0.0 }
 0x4cc   :  { %774 = vadd.xlane.f32.xlu0 %v773_v53  ;;  %v1226_v36 = vpop.xlane.xlu1 %1225 }
 0x4cd   :  { %7707 = vpow2.f32 %v1004_v30  ;;  %v1233_v15 = vsub.f32 %v8573_v21, %v1226_v36 }
 0x4ce   :  { %v8697_v56 = vpop.eup %7701 }
 0x4cf   :  { %v1236_v41 = vmul.f32 1.442695, %v1233_v15  ;;  %v776_v59 = vsel %vm520_vm8, %v8697_v56, 0.0 }
 0x4d0   :  { %v1229_v48 = vpop.xlane.xlu0 %1228  ;;  %777 = vadd.xlane.f32.xlu1 %v776_v59 }
 0x4d1   :  { %7709 = vpow2.f32 %v1236_v41  ;;  %v1234_v18 = vsub.f32 %v8577_v25, %v1229_v48 }
 0x4d2   :  { %v8702_v0 = vpop.eup %7703 }
 0x4d3   :  { %v1238_v50 = vmul.f32 1.442695, %v1234_v18  ;;  %v1006_v5 = vsel %vm513_vm7, %v8702_v0, 0.0 }
 0x4d4   :  { %1007 = vadd.xlane.f32.xlu1 %v1006_v5  ;;  %v1232_v55 = vpop.xlane.xlu1 %1231 }
 0x4d5   :  { %7711 = vpow2.f32 %v1238_v50  ;;  %v1235_v21 = vsub.f32 %v8581_v29, %v1232_v55 }
 0x4d6   :  { %v8707_v58 = vpop.eup %7705 }
 0x4d7   :  { %v1240_v62 = vmul.f32 1.442695, %v1235_v21  ;;  %v1009_v8 = vsel %vm513_vm7, %v8707_v58, 0.0 }
 0x4d8   :  { %v1511_v10 = vpop.xlane.xlu0 %1510  ;;  %1010 = vadd.xlane.f32.xlu0 %v1009_v8 }
 0x4d9   :  { %7713 = vpow2.f32 %v1240_v62  ;;  %v1518_v25 = vsub.f32 %v8585_v34, %v1511_v10 }
 0x4da   :  { %v8712_v19 = vpop.eup %7707 }
 0x4db   :  { %v1521_v24 = vmul.f32 1.442695, %v1518_v25  ;;  %v1012_v11 = vsel %vm520_vm8, %v8712_v19, 0.0 }
 0x4dc   :  { %1013 = vadd.xlane.f32.xlu1 %v1012_v11  ;;  %v1514_v30 = vpop.xlane.xlu1 %1513 }
 0x4dd   :  { %7715 = vpow2.f32 %v1521_v24  ;;  %v1519_v29 = vsub.f32 %v8589_v37, %v1514_v30 }
 0x4de   :  { %v8717_v53 = vpop.eup %7709 }
 0x4df   :  { %v1523_v36 = vmul.f32 1.442695, %v1519_v29  ;;  %v1242_v15 = vsel %vm513_vm7, %v8717_v53, 0.0 }
 0x4e0   :  { %v1517_v41 = vpop.xlane.xlu0 %1516  ;;  %1243 = vadd.xlane.f32.xlu1 %v1242_v15 }
 0x4e1   :  { %7717 = vpow2.f32 %v1523_v36  ;;  %v1520_v34 = vsub.f32 %v8593_v40, %v1517_v41 }
 0x4e2   :  { %v8722_v59 = vpop.eup %7711 }
 0x4e3   :  { %v1525_v48 = vmul.f32 1.442695, %v1520_v34  ;;  %v1245_v18 = vsel %vm513_vm7, %v8722_v59, 0.0 }
 0x4e4   :  { %1246 = vadd.xlane.f32.xlu1 %v1245_v18  ;;  %v1747_v50 = vpop.xlane.xlu1 %1746 }
 0x4e5   :  { %7719 = vpow2.f32 %v1525_v48  ;;  %v1754_v37 = vsub.f32 %v8597_v43, %v1747_v50 }
 0x4e6   :  { %v8727_v5 = vpop.eup %7713 }
 0x4e7   :  { %v1757_v55 = vmul.f32 1.442695, %v1754_v37  ;;  %v1248_v21 = vsel %vm520_vm8, %v8727_v5, 0.0 }
 0x4e8   :  { %v1750_v62 = vpop.xlane.xlu0 %1749  ;;  %1249 = vadd.xlane.f32.xlu0 %v1248_v21  ;;  %v8756_v41 = vpop.permute.xlu1 %2016 }
 0x4e9   :  { %7721 = vpow2.f32 %v1757_v55  ;;  %v1755_v40 = vsub.f32 %v8601_v46, %v1750_v62 }
 0x4ea   :  { %v8732_v8 = vpop.eup %7715 }
 0x4eb   :  { %v1759_v10 = vmul.f32 1.442695, %v1755_v40  ;;  %v1527_v25 = vsel %vm513_vm7, %v8732_v8, 0.0 }
 0x4ec   :  { %1528 = vadd.xlane.f32.xlu1 %v1527_v25  ;;  %v8758_v34 = vpop.permute.xlu0 %2018 }
 0x4ed   :  { %7723 = vpow2.f32 %v1759_v10 }
 0x4ee   :  { %v8736_v43 = vpop.eup %7717 }
 0x4ef   :  { %v1530_v24 = vsel %vm513_vm7, %v8736_v43, 0.0 }
 0x4f0   :  { %1531 = vadd.xlane.f32.xlu0 %v1530_v24 }
 0x4f2   :  { %v8740_v11 = vpop.eup %7719 }
 0x4f3   :  { %v1533_v30 = vsel %vm520_vm8, %v8740_v11, 0.0 }
 0x4f4   :  { %1534 = vadd.xlane.f32.xlu1 %v1533_v30 }
 0x4f6   :  { %v8744_v46 = vpop.eup %7721 }
 0x4f7   :  { %v1763_v29 = vsel %vm513_vm7, %v8744_v46, 0.0 }
 0x4f8   :  { %1764 = vadd.xlane.f32.xlu1 %v1763_v29 }
 0x4fa   :  { %v8748_v36 = vpop.eup %7723 }
 0x4fb   :  { %v1766_v15 = vsel %vm513_vm7, %v8748_v36, 0.0 }
 0x4fc   :  { %1767 = vadd.xlane.f32.xlu0 %v1766_v15 }
 0x509   :  { %2254 = vrot.lane.b32.xlu1 %v8315_v61, %s10832_s26 }
 0x512   :  { %2014 = vrot.lane.b32.xlu0 %v8331_v2, %s10834_s3  ;;  %s10889_s3 = smov 48  }
 0x519   :  { %v1753_v48 = vpop.xlane.xlu1 %1752 }
 0x51a   :  { %v1756_v18 = vsub.f32 %v8605_v49, %v1753_v48 }
 0x51c   :  { %v1761_v50 = vmul.f32 1.442695, %v1756_v18 }
 0x51d   :  { %v1983_v37 = vpop.xlane.xlu0 %1982  ;;  %v1986_v55 = vpop.xlane.xlu1 %1985 }
 0x51e   :  { %7725 = vpow2.f32 %v1761_v50  ;;  %v1990_v21 = vsub.f32 %v8607_v51, %v1983_v37  ;;  %v1991_v62 = vsub.f32 %v8609_v54, %v1986_v55 }
 0x520   :  { %v1993_v40 = vmul.f32 1.442695, %v1990_v21  ;;  %v1995_v61 = vmul.f32 1.442695, %v1991_v62 }
 0x521   :  { %v1989_v10 = vpop.xlane.xlu0 %1988  ;;  %v2219_v25 = vpop.xlane.xlu1 %2218 }
 0x522   :  { %7727 = vpow2.f32 %v1993_v40  ;;  %v1992_v24 = vsub.f32 %v8613_v57, %v1989_v10  ;;  %v2226_v30 = vsub.f32 %v8615_v60, %v2219_v25 }
 0x523   :  { %7729 = vpow2.f32 %v1995_v61 }
 0x524   :  { %v1997_v29 = vmul.f32 1.442695, %v1992_v24  ;;  %v2229_v49 = vmul.f32 1.442695, %v2226_v30 }
 0x525   :  { %v2222_v21 = vpop.xlane.xlu0 %2221 }
 0x526   :  { %7731 = vpow2.f32 %v1997_v29  ;;  %v2227_v10 = vsub.f32 %v8621_v4, %v2222_v21 }
 0x527   :  { %7733 = vpow2.f32 %v2229_v49 }
 0x528   :  { %v2231_v24 = vmul.f32 1.442695, %v2227_v10 }
 0x529   :  { %v2225_v62 = vpop.xlane.xlu0 %2224 }
 0x52b   :  { %v8765_v15 = vpop.eup %7725 }
 0x52c   :  { %v1769_v51 = vsel %vm520_vm8, %v8765_v15, 0.0 }
 0x52d   :  { %1770 = vadd.xlane.f32.xlu1 %v1769_v51  ;;  %v2228_v51 = vsub.f32 %v8623_v7, %v2225_v62 }
 0x52f   :  { %v8769_v54 = vpop.eup %7727  ;;  %v2233_v4 = vmul.f32 1.442695, %v2228_v51 }
 0x530   :  { %v8771_v48 = vpop.eup %7729  ;;  %v1999_v57 = vsel %vm513_vm7, %v8769_v54, 0.0 }
 0x531   :  { %2000 = vadd.xlane.f32.xlu1 %v1999_v57  ;;  %v2002_v60 = vsel %vm513_vm7, %v8771_v48, 0.0 }
 0x532   :  { %2003 = vadd.xlane.f32.xlu0 %v2002_v60 }
 0x533   :  { %v8777_v18 = vpop.eup %7731 }
 0x534   :  { %v2005_v50 = vsel %vm520_vm8, %v8777_v18, 0.0  ;;  %v8781_v37 = vpop.eup %7733 }
 0x535   :  { %2006 = vadd.xlane.f32.xlu1 %v2005_v50  ;;  %v2235_v55 = vsel %vm513_vm7, %v8781_v37, 0.0 }
 0x539   :  { %2236 = vadd.xlane.f32.xlu1 %v2235_v55 }
 0x545   :  { %v535_v40 = vpop.xlane.xlu0 %534 }
 0x546   :  { %7735 = vrcp.f32 %v535_v40 }
 0x548   :  { %2252 = vrot.lane.b32.xlu0 %v8323_v63, %s10832_s26 }
 0x549   :  { %v538_v61 = vpop.xlane.xlu1 %537 }
 0x54a   :  { %7737 = vrcp.f32 %v538_v61  ;;  %2250 = vrot.lane.b32.xlu1 %v8331_v2, %s10832_s26  ;;  %s10852_s26 = smov 8  }
 0x54d   :  { %v541_v25 = vpop.xlane.xlu0 %540 }
 0x54e   :  { %7739 = vrcp.f32 %v541_v25 }
 0x551   :  { %v772_v30 = vpop.xlane.xlu1 %771 }
 0x552   :  { %7741 = vrcp.f32 %v772_v30 }
 0x553   :  { %v7736_v29 = vpop.eup %7735  ;;  %7743 = vpow2.f32 %v2231_v24 }
 0x554   :  { %v545_v49 = vmul.f32 %v7736_v29, %v8672_v33 }
 0x555   :  { %v775_v57 = vpop.xlane.xlu0 %774 }
 0x556   :  { %7745 = vrcp.f32 %v775_v57  ;;  %6974 = vmatmul.mubr.msk.f32.vlgmr.msra.gmra.mxu0 %vm513_vm7, %v545_v49 }
 0x557   :  { %v7738_v63 = vpop.eup %7737  ;;  %6998 = vmatpush3.msk.msra.mxu0 %vm565_vm6, %v8617_v3  ;;  %6976 = vmatprep.mubr.msk.f32.mxu0 %vm7964_vm0, %v7963_v1 }
 0x558   :  { %6999 = vmatprep.subr.mxu0 %v7963_v1  ;;  %v546_v2 = vmul.f32 %v7738_v63, %v8677_v47 }
 0x559   :  { %7000 = vmatpush3.msra.mxu0 %v8631_v16  ;;  %v778_v33 = vpop.xlane.xlu1 %777 }
 0x55a   :  { %7001 = vmatprep.subr.mxu0 %v7963_v1  ;;  %7747 = vrcp.f32 %v778_v33  ;;  %6977 = vmatmul.mubr.msk.f32.gmra.mxu0 %vm513_vm7, %v546_v2 }
 0x55b   :  { %v7740_v7 = vpop.eup %7739  ;;  %7002 = vmatpush3.msra.mxu0 %v8637_v20  ;;  %6979 = vmatprep.mubr.msk.f32.mxu0 %vm7964_vm0, %v7963_v1  ;;  %7749 = vpow2.f32 %v2233_v4 }
 0x55c   :  { %v547_v3 = vmul.f32 %v7740_v7, %v8682_v52  ;;  %7027 = vmatprep.subr.mxu0 %v7963_v1 }
 0x55d   :  { %v1008_v47 = vpop.xlane.xlu1 %1007 }
 0x55e   :  { %7751 = vrcp.f32 %v1008_v47  ;;  %6980 = vmatmul.mubr.msk.f32.gmra.mxu0 %vm513_vm7, %v547_v3 }
 0x55f   :  { %v7742_v16 = vpop.eup %7741  ;;  %7003 = vmatprep.mubr.msk.f32.mxu0 %vm7964_vm0, %v7963_v1 }
 0x560   :  { %v782_v60 = vmul.f32 %v7742_v16, %v8687_v6  ;;  %v8811_v20 = vpop.eup %7743 }
 0x561   :  { %v1011_v50 = vpop.xlane.xlu0 %1010  ;;  %v2238_v21 = vsel %vm513_vm7, %v8811_v20, 0.0 }
 0x562   :  { %7753 = vrcp.f32 %v1011_v50  ;;  %7004 = vmatmul.mubr.msk.f32.vlgmr.msra.gmra.mxu0 %vm513_vm7, %v782_v60 }
 0x563   :  { %v7746_v52 = vpop.eup %7745  ;;  %7028 = vmatpush3.msk.msra.mxu0 %vm565_vm6, %v8625_v9  ;;  %7006 = vmatprep.mubr.msk.f32.mxu0 %vm7964_vm0, %v7963_v1 }
 0x564   :  { %7029 = vmatprep.subr.mxu0 %v7963_v1  ;;  %v783_v55 = vmul.f32 %v7746_v52, %v8692_v26 }
 0x565   :  { %7030 = vmatpush3.msra.mxu0 %v8645_v28  ;;  %v1014_v6 = vpop.xlane.xlu1 %1013 }
 0x566   :  { %7031 = vmatprep.subr.mxu0 %v7963_v1  ;;  %7755 = vrcp.f32 %v1014_v6  ;;  %7007 = vmatmul.mubr.msk.f32.gmra.mxu0 %vm513_vm7, %v783_v55 }
 0x567   :  { %v7748_v62 = vpop.eup %7747  ;;  %2239 = vadd.xlane.f32.xlu0 %v2238_v21  ;;  %7032 = vmatpush3.msra.mxu0 %v8627_v12 }
 0x568   :  { %7009 = vmatprep.mubr.msk.f32.mxu0 %vm7964_vm0, %v7963_v1  ;;  %v784_v9 = vmul.f32 %v7748_v62, %v8697_v56  ;;  %7057 = vmatprep.subr.mxu0 %v7963_v1  ;;  %v8830_v26 = vpop.eup %7749 }
 0x569   :  { %v1244_v28 = vpop.xlane.xlu1 %1243  ;;  %v2241_v10 = vsel %vm520_vm8, %v8830_v26, 0.0 }
 0x56a   :  { %7757 = vrcp.f32 %v1244_v28  ;;  %7010 = vmatmul.mubr.msk.f32.gmra.mxu0 %vm513_vm7, %v784_v9 }
 0x56b   :  { %v7752_v40 = vpop.eup %7751  ;;  %7033 = vmatprep.mubr.msk.f32.mxu0 %vm7964_vm0, %v7963_v1 }
 0x56c   :  { %v1018_v61 = vmul.f32 %v7752_v40, %v8702_v0 }
 0x56d   :  { %v1247_v12 = vpop.xlane.xlu1 %1246 }
 0x56e   :  { %7759 = vrcp.f32 %v1247_v12  ;;  %2242 = vadd.xlane.f32.xlu1 %v2241_v10  ;;  %7034 = vmatmul.mubr.msk.f32.vlgmr.msra.gmra.mxu0 %vm513_vm7, %v1018_v61 }
 0x56f   :  { %v7754_v56 = vpop.eup %7753  ;;  %7058 = vmatpush3.msk.msra.mxu0 %vm565_vm6, %v8629_v13  ;;  %7036 = vmatprep.mubr.msk.f32.mxu0 %vm7964_vm0, %v7963_v1 }
 0x570   :  { %7059 = vmatprep.subr.mxu0 %v7963_v1  ;;  %v1019_v25 = vmul.f32 %v7754_v56, %v8707_v58 }
 0x571   :  { %7060 = vmatpush3.msra.mxu0 %v8655_v38  ;;  %v1250_v0 = vpop.xlane.xlu0 %1249 }
 0x572   :  { %7761 = vrcp.f32 %v1250_v0  ;;  %7061 = vmatprep.subr.mxu0 %v7963_v1  ;;  %7037 = vmatmul.mubr.msk.f32.gmra.mxu0 %vm513_vm7, %v1019_v25  ;;  %v2407_v0 = vld [vmem:[%s10877_s6 + $0x18] sm:$0xff] }
 0x573   :  { %v7756_v24 = vpop.eup %7755  ;;  %7062 = vmatpush3.msra.mxu0 %v8633_v17  ;;  %7039 = vmatprep.mubr.msk.f32.mxu0 %vm7964_vm0, %v7963_v1 }
 0x574   :  { %v1020_v13 = vmul.f32 %v7756_v24, %v8712_v19  ;;  %7087 = vmatprep.subr.mxu0 %v7963_v1  ;;  %v2406_v24 = vld [vmem:[%s10877_s6 + $0x10] sm:$0xff]  ;;  %7193 = vmatpush3.msra.mxu1 %v2407_v0 }
 0x575   :  { %v1529_v30 = vpop.xlane.xlu1 %1528  ;;  %7194 = vmatprep.subr.mxu1 %v7963_v1 }
 0x576   :  { %7763 = vrcp.f32 %v1529_v30  ;;  %7040 = vmatmul.mubr.msk.f32.gmra.mxu0 %vm513_vm7, %v1020_v13  ;;  %v2405_v30 = vld [vmem:[%s10877_s6 + $0x8] sm:$0xff]  ;;  %7195 = vmatpush3.msra.mxu1 %v2406_v24 }
 0x577   :  { %v7758_v38 = vpop.eup %7757  ;;  %7063 = vmatprep.mubr.msk.f32.mxu0 %vm7964_vm0, %v7963_v1  ;;  %7196 = vmatprep.subr.mxu1 %v7963_v1 }
 0x578   :  { %v1254_v58 = vmul.f32 %v7758_v38, %v8717_v53  ;;  %7197 = vmatpush3.msra.mxu1 %v2405_v30 }
 0x579   :  { %v1532_v29 = vpop.xlane.xlu0 %1531  ;;  %7198 = vmatprep.subr.mxu1 %v7963_v1 }
 0x57a   :  { %7765 = vrcp.f32 %v1532_v29  ;;  %7064 = vmatmul.mubr.msk.f32.vlgmr.msra.gmra.mxu0 %vm513_vm7, %v1254_v58 }
 0x57b   :  { %v7760_v17 = vpop.eup %7759  ;;  %7088 = vmatpush3.msk.msra.mxu0 %vm565_vm6, %v8639_v23  ;;  %7066 = vmatprep.mubr.msk.f32.mxu0 %vm7964_vm0, %v7963_v1 }
 0x57c   :  { %7089 = vmatprep.subr.mxu0 %v7963_v1  ;;  %v1255_v19 = vmul.f32 %v7760_v17, %v8722_v59  ;;  %v2404_v17 = vld [vmem:[%s10877_s6] sm:$0xff] }
 0x57d   :  { %7090 = vmatpush3.msra.mxu0 %v8661_v42  ;;  %v1535_v49 = vpop.xlane.xlu1 %1534  ;;  %7199 = vmatpush3.msra.mxu1 %v2404_v17 }
 0x57e   :  { %7091 = vmatprep.subr.mxu0 %v7963_v1  ;;  %7767 = vrcp.f32 %v1535_v49  ;;  %7067 = vmatmul.mubr.msk.f32.gmra.mxu0 %vm513_vm7, %v1255_v19 }
 0x57f   :  { %v7762_v53 = vpop.eup %7761  ;;  %7092 = vmatpush3.msra.mxu0 %v8651_v35  ;;  %7069 = vmatprep.mubr.msk.f32.mxu0 %vm7964_vm0, %v7963_v1 }
 0x580   :  { %v1256_v23 = vmul.f32 %v7762_v53, %v8727_v5  ;;  %7117 = vmatprep.subr.mxu0 %v7963_v1  ;;  %7238 = vmatprep.subr.mxu1 %v7963_v1 }
 0x581   :  { %v1765_v51 = vpop.xlane.xlu1 %1764 }
 0x582   :  { %7769 = vrcp.f32 %v1765_v51  ;;  %7070 = vmatmul.mubr.msk.f32.gmra.mxu0 %vm513_vm7, %v1256_v23 }
 0x583   :  { %v7764_v42 = vpop.eup %7763  ;;  %7093 = vmatprep.mubr.msk.f32.mxu0 %vm7964_vm0, %v7963_v1 }
 0x584   :  { %v1539_v59 = vmul.f32 %v7764_v42, %v8732_v8 }
 0x585   :  { %v1768_v57 = vpop.xlane.xlu0 %1767 }
 0x586   :  { %7771 = vrcp.f32 %v1768_v57  ;;  %7094 = vmatmul.mubr.msk.f32.vlgmr.msra.gmra.mxu0 %vm513_vm7, %v1539_v59 }
 0x587   :  { %v7766_v35 = vpop.eup %7765  ;;  %7118 = vmatpush3.msk.msra.mxu0 %vm565_vm6, %v8657_v39  ;;  %7096 = vmatprep.mubr.msk.f32.mxu0 %vm7964_vm0, %v7963_v1 }
 0x588   :  { %7119 = vmatprep.subr.mxu0 %v7963_v1  ;;  %v1540_v5 = vmul.f32 %v7766_v35, %v8736_v43 }
 0x589   :  { %7120 = vmatpush3.msra.mxu0 %v8665_v45 }
 0x58a   :  { %7121 = vmatprep.subr.mxu0 %v7963_v1  ;;  %7097 = vmatmul.mubr.msk.f32.gmra.mxu0 %vm513_vm7, %v1540_v5 }
 0x58b   :  { %v7768_v8 = vpop.eup %7767  ;;  %7122 = vmatpush3.msra.mxu0 %v8663_v44  ;;  %7099 = vmatprep.mubr.msk.f32.mxu0 %vm7964_vm0, %v7963_v1 }
 0x58c   :  { %v1541_v39 = vmul.f32 %v7768_v8, %v8740_v11  ;;  %7147 = vmatprep.subr.mxu0 %v7963_v1  ;;  %v2015_v11 = vpop.permute.xlu0 %2014 }
 0x58e   :  { %7100 = vmatmul.mubr.msk.f32.gmra.mxu0 %vm513_vm7, %v1541_v39 }
 0x58f   :  { %v7770_v63 = vpop.eup %7769  ;;  %7123 = vmatprep.mubr.msk.f32.mxu0 %vm7964_vm0, %v7963_v1 }
 0x590   :  { %v1775_v45 = vmul.f32 %v7770_v63, %v8744_v46  ;;  %v2255_v46 = vpop.permute.xlu1 %2254 }
 0x592   :  { %7124 = vmatmul.mubr.msk.f32.vlgmr.msra.gmra.mxu0 %vm513_vm7, %v1775_v45 }
 0x593   :  { %v7772_v43 = vpop.eup %7771  ;;  %7148 = vmatpush3.msk.msra.mxu0 %vm565_vm6, %v8758_v34  ;;  %7126 = vmatprep.mubr.msk.f32.mxu0 %vm7964_vm0, %v7963_v1 }
 0x594   :  { %7149 = vmatprep.subr.mxu0 %v7963_v1  ;;  %v1776_v44 = vmul.f32 %v7772_v43, %v8748_v36 }
 0x595   :  { %7150 = vmatpush3.msra.mxu0 %v8756_v41 }
 0x596   :  { %7151 = vmatprep.subr.mxu0 %v7963_v1  ;;  %7127 = vmatmul.mubr.msk.f32.gmra.mxu0 %vm513_vm7, %v1776_v44 }
 0x597   :  { %7152 = vmatpush3.msra.mxu0 %v2015_v11  ;;  %7129 = vmatprep.mubr.msk.f32.mxu0 %vm7964_vm0, %v7963_v1 }
 0x598   :  { %7177 = vmatprep.subr.mxu0 %v7963_v1 }
 0x5b6   :  { %v1771_v34 = vpop.xlane.xlu1 %1770 }
 0x5b7   :  { %7773 = vrcp.f32 %v1771_v34 }
 0x5ba   :  { %v2001_v2 = vpop.xlane.xlu1 %2000 }
 0x5bb   :  { %v2004_v4 = vpop.xlane.xlu0 %2003  ;;  %7775 = vrcp.f32 %v2001_v2 }
 0x5bc   :  { %7777 = vrcp.f32 %v2004_v4 }
 0x5be   :  { %v2007_v36 = vpop.xlane.xlu1 %2006 }
 0x5bf   :  { %7779 = vrcp.f32 %v2007_v36  ;;  %v2253_v60 = vpop.permute.xlu0 %2252 }
 0x5c2   :  { %v2237_v41 = vpop.xlane.xlu1 %2236 }
 0x5c3   :  { %7781 = vrcp.f32 %v2237_v41 }
 0x5c4   :  { %v7774_v33 = vpop.eup %7773 }
 0x5c5   :  { %v1777_v7 = vmul.f32 %v7774_v33, %v8765_v15 }
 0x5c6   :  { %v2251_v52 = vpop.permute.xlu1 %2250 }
 0x5c7   :  { %7130 = vmatmul.mubr.msk.f32.gmra.mxu0 %vm513_vm7, %v1777_v7 }
 0x5c8   :  { %v7776_v3 = vpop.eup %7775  ;;  %7153 = vmatprep.mubr.msk.f32.mxu0 %vm7964_vm0, %v7963_v1 }
 0x5c9   :  { %v2011_v47 = vmul.f32 %v7776_v3, %v8769_v54  ;;  %v7778_v16 = vpop.eup %7777 }
 0x5ca   :  { %v2012_v15 = vmul.f32 %v7778_v16, %v8771_v48 }
 0x5cb   :  { %7154 = vmatmul.mubr.msk.f32.vlgmr.msra.gmra.mxu0 %vm513_vm7, %v2011_v47 }
 0x5cc   :  { %7178 = vmatpush3.msk.msra.mxu0 %vm565_vm6, %v2255_v46  ;;  %7156 = vmatprep.mubr.msk.f32.mxu0 %vm7964_vm0, %v7963_v1  ;;  %v7780_v50 = vpop.eup %7779 }
 0x5cd   :  { %7179 = vmatprep.subr.mxu0 %v7963_v1  ;;  %v2013_v54 = vmul.f32 %v7780_v50, %v8777_v18 }
 0x5ce   :  { %7180 = vmatpush3.msra.mxu0 %v2253_v60 }
 0x5cf   :  { %7181 = vmatprep.subr.mxu0 %v7963_v1  ;;  %7157 = vmatmul.mubr.msk.f32.gmra.mxu0 %vm513_vm7, %v2012_v15 }
 0x5d0   :  { %7182 = vmatpush3.msra.mxu0 %v2251_v52  ;;  %7159 = vmatprep.mubr.msk.f32.mxu0 %vm7964_vm0, %v7963_v1  ;;  %v7782_v55 = vpop.eup %7781 }
 0x5d1   :  { %7215 = vmatprep.subr.mxu0 %v7963_v1  ;;  %v2247_v48 = vmul.f32 %v7782_v55, %v8781_v37 }
 0x5d3   :  { %7160 = vmatmul.mubr.msk.f32.gmra.mxu0 %vm513_vm7, %v2013_v54 }
 0x5d4   :  { %7183 = vmatprep.mubr.msk.f32.mxu0 %vm7964_vm0, %v7963_v1 }
 0x5d7   :  { %7184 = vmatmul.mubr.msk.f32.vlgmr.msra.gmra.mxu0 %vm513_vm7, %v2247_v48 }
 0x5d8   :  { %7186 = vmatprep.mubr.msk.f32.mxu0 %vm7964_vm0, %v7963_v1 }
 0x5f0   :  { %v2240_v6 = vpop.xlane.xlu0 %2239 }
 0x5f1   :  { %7783 = vrcp.f32 %v2240_v6 }
 0x5f7   :  { %v2243_v21 = vpop.xlane.xlu1 %2242 }
 0x5f8   :  { %7785 = vrcp.f32 %v2243_v21 }
 0x5fe   :  { %v7784_v18 = vpop.eup %7783 }
 0x5ff   :  { %v2248_v62 = vmul.f32 %v7784_v18, %v8811_v20 }
 0x601   :  { %7187 = vmatmul.mubr.msk.f32.gmra.mxu0 %vm513_vm7, %v2248_v62 }
 0x602   :  { %7189 = vmatprep.mubr.msk.f32.mxu0 %vm7964_vm0, %v7963_v1 }
 0x605   :  { %v7786_v9 = vpop.eup %7785 }
 0x606   :  { %v2249_v37 = vmul.f32 %v7786_v9, %v8830_v26 }
 0x608   :  { %7190 = vmatmul.mubr.msk.f32.gmra.mxu0 %vm513_vm7, %v2249_v37 }
 0x609   :  { %7223 = vmatprep.mubr.msk.f32.mxu0 %vm7964_vm0, %v7963_v1 }
 0x616   :  { %v8940_v28 = vpop.f32.mrf.mxu0 }
 0x618   :  { %v6975_v40 = vpop.f32.mrf.mxu0 }
 0x61a   :  { %v8942_v61 = vpop.f32.mrf.mxu0 }
 0x61c   :  { %v6978_v12 = vpop.f32.mrf.mxu0 }
 0x61e   :  { %v8944_v20 = vpop.f32.mrf.mxu0 }
 0x620   :  { %v6981_v10 = vpop.f32.mrf.mxu0 }
 0x622   :  { %v870_v56 = vpop.f32.mrf.mxu0 }
 0x623   :  { %1359 = vrot.lane.b32.xlu0 %v870_v56, %s10852_s26 }
 0x624   :  { %v7005_v25 = vpop.f32.mrf.mxu0 }
 0x626   :  { %v875_v26 = vpop.f32.mrf.mxu0 }
 0x627   :  { %1361 = vrot.lane.b32.xlu1 %v875_v26, %s10852_s26 }
 0x628   :  { %v7008_v13 = vpop.f32.mrf.mxu0 }
 0x62a   :  { %v880_v38 = vpop.f32.mrf.mxu0 }
 0x62b   :  { %1363 = vrot.lane.b32.xlu0 %v880_v38, %s10852_s26 }
 0x62c   :  { %v7011_v58 = vpop.f32.mrf.mxu0 }
 0x62e   :  { %v1106_v29 = vpop.f32.mrf.mxu0 }
 0x62f   :  { %1371 = vrot.lane.b32.xlu1 %v1106_v29, %s10850_s30 }
 0x630   :  { %v7035_v19 = vpop.f32.mrf.mxu0 }
 0x632   :  { %v1111_v49 = vpop.f32.mrf.mxu0 }
 0x633   :  { %1373 = vrot.lane.b32.xlu0 %v1111_v49, %s10850_s30 }
 0x634   :  { %v7038_v53 = vpop.f32.mrf.mxu0 }
 0x636   :  { %v1116_v23 = vpop.f32.mrf.mxu0 }
 0x638   :  { %v7041_v51 = vpop.f32.mrf.mxu0 }
 0x63a   :  { %v1342_v42 = vpop.f32.mrf.mxu0 }
 0x63b   :  { %1383 = vrot.lane.b32.xlu0 %v1342_v42, %s10848_s28 }
 0x63c   :  { %v7065_v59 = vpop.f32.mrf.mxu0 }
 0x63e   :  { %v1347_v57 = vpop.f32.mrf.mxu0 }
 0x63f   :  { %1385 = vrot.lane.b32.xlu0 %v1347_v57, %s10848_s28 }
 0x640   :  { %v7068_v35 = vpop.f32.mrf.mxu0 }
 0x642   :  { %v1352_v5 = vpop.f32.mrf.mxu0 }
 0x643   :  { %1375 = vrot.lane.b32.xlu0 %v1116_v23, %s10850_s30 }
 0x644   :  { %v7071_v8 = vpop.f32.mrf.mxu0 }
 0x646   :  { %v1627_v39 = vpop.f32.mrf.mxu0 }
 0x648   :  { %v7095_v63 = vpop.f32.mrf.mxu0 }
 0x64a   :  { %v8970_v45 = vpop.f32.mrf.mxu0 }
 0x64c   :  { %v7098_v43 = vpop.f32.mrf.mxu0 }
 0x64e   :  { %v8972_v44 = vpop.f32.mrf.mxu0 }
 0x650   :  { %v7101_v11 = vpop.f32.mrf.mxu0 }
 0x652   :  { %v1863_v46 = vpop.f32.mrf.mxu0 }
 0x653   :  { %2352 = vrot.lane.b32.xlu1 %v1863_v46, %s10852_s26 }
 0x654   :  { %v7125_v34 = vpop.f32.mrf.mxu0 }
 0x656   :  { %v1868_v2 = vpop.f32.mrf.mxu0 }
 0x657   :  { %2354 = vrot.lane.b32.xlu0 %v1868_v2, %s10852_s26 }
 0x658   :  { %v7128_v4 = vpop.f32.mrf.mxu0 }
 0x687   :  { %v1873_v36 = vpop.f32.mrf.mxu0 }
 0x689   :  { %v7131_v41 = vpop.f32.mrf.mxu0 }
 0x68b   :  { %v2099_v33 = vpop.f32.mrf.mxu0 }
 0x68c   :  { %2364 = vrot.lane.b32.xlu1 %v2099_v33, %s10850_s30 }
 0x68d   :  { %v7155_v7 = vpop.f32.mrf.mxu0 }
 0x68f   :  { %v2104_v3 = vpop.f32.mrf.mxu0 }
 0x691   :  { %v7158_v47 = vpop.f32.mrf.mxu0 }
 0x693   :  { %v2109_v16 = vpop.f32.mrf.mxu0 }
 0x695   :  { %v7161_v60 = vpop.f32.mrf.mxu0  ;;  %v1360_v52 = vpop.permute.xlu0 %1359 }
 0x696   :  { %v1392_v21 = vsel %vm420_vm5, %v8940_v28, %v1360_v52 }
 0x697   :  { %v2335_v15 = vpop.f32.mrf.mxu0 }
 0x698   :  { %2376 = vrot.lane.b32.xlu1 %v2335_v15, %s10848_s28 }
 0x699   :  { %v7185_v50 = vpop.f32.mrf.mxu0  ;;  %v1362_v55 = vpop.permute.xlu1 %1361 }
 0x69a   :  { %v1393_v37 = vsel %vm420_vm5, %v8942_v61, %v1362_v55 }
 0x69c   :  { %1387 = vrot.lane.b32.xlu1 %v1352_v5, %s10848_s28 }
 0x69d   :  { %v1364_v54 = vpop.permute.xlu0 %1363 }
 0x69e   :  { %v1394_v29 = vsel %vm420_vm5, %v8944_v20, %v1364_v54 }
 0x6a0   :  { %2366 = vrot.lane.b32.xlu1 %v2104_v3, %s10850_s30 }
 0x6a1   :  { %v1372_v6 = vpop.permute.xlu1 %1371 }
 0x6a2   :  { %v1396_v18 = vsel %vm1395_vm9, %v1392_v21, %v1372_v6 }
 0x6a4   :  { %2356 = vrot.lane.b32.xlu1 %v1873_v36, %s10852_s26  ;;  %s10879_s26 = sld [smem:[#allocation14_spill]] }
 0x6a5   :  { %v1374_v48 = vpop.permute.xlu0 %1373 }
 0x6a6   :  { %v1397_v40 = vsel %vm1395_vm9, %v1393_v37, %v1374_v48 }
 0x6ad   :  { %v1384_v62 = vpop.permute.xlu0 %1383 }
 0x6ae   :  { %v1400_v9 = vsel %vm1399_vm10, %v1396_v18, %v1384_v62 }
 0x6af   :  { %7201 = vmatmul.mubr.msk.f32.vlgmr.msra.gmra.mxu1 %vm205_vm2, %v1400_v9 }
 0x6b0   :  { %7203 = vmatprep.mubr.msk.f32.mxu1 %vm7964_vm0, %v7963_v1 }
 0x6b1   :  { %v1386_v12 = vpop.permute.xlu0 %1385 }
 0x6b2   :  { %v1401_v10 = vsel %vm1399_vm10, %v1397_v40, %v1386_v12 }
 0x6b3   :  { %7204 = vmatmul.mubr.msk.f32.gmra.mxu1 %vm205_vm2, %v1401_v10 }
 0x6b4   :  { %7206 = vmatprep.mubr.msk.f32.mxu1 %vm7964_vm0, %v7963_v1 }
 0x6b5   :  { %v1376_v38 = vpop.permute.xlu0 %1375 }
 0x6b6   :  { %v1398_v17 = vsel %vm1395_vm9, %v1394_v29, %v1376_v38  ;;  %v2617_v38 = vld [vmem:[%s10807_s11] sm:$0xff] }
 0x6c1   :  { %v2340_v28 = vpop.f32.mrf.mxu0 }
 0x6c2   :  { %2378 = vrot.lane.b32.xlu0 %v2340_v28, %s10848_s28 }
 0x6c3   :  { %v7188_v56 = vpop.f32.mrf.mxu0 }
 0x6c5   :  { %v2353_v26 = vpop.permute.xlu1 %2352 }
 0x6c6   :  { %2368 = vrot.lane.b32.xlu0 %v2109_v16, %s10850_s30  ;;  %v2385_v24 = vsel %vm420_vm5, %v1627_v39, %v2353_v26  ;;  %s10883_s30 = smov 120  }
 0x6c8   :  { %v2345_v61 = vpop.f32.mrf.mxu0 }
 0x6c9   :  { %2380 = vrot.lane.b32.xlu1 %v2345_v61, %s10848_s28  ;;  %v2355_v51 = vpop.permute.xlu0 %2354  ;;  %s10884_s28 = smov 72  }
 0x6ca   :  { %v7191_v25 = vpop.f32.mrf.mxu0  ;;  %v2386_v59 = vsel %vm420_vm5, %v8970_v45, %v2355_v51 }
 0x6fe   :  { %v2365_v0 = vpop.permute.xlu1 %2364 }
 0x6ff   :  { %v2388_v13 = vsel %vm1395_vm9, %v2385_v24, %v2365_v0 }
 0x70a   :  { %v2377_v30 = vpop.permute.xlu1 %2376 }
 0x70b   :  { %v2391_v58 = vsel %vm1399_vm10, %v2388_v13, %v2377_v30  ;;  %v2619_v13 = vld [vmem:[%s10807_s11 + $0x10] sm:$0xff]  ;;  %v2618_v30 = vld [vmem:[%s10807_s11 + $0x8] sm:$0xff] }
 0x70c   :  { %v2397_v19 = vrot.slane %v2391_v58, 7 }
 0x70e   :  { %v1388_v49 = vpop.permute.xlu1 %1387 }
 0x70f   :  { %v1402_v53 = vsel %vm1399_vm10, %v1398_v17, %v1388_v49 }
 0x710   :  { %v2403_v23 = vsel %vm565_vm6, %v1402_v53, %v2397_v19 }
 0x711   :  { %7207 = vmatmul.mubr.msk.f32.gmra.mxu1 %vm205_vm2, %v2403_v23 }
 0x712   :  { %7209 = vmatprep.mubr.msk.f32.mxu1 %vm7964_vm0, %v7963_v1  ;;  %v2367_v42 = vpop.permute.xlu1 %2366 }
 0x713   :  { %v2389_v20 = vsel %vm1395_vm9, %v2386_v59, %v2367_v42 }
 0x716   :  { %v2357_v8 = vpop.permute.xlu1 %2356 }
 0x717   :  { %v2387_v43 = vsel %vm420_vm5, %v8972_v44, %v2357_v8  ;;  %v6406_v44 = vld [vmem:[%s10878_s5] ss:$0 sm:$0xff] }
 0x734   :  { %v2379_v57 = vpop.permute.xlu0 %2378 }
 0x735   :  { %v2392_v35 = vsel %vm1399_vm10, %v2389_v20, %v2379_v57 }
 0x736   :  { %v2398_v5 = vrot.slane %v2392_v35, 7 }
 0x738   :  { %v2369_v39 = vpop.permute.xlu0 %2368  ;;  %v2399_v63 = vsel %vm565_vm6, %v2397_v19, %v2398_v5 }
 0x739   :  { %7210 = vmatmul.mubr.msk.f32.gmra.mxu1 %vm205_vm2, %v2399_v63  ;;  %v2390_v45 = vsel %vm1395_vm9, %v2387_v43, %v2369_v39 }
 0x73a   :  { %7212 = vmatprep.mubr.msk.f32.mxu1 %vm7964_vm0, %v7963_v1 }
 0x73b   :  { %v2381_v11 = vpop.permute.xlu1 %2380 }
 0x73c   :  { %v2393_v46 = vsel %vm1399_vm10, %v2390_v45, %v2381_v11 }
 0x73d   :  { %v2400_v34 = vrot.slane %v2393_v46, 7 }
 0x73f   :  { %v2401_v2 = vsel %vm565_vm6, %v2398_v5, %v2400_v34 }
 0x740   :  { %7213 = vmatmul.mubr.msk.f32.gmra.mxu1 %vm205_vm2, %v2401_v2  ;;  %v9094_v2 = vld [vmem:[%s10879_s26] ss:$0 sm:$0xff] }
 0x741   :  { %7270 = vmatprep.mubr.msk.f32.mxu1 %vm7964_vm0, %v7963_v1 }
 0x76f   :  { %v2487_v4 = vpop.f32.mrf.mxu1 }
 0x770   :  { %v2511_v36 = vadd.f32 %v2487_v4, %v8179_v14 }
 0x771   :  { %v7202_v41 = vpop.f32.mrf.mxu1 }
 0x772   :  { %v9029_v33 = vadd.f32 %v6406_v44, %v2511_v36 }
 0x773   :  { %v2492_v7 = vpop.f32.mrf.mxu1 }
 0x774   :  { %v2512_v3 = vadd.f32 %v2492_v7, %v8189_v22  ;;  %v2530_v47 = vsel %vm205_vm2, %v9029_v33, 0.0 }
 0x775   :  { %v7205_v16 = vpop.f32.mrf.mxu1  ;;  %2531 = vadd.xlane.f32.xlu0 %v2530_v47 }
 0x776   :  { %v9034_v60 = vadd.f32 %v6406_v44, %v2512_v3 }
 0x778   :  { %v2533_v15 = vsel %vm205_vm2, %v9034_v60, 0.0 }
 0x779   :  { %2534 = vadd.xlane.f32.xlu1 %v2533_v15  ;;  %v2793_v15 = vld [vmem:[%s10809_s13 + $0x78] sm:$0xff] }
 0x77a   :  { %7239 = vmatpush3.msra.mxu1 %v2793_v15 }
 0x77b   :  { %7240 = vmatprep.subr.mxu1 %v7963_v1 }
 0x7d1   :  { %v2497_v50 = vpop.f32.mrf.mxu1 }
 0x7d2   :  { %v2513_v14 = vadd.f32 %v2497_v50, %v8203_v32  ;;  %v2792_v50 = vld [vmem:[%s10809_s13 + $0x70] sm:$0xff] }
 0x7d3   :  { %v7208_v52 = vpop.f32.mrf.mxu1  ;;  %7241 = vmatpush3.msra.mxu1 %v2792_v50 }
 0x7d4   :  { %v9039_v54 = vadd.f32 %v6406_v44, %v2513_v14  ;;  %7242 = vmatprep.subr.mxu1 %v7963_v1  ;;  %v2791_v14 = vld [vmem:[%s10809_s13 + $0x68] sm:$0xff]  ;;  %v2790_v52 = vld [vmem:[%s10809_s13 + $0x60] sm:$0xff] }
 0x7d5   :  { %7243 = vmatpush3.msra.mxu1 %v2791_v14 }
 0x7d6   :  { %v2536_v22 = vsel %vm205_vm2, %v9039_v54, 0.0  ;;  %7244 = vmatprep.subr.mxu1 %v7963_v1 }
 0x7d7   :  { %2537 = vadd.xlane.f32.xlu0 %v2536_v22  ;;  %7245 = vmatpush3.msra.mxu1 %v2790_v52 }
 0x7d8   :  { %7246 = vmatprep.subr.mxu1 %v7963_v1 }
 0x7f9   :  { %v2502_v55 = vpop.f32.mrf.mxu1 }
 0x7fa   :  { %v2514_v48 = vadd.f32 %v2502_v55, %v8201_v31 }
 0x7fb   :  { %v7211_v6 = vpop.f32.mrf.mxu1 }
 0x7fc   :  { %v9044_v21 = vadd.f32 %v6406_v44, %v2514_v48  ;;  %v2789_v48 = vld [vmem:[%s10809_s13 + $0x58] sm:$0xff] }
 0x7fd   :  { %7247 = vmatpush3.msra.mxu1 %v2789_v48 }
 0x7fe   :  { %v2539_v18 = vsel %vm205_vm2, %v9044_v21, 0.0  ;;  %v2532_v62 = vpop.xlane.xlu0 %2531  ;;  %7248 = vmatprep.subr.mxu1 %v7963_v1 }
 0x7ff   :  { %2540 = vadd.xlane.f32.xlu0 %v2539_v18  ;;  %v2545_v9 = vmul.f32 0.03125, %v2532_v62  ;;  %v2788_v18 = vld [vmem:[%s10809_s13 + $0x50] sm:$0xff]  ;;  %v2787_v62 = vld [vmem:[%s10809_s13 + $0x48] sm:$0xff] }
 0x800   :  { %v2507_v32 = vpop.f32.mrf.mxu1  ;;  %7249 = vmatpush3.msra.mxu1 %v2788_v18 }
 0x801   :  { %v2550_v37 = vsub.f32 %v9029_v33, %v2545_v9  ;;  %v2515_v40 = vadd.f32 %v2507_v32, %v8197_v27  ;;  %v2620_v27 = vld [vmem:[%s10807_s11 + $0x18] sm:$0xff]  ;;  %7250 = vmatprep.subr.mxu1 %v7963_v1  ;;  %v2786_v9 = vld [vmem:[%s10809_s13 + $0x40] sm:$0xff] }
 0x802   :  { %v7214_v12 = vpop.f32.mrf.mxu1  ;;  %v2535_v10 = vpop.xlane.xlu1 %2534  ;;  %7216 = vmatpush3.msra.mxu0 %v2620_v27  ;;  %7251 = vmatpush3.msra.mxu1 %v2787_v62  ;;  %v2785_v32 = vld [vmem:[%s10809_s13 + $0x38] sm:$0xff] }
 0x803   :  { %v9050_v28 = vadd.f32 %v6406_v44, %v2515_v40  ;;  %v2546_v56 = vmul.f32 0.03125, %v2535_v10  ;;  %v2555_v31 = vmul.f32 %v2550_v37, %v2550_v37  ;;  %7217 = vmatprep.subr.mxu0 %v7963_v1  ;;  %v9099_v44 = vld [vmem:[%s10806_s10] ss:$0 sm:$0xff]  ;;  %7252 = vmatprep.subr.mxu1 %v7963_v1  ;;  %v2783_v40 = vld [vmem:[%s10809_s13 + $0x28] sm:$0xff]  ;;  %v2781_v10 = vld [vmem:[%s10809_s13 + $0x18] sm:$0xff] }
 0x804   :  { %7218 = vmatpush3.msra.mxu0 %v2619_v13  ;;  %7253 = vmatpush3.msra.mxu1 %v2786_v9  ;;  %v2782_v12 = vld [vmem:[%s10809_s13 + $0x20] sm:$0xff] }
 0x805   :  { %v2551_v61 = vsub.f32 %v9034_v60, %v2546_v56  ;;  %v2560_v25 = vsel %vm205_vm2, %v2555_v31, 0.0  ;;  %v2542_v26 = vsel %vm218_vm3, %v9050_v28, 0.0  ;;  %7219 = vmatprep.subr.mxu0 %v7963_v1  ;;  %7254 = vmatprep.subr.mxu1 %v7963_v1 }
 0x806   :  { %2561 = vadd.xlane.f32.xlu1 %v2560_v25  ;;  %2543 = vadd.xlane.f32.xlu0 %v2542_v26  ;;  %v2779_v26 = vld [vmem:[%s10809_s13 + $0x8] sm:$0xff] }
 0x807   :  { %v2556_v0 = vmul.f32 %v2551_v61, %v2551_v61  ;;  %7220 = vmatpush3.msra.mxu0 %v2618_v30  ;;  %7255 = vmatpush3.msra.mxu1 %v2785_v32 }
 0x808   :  { %7221 = vmatprep.subr.mxu0 %v7963_v1  ;;  %7256 = vmatprep.subr.mxu1 %v7963_v1 }
 0x809   :  { %v2563_v24 = vsel %vm205_vm2, %v2556_v0, 0.0  ;;  %7222 = vmatpush3.msra.mxu0 %v2617_v38  ;;  %v2778_v0 = vld [vmem:[%s10809_s13] sm:$0xff] }
 0x80a   :  { %2564 = vadd.xlane.f32.xlu0 %v2563_v24  ;;  %7285 = vmatprep.subr.mxu0 %v7963_v1 }
 0x860   :  { %v2538_v58 = vpop.xlane.xlu0 %2537 }
 0x861   :  { %v2547_v29 = vmul.f32 0.03125, %v2538_v58 }
 0x863   :  { %v9074_v17 = vsub.f32 %v9039_v54, %v2547_v29 }
 0x865   :  { %v2557_v19 = vmul.f32 %v9074_v17, %v9074_v17 }
 0x867   :  { %v2566_v49 = vsel %vm205_vm2, %v2557_v19, 0.0 }
 0x868   :  { %2567 = vadd.xlane.f32.xlu1 %v2566_v49 }
 0x888   :  { %v2541_v53 = vpop.xlane.xlu0 %2540 }
 0x889   :  { %v2548_v23 = vmul.f32 0.03125, %v2541_v53 }
 0x88b   :  { %v9080_v51 = vsub.f32 %v9044_v21, %v2548_v23 }
 0x88d   :  { %v2558_v42 = vmul.f32 %v9080_v51, %v9080_v51 }
 0x88f   :  { %v2544_v59 = vpop.xlane.xlu0 %2543  ;;  %v2569_v20 = vsel %vm205_vm2, %v2558_v42, 0.0  ;;  %v2562_v57 = vpop.xlane.xlu1 %2561 }
 0x890   :  { %v2549_v35 = vmul.f32 0.03125, %v2544_v59  ;;  %2570 = vadd.xlane.f32.xlu0 %v2569_v20  ;;  %v2575_v5 = vmul.f32 0.03125, %v2562_v57 }
 0x892   :  { %v9086_v8 = vsub.f32 %v9050_v28, %v2549_v35  ;;  %v2580_v39 = vadd.f32 1e-06, %v2575_v5 }
 0x893   :  { %v2565_v63 = vpop.xlane.xlu0 %2564 }
 0x894   :  { %7787 = vrsqrt.f32 %v2580_v39  ;;  %v2576_v43 = vmul.f32 0.03125, %v2565_v63  ;;  %v2559_v45 = vmul.f32 %v9086_v8, %v9086_v8 }
 0x896   :  { %v2581_v11 = vadd.f32 1e-06, %v2576_v43  ;;  %v2572_v46 = vsel %vm218_vm3, %v2559_v45, 0.0 }
 0x897   :  { %2573 = vadd.xlane.f32.xlu1 %v2572_v46 }
 0x898   :  { %7789 = vrsqrt.f32 %v2581_v11 }
 0x8a1   :  { %v7788_v34 = vpop.eup %7787 }
 0x8a2   :  { %v2590_v4 = vmul.f32 %v7788_v34, %v2550_v37  ;;  %v2784_v37 = vld [vmem:[%s10809_s13 + $0x30] sm:$0xff] }
 0x8a3   :  { %7257 = vmatpush3.msra.mxu1 %v2784_v37 }
 0x8a4   :  { %v2601_v36 = vmul.f32 %v9094_v2, %v2590_v4  ;;  %7258 = vmatprep.subr.mxu1 %v7963_v1 }
 0x8a5   :  { %v7790_v41 = vpop.eup %7789  ;;  %7259 = vmatpush3.msra.mxu1 %v2783_v40 }
 0x8a6   :  { %v2612_v7 = vadd.f32 %v9099_v44, %v2601_v36  ;;  %v2591_v3 = vmul.f32 %v7790_v41, %v2551_v61  ;;  %7260 = vmatprep.subr.mxu1 %v7963_v1  ;;  %v2780_v61 = vld [vmem:[%s10809_s13 + $0x10] sm:$0xff] }
 0x8a7   :  { %7261 = vmatpush3.msra.mxu1 %v2782_v12 }
 0x8a8   :  { %7224 = vmatmul.mubr.msk.f32.vlgmr.msra.gmra.mxu0 %vm205_vm2, %v2612_v7  ;;  %v2602_v47 = vmul.f32 %v9094_v2, %v2591_v3  ;;  %7262 = vmatprep.subr.mxu1 %v7963_v1 }
 0x8a9   :  { %7226 = vmatprep.mubr.msk.f32.mxu0 %vm7964_vm0, %v7963_v1  ;;  %7263 = vmatpush3.msra.mxu1 %v2781_v10 }
 0x8aa   :  { %v2613_v16 = vadd.f32 %v9099_v44, %v2602_v47  ;;  %7264 = vmatprep.subr.mxu1 %v7963_v1 }
 0x8ab   :  { %7265 = vmatpush3.msra.mxu1 %v2780_v61 }
 0x8ac   :  { %7227 = vmatmul.mubr.msk.f32.gmra.mxu0 %vm205_vm2, %v2613_v16  ;;  %7266 = vmatprep.subr.mxu1 %v7963_v1 }
 0x8ad   :  { %7229 = vmatprep.mubr.msk.f32.mxu0 %vm7964_vm0, %v7963_v1  ;;  %7267 = vmatpush3.msra.mxu1 %v2779_v26 }
 0x8ae   :  { %7268 = vmatprep.subr.mxu1 %v7963_v1 }
 0x8af   :  { %7269 = vmatpush3.msra.mxu1 %v2778_v0 }
 0x8b0   :  { %7323 = vmatprep.subr.mxu1 %v7963_v1 }
 0x8f1   :  { %v2568_v22 = vpop.xlane.xlu1 %2567 }
 0x8f2   :  { %v2577_v55 = vmul.f32 0.03125, %v2568_v22 }
 0x8f4   :  { %v2582_v6 = vadd.f32 1e-06, %v2577_v55 }
 0x8f6   :  { %7791 = vrsqrt.f32 %v2582_v6 }
 0x903   :  { %v7792_v56 = vpop.eup %7791 }
 0x904   :  { %v2592_v31 = vmul.f32 %v7792_v56, %v9074_v17 }
 0x906   :  { %v2603_v25 = vmul.f32 %v9094_v2, %v2592_v31 }
 0x908   :  { %v2614_v24 = vadd.f32 %v9099_v44, %v2603_v25 }
 0x90a   :  { %7230 = vmatmul.mubr.msk.f32.gmra.mxu0 %vm205_vm2, %v2614_v24 }
 0x90b   :  { %7232 = vmatprep.mubr.msk.f32.mxu0 %vm7964_vm0, %v7963_v1 }
 0x919   :  { %v2571_v27 = vpop.xlane.xlu0 %2570 }
 0x91a   :  { %v2578_v13 = vmul.f32 0.03125, %v2571_v27 }
 0x91c   :  { %v2583_v30 = vadd.f32 1e-06, %v2578_v13 }
 0x91e   :  { %7793 = vrsqrt.f32 %v2583_v30 }
 0x920   :  { %v2574_v38 = vpop.xlane.xlu1 %2573 }
 0x921   :  { %v2579_v58 = vmul.f32 0.03125, %v2574_v38 }
 0x923   :  { %v2584_v29 = vadd.f32 1e-06, %v2579_v58 }
 0x925   :  { %7795 = vrsqrt.f32 %v2584_v29 }
 0x92b   :  { %v7794_v17 = vpop.eup %7793 }
 0x92c   :  { %v2593_v19 = vmul.f32 %v7794_v17, %v9080_v51  ;;  %v6409_v51 = vld [vmem:[%s10808_s12] ss:$0 sm:$0xff] }
 0x92e   :  { %v2604_v49 = vmul.f32 %v9094_v2, %v2593_v19 }
 0x930   :  { %v2615_v53 = vadd.f32 %v9099_v44, %v2604_v49 }
 0x932   :  { %v7796_v23 = vpop.eup %7795  ;;  %7233 = vmatmul.mubr.msk.f32.gmra.mxu0 %vm205_vm2, %v2615_v53 }
 0x933   :  { %7235 = vmatprep.mubr.msk.f32.mxu0 %vm7964_vm0, %v7963_v1  ;;  %v2594_v42 = vmul.f32 %v7796_v23, %v9086_v8 }
 0x935   :  { %v2605_v59 = vmul.f32 %v9094_v2, %v2594_v42 }
 0x937   :  { %v2616_v20 = vadd.f32 %v9099_v44, %v2605_v59 }
 0x939   :  { %7236 = vmatmul.mubr.msk.f32.gmra.mxu0 %vm205_vm2, %v2616_v20 }
 0x93a   :  { %7293 = vmatprep.mubr.msk.f32.mxu0 %vm7964_vm0, %v7963_v1 }
 0x968   :  { %v2709_v57 = vpop.f32.mrf.mxu0 }
 0x969   :  { %v2710_v35 = vadd.f32 %v6409_v51, %v2709_v57 }
 0x96a   :  { %v7225_v5 = vpop.f32.mrf.mxu0 }
 0x96b   :  { %v2733_v39 = vmul.f32 %v2710_v35, %v2710_v35 }
 0x96c   :  { %v2714_v63 = vpop.f32.mrf.mxu0 }
 0x96d   :  { %v2738_v43 = vmul.f32 %v2733_v39, %v2710_v35  ;;  %v2715_v8 = vadd.f32 %v6409_v51, %v2714_v63  ;;  %v6415_v39 = vld [vmem:[%s10810_s14] ss:$0 sm:$0xff] }
 0x96e   :  { %v7228_v45 = vpop.f32.mrf.mxu0 }
 0x96f   :  { %v2743_v11 = vmul.f32 0.044715, %v2738_v43  ;;  %v2734_v46 = vmul.f32 %v2715_v8, %v2715_v8 }
 0x971   :  { %v2748_v34 = vadd.f32 %v2743_v11, %v2710_v35  ;;  %v2739_v2 = vmul.f32 %v2734_v46, %v2715_v8 }
 0x973   :  { %v2753_v4 = vmul.f32 0.7978846, %v2748_v34  ;;  %v2744_v44 = vmul.f32 0.044715, %v2739_v2 }
 0x975   :  { %7797 = vtanh.f32 %v2753_v4  ;;  %v2749_v36 = vadd.f32 %v2744_v44, %v2715_v8 }
 0x977   :  { %v2754_v41 = vmul.f32 0.7978846, %v2749_v36 }
 0x979   :  { %7799 = vtanh.f32 %v2754_v41 }
 0x982   :  { %v7798_v7 = vpop.eup %7797 }
 0x983   :  { %v2763_v3 = vadd.f32 1.0, %v7798_v7 }
 0x985   :  { %v2768_v47 = vmul.f32 0.5, %v2763_v3 }
 0x986   :  { %v7800_v16 = vpop.eup %7799 }
 0x987   :  { %v2773_v15 = vmul.f32 %v2768_v47, %v2710_v35  ;;  %v2764_v50 = vadd.f32 1.0, %v7800_v16 }
 0x989   :  { %7271 = vmatmul.mubr.f32.vlgmr.msra.gmra.mxu1 %v2773_v15  ;;  %v2769_v14 = vmul.f32 0.5, %v2764_v50 }
 0x98a   :  { %7273 = vmatprep.mubr.msk.f32.mxu1 %vm7964_vm0, %v7963_v1 }
 0x98b   :  { %v2774_v52 = vmul.f32 %v2769_v14, %v2715_v8 }
 0x98d   :  { %7274 = vmatmul.mubr.f32.gmra.mxu1 %v2774_v52 }
 0x98e   :  { %7276 = vmatprep.mubr.msk.f32.mxu1 %vm7964_vm0, %v7963_v1 }
 0x9ca   :  { %v2719_v22 = vpop.f32.mrf.mxu0 }
 0x9cb   :  { %v2720_v55 = vadd.f32 %v6409_v51, %v2719_v22 }
 0x9cc   :  { %v7231_v48 = vpop.f32.mrf.mxu0 }
 0x9cd   :  { %v2735_v6 = vmul.f32 %v2720_v55, %v2720_v55 }
 0x9cf   :  { %v2740_v18 = vmul.f32 %v2735_v6, %v2720_v55 }
 0x9d1   :  { %v2745_v62 = vmul.f32 0.044715, %v2740_v18 }
 0x9d3   :  { %v2750_v9 = vadd.f32 %v2745_v62, %v2720_v55 }
 0x9d5   :  { %v2755_v32 = vmul.f32 0.7978846, %v2750_v9 }
 0x9d7   :  { %7801 = vtanh.f32 %v2755_v32 }
 0x9e4   :  { %v7802_v37 = vpop.eup %7801 }
 0x9e5   :  { %v2765_v40 = vadd.f32 1.0, %v7802_v37 }
 0x9e7   :  { %v2770_v12 = vmul.f32 0.5, %v2765_v40 }
 0x9e9   :  { %v2775_v10 = vmul.f32 %v2770_v12, %v2720_v55  ;;  %v6422_v12 = vld [vmem:[%s10873_s1 + $0x30] sm:$0xff] }
 0x9eb   :  { %7277 = vmatmul.mubr.f32.gmra.mxu1 %v2775_v10  ;;  %v6421_v10 = vld [vmem:[%s10873_s1 + $0x28] sm:$0xff] }
 0x9ec   :  { %7279 = vmatprep.mubr.msk.f32.mxu1 %vm7964_vm0, %v7963_v1 }
 0x9f2   :  { %v2724_v56 = vpop.f32.mrf.mxu0 }
 0x9f3   :  { %v2725_v31 = vadd.f32 %v6409_v51, %v2724_v56  ;;  %v6420_v56 = vld [vmem:[%s10873_s1 + $0x20] sm:$0xff] }
 0x9f4   :  { %v7234_v61 = vpop.f32.mrf.mxu0 }
 0x9f5   :  { %v2736_v25 = vmul.f32 %v2725_v31, %v2725_v31 }
 0x9f7   :  { %v2741_v26 = vmul.f32 %v2736_v25, %v2725_v31 }
 0x9f9   :  { %v2746_v0 = vmul.f32 0.044715, %v2741_v26  ;;  %v2729_v24 = vpop.f32.mrf.mxu0 }
 0x9fa   :  { %v2730_v27 = vadd.f32 %v6409_v51, %v2729_v24 }
 0x9fb   :  { %v2751_v13 = vadd.f32 %v2746_v0, %v2725_v31  ;;  %v7237_v30 = vpop.f32.mrf.mxu0 }
 0x9fc   :  { %v2737_v38 = vmul.f32 %v2730_v27, %v2730_v27 }
 0x9fd   :  { %v2756_v58 = vmul.f32 0.7978846, %v2751_v13 }
 0x9fe   :  { %v2742_v29 = vmul.f32 %v2737_v38, %v2730_v27 }
 0x9ff   :  { %7803 = vtanh.f32 %v2756_v58 }
 0xa00   :  { %v2747_v17 = vmul.f32 0.044715, %v2742_v29 }
 0xa02   :  { %v2752_v19 = vadd.f32 %v2747_v17, %v2730_v27 }
 0xa04   :  { %v2757_v49 = vmul.f32 0.7978846, %v2752_v19 }
 0xa06   :  { %7805 = vtanh.f32 %v2757_v49 }
 0xa0c   :  { %v7804_v53 = vpop.eup %7803 }
 0xa0d   :  { %v2766_v23 = vadd.f32 1.0, %v7804_v53 }
 0xa0f   :  { %v2771_v42 = vmul.f32 0.5, %v2766_v23 }
 0xa11   :  { %v2776_v59 = vmul.f32 %v2771_v42, %v2725_v31 }
 0xa13   :  { %v7806_v20 = vpop.eup %7805  ;;  %7280 = vmatmul.mubr.f32.gmra.mxu1 %v2776_v59 }
 0xa14   :  { %7282 = vmatprep.mubr.msk.f32.mxu1 %vm7964_vm0, %v7963_v1  ;;  %v2767_v51 = vadd.f32 1.0, %v7806_v20 }
 0xa16   :  { %v2772_v57 = vmul.f32 0.5, %v2767_v51 }
 0xa18   :  { %v2777_v35 = vmul.f32 %v2772_v57, %v2730_v27 }
 0xa1a   :  { %7283 = vmatmul.mubr.f32.gmra.mxu1 %v2777_v35  ;;  %v6418_v35 = vld [vmem:[%s10874_s2 + $0x1] ss:$0 sm:$0xff]  ;;  %s10890_s2 = smov 40  }
 0xa1b   :  { %7329 = vmatprep.mubr.msk.f32.mxu1 %vm7964_vm0, %v7963_v1 }
 0xa49   :  { %v2860_v5 = vpop.f32.mrf.mxu1 }
 0xa4a   :  { %v2884_v63 = vadd.f32 %v2860_v5, %v9029_v33 }
 0xa4b   :  { %v7272_v43 = vpop.f32.mrf.mxu1 }
 0xa4c   :  { %v9210_v8 = vadd.f32 %v6415_v39, %v2884_v63 }
 0xa4d   :  { %v2865_v45 = vpop.f32.mrf.mxu1 }
 0xa4e   :  { %v2885_v11 = vadd.f32 %v2865_v45, %v9034_v60  ;;  %v2905_v46 = vsel %vm205_vm2, %v9210_v8, 0.0 }
 0xa4f   :  { %2906 = vadd.xlane.f32.xlu0 %v2905_v46  ;;  %v7275_v34 = vpop.f32.mrf.mxu1 }
 0xa50   :  { %v9215_v2 = vadd.f32 %v6415_v39, %v2885_v11 }
 0xa52   :  { %v2908_v4 = vsel %vm205_vm2, %v9215_v2, 0.0 }
 0xa53   :  { %2909 = vadd.xlane.f32.xlu1 %v2908_v4 }
 0xaab   :  { %v2870_v44 = vpop.f32.mrf.mxu1 }
 0xaac   :  { %v2886_v33 = vadd.f32 %v2870_v44, %v9039_v54 }
 0xaad   :  { %v7278_v36 = vpop.f32.mrf.mxu1 }
 0xaae   :  { %v9220_v41 = vadd.f32 %v6415_v39, %v2886_v33 }
 0xab0   :  { %v2911_v60 = vsel %vm205_vm2, %v9220_v41, 0.0 }
 0xab1   :  { %2912 = vadd.xlane.f32.xlu0 %v2911_v60 }
 0xad3   :  { %v2875_v7 = vpop.f32.mrf.mxu1 }
 0xad4   :  { %v2887_v3 = vadd.f32 %v2875_v7, %v9044_v21 }
 0xad5   :  { %v7281_v47 = vpop.f32.mrf.mxu1 }
 0xad6   :  { %v9225_v16 = vadd.f32 %v6415_v39, %v2887_v3 }
 0xad8   :  { %v2907_v15 = vpop.xlane.xlu0 %2906  ;;  %v2914_v50 = vsel %vm205_vm2, %v9225_v16, 0.0 }
 0xad9   :  { %v2920_v14 = vmul.f32 0.03125, %v2907_v15  ;;  %2915 = vadd.xlane.f32.xlu1 %v2914_v50 }
 0xada   :  { %v2880_v54 = vpop.f32.mrf.mxu1 }
 0xadb   :  { %v2925_v52 = vsub.f32 %v9210_v8, %v2920_v14  ;;  %v2888_v22 = vadd.f32 %v2880_v54, %v9050_v28  ;;  %v6423_v28 = vld [vmem:[%s10873_s1 + $0x38] sm:$0xff]  ;;  %s10886_s1 = smov 104  }
 0xadc   :  { %v2910_v55 = vpop.xlane.xlu1 %2909  ;;  %v7284_v48 = vpop.f32.mrf.mxu1  ;;  %7286 = vmatpush3.msra.mxu0 %v6423_v28  ;;  %v6425_v28 = vld [vmem:[%s10876_s8 + $0x1] ss:$0 sm:$0xff]  ;;  %s10882_s8 = smov 80  }
 0xadd   :  { %v9231_v6 = vadd.f32 %v6415_v39, %v2888_v22  ;;  %v2921_v18 = vmul.f32 0.03125, %v2910_v55  ;;  %v2930_v21 = vmul.f32 %v2925_v52, %v2925_v52  ;;  %7287 = vmatprep.subr.mxu0 %v7963_v1  ;;  %v6419_v39 = vld [vmem:[%s10875_s7 + $0x1] ss:$0 sm:$0xff]  ;;  %s10891_s7 = smov 8  }
 0xade   :  { %7288 = vmatpush3.msra.mxu0 %v6422_v12 }
 0xadf   :  { %v2926_v62 = vsub.f32 %v9215_v2, %v2921_v18  ;;  %v2935_v9 = vsel %vm205_vm2, %v2930_v21, 0.0  ;;  %v2917_v32 = vsel %vm218_vm3, %v9231_v6, 0.0  ;;  %7289 = vmatprep.subr.mxu0 %v7963_v1 }
 0xae0   :  { %2936 = vadd.xlane.f32.xlu1 %v2935_v9  ;;  %2918 = vadd.xlane.f32.xlu0 %v2917_v32 }
 0xae1   :  { %v2931_v37 = vmul.f32 %v2926_v62, %v2926_v62  ;;  %7290 = vmatpush3.msra.mxu0 %v6421_v10 }
 0xae2   :  { %7291 = vmatprep.subr.mxu0 %v7963_v1 }
 0xae3   :  { %v2938_v40 = vsel %vm205_vm2, %v2931_v37, 0.0  ;;  %7292 = vmatpush3.msra.mxu0 %v6420_v56 }
 0xae4   :  { %2939 = vadd.xlane.f32.xlu0 %v2938_v40  ;;  %7308 = vmatprep.subr.mxu0 %v7963_v1 }
 0xb3a   :  { %v2913_v31 = vpop.xlane.xlu0 %2912 }
 0xb3b   :  { %v2922_v61 = vmul.f32 0.03125, %v2913_v31 }
 0xb3d   :  { %v2927_v25 = vsub.f32 %v9220_v41, %v2922_v61 }
 0xb3f   :  { %v2932_v26 = vmul.f32 %v2927_v25, %v2927_v25 }
 0xb41   :  { %v2941_v0 = vsel %vm205_vm2, %v2932_v26, 0.0 }
 0xb42   :  { %2942 = vadd.xlane.f32.xlu1 %v2941_v0 }
 0xb62   :  { %v2916_v24 = vpop.xlane.xlu1 %2915 }
 0xb63   :  { %v2923_v27 = vmul.f32 0.03125, %v2916_v24 }
 0xb65   :  { %v2928_v13 = vsub.f32 %v9225_v16, %v2923_v27 }
 0xb67   :  { %v2933_v30 = vmul.f32 %v2928_v13, %v2928_v13 }
 0xb69   :  { %v2937_v38 = vpop.xlane.xlu1 %2936  ;;  %v2944_v58 = vsel %vm205_vm2, %v2933_v30, 0.0  ;;  %v2919_v29 = vpop.xlane.xlu0 %2918 }
 0xb6a   :  { %v2950_v17 = vmul.f32 0.03125, %v2937_v38  ;;  %2945 = vadd.xlane.f32.xlu0 %v2944_v58  ;;  %v2924_v19 = vmul.f32 0.03125, %v2919_v29 }
 0xb6c   :  { %v2955_v49 = vadd.f32 1e-06, %v2950_v17  ;;  %v2929_v53 = vsub.f32 %v9231_v6, %v2924_v19 }
 0xb6d   :  { %v2940_v23 = vpop.xlane.xlu0 %2939 }
 0xb6e   :  { %7807 = vrsqrt.f32 %v2955_v49  ;;  %v2951_v42 = vmul.f32 0.03125, %v2940_v23  ;;  %v2934_v59 = vmul.f32 %v2929_v53, %v2929_v53 }
 0xb70   :  { %v2956_v20 = vadd.f32 1e-06, %v2951_v42  ;;  %v2947_v51 = vsel %vm218_vm3, %v2934_v59, 0.0 }
 0xb71   :  { %2948 = vadd.xlane.f32.xlu1 %v2947_v51 }
 0xb72   :  { %7809 = vrsqrt.f32 %v2956_v20 }
 0xb7b   :  { %v7808_v57 = vpop.eup %7807 }
 0xb7c   :  { %v2965_v5 = vmul.f32 %v7808_v57, %v2925_v52 }
 0xb7e   :  { %v2976_v63 = vmul.f32 %v6418_v35, %v2965_v5 }
 0xb7f   :  { %v7810_v43 = vpop.eup %7809 }
 0xb80   :  { %v2987_v45 = vadd.f32 %v6419_v39, %v2976_v63  ;;  %v2966_v11 = vmul.f32 %v7810_v43, %v2926_v62 }
 0xb82   :  { %7294 = vmatmul.mubr.msk.f32.vlgmr.msra.gmra.mxu0 %vm205_vm2, %v2987_v45  ;;  %v2977_v46 = vmul.f32 %v6418_v35, %v2966_v11 }
 0xb83   :  { %7296 = vmatprep.mubr.msk.f32.mxu0 %vm7964_vm0, %v7963_v1 }
 0xb84   :  { %v2988_v34 = vadd.f32 %v6419_v39, %v2977_v46 }
 0xb86   :  { %7297 = vmatmul.mubr.msk.f32.gmra.mxu0 %vm205_vm2, %v2988_v34 }
 0xb87   :  { %7299 = vmatprep.mubr.msk.f32.mxu0 %vm7964_vm0, %v7963_v1 }
 0xbcb   :  { %v2943_v4 = vpop.xlane.xlu1 %2942 }
 0xbcc   :  { %v2952_v44 = vmul.f32 0.03125, %v2943_v4 }
 0xbce   :  { %v2957_v33 = vadd.f32 1e-06, %v2952_v44 }
 0xbd0   :  { %7811 = vrsqrt.f32 %v2957_v33 }
 0xbdd   :  { %v7812_v36 = vpop.eup %7811 }
 0xbde   :  { %v2967_v60 = vmul.f32 %v7812_v36, %v2927_v25 }
 0xbe0   :  { %v2978_v7 = vmul.f32 %v6418_v35, %v2967_v60 }
 0xbe2   :  { %v2989_v3 = vadd.f32 %v6419_v39, %v2978_v7 }
 0xbe4   :  { %7300 = vmatmul.mubr.msk.f32.gmra.mxu0 %vm205_vm2, %v2989_v3 }
 0xbe5   :  { %7302 = vmatprep.mubr.msk.f32.mxu0 %vm7964_vm0, %v7963_v1 }
 0xbf3   :  { %v2946_v47 = vpop.xlane.xlu0 %2945 }
 0xbf4   :  { %v2953_v15 = vmul.f32 0.03125, %v2946_v47 }
 0xbf6   :  { %v2958_v50 = vadd.f32 1e-06, %v2953_v15 }
 0xbf8   :  { %7813 = vrsqrt.f32 %v2958_v50 }
 0xbfa   :  { %v2949_v14 = vpop.xlane.xlu1 %2948 }
 0xbfb   :  { %v2954_v54 = vmul.f32 0.03125, %v2949_v14 }
 0xbfd   :  { %v2959_v52 = vadd.f32 1e-06, %v2954_v54 }
 0xbff   :  { %7815 = vrsqrt.f32 %v2959_v52 }
 0xc05   :  { %v7814_v22 = vpop.eup %7813 }
 0xc06   :  { %v2968_v55 = vmul.f32 %v7814_v22, %v2928_v13 }
 0xc08   :  { %v2979_v48 = vmul.f32 %v6418_v35, %v2968_v55 }
 0xc0a   :  { %v2990_v18 = vadd.f32 %v6419_v39, %v2979_v48 }
 0xc0c   :  { %v7816_v21 = vpop.eup %7815  ;;  %7303 = vmatmul.mubr.msk.f32.gmra.mxu0 %vm205_vm2, %v2990_v18 }
 0xc0d   :  { %7305 = vmatprep.mubr.msk.f32.mxu0 %vm7964_vm0, %v7963_v1  ;;  %v2969_v62 = vmul.f32 %v7816_v21, %v2929_v53 }
 0xc0f   :  { %v2980_v9 = vmul.f32 %v6418_v35, %v2969_v62 }
 0xc11   :  { %v2991_v32 = vadd.f32 %v6419_v39, %v2980_v9 }
 0xc13   :  { %7306 = vmatmul.mubr.msk.f32.gmra.mxu0 %vm205_vm2, %v2991_v32 }
 0xc14   :  { %7314 = vmatprep.mubr.msk.f32.mxu0 %vm7964_vm0, %v7963_v1 }
 0xc42   :  { %v3086_v37 = vpop.f32.mrf.mxu0 }
 0xc43   :  { %v9288_v31 = vadd.f32 %v6425_v28, %v3086_v37 }
 0xc44   :  { %v7295_v40 = vpop.f32.mrf.mxu0 }
 0xc46   :  { %v3091_v12 = vpop.f32.mrf.mxu0 }
 0xc47   :  { %v9284_v10 = vadd.f32 %v6425_v28, %v3091_v12 }
 0xc48   :  { %v7298_v56 = vpop.f32.mrf.mxu0 }
 0xc49   :  { %3115 = vrot.lane.b32.xlu1 %v9284_v10, %s10880_s4 }
 0xc4d   :  { %3113 = vrot.lane.b32.xlu1 %v9288_v31, %s10880_s4 }
 0xca4   :  { %v3096_v61 = vpop.f32.mrf.mxu0 }
 0xca5   :  { %v9292_v25 = vadd.f32 %v6425_v28, %v3096_v61 }
 0xca6   :  { %v7301_v26 = vpop.f32.mrf.mxu0 }
 0xca7   :  { %3353 = vrot.lane.b32.xlu1 %v9292_v25, %s10881_s9  ;;  %3117 = vrot.lane.b32.xlu0 %v9292_v25, %s10880_s4  ;;  %v4098_v17 = vrot.slane %v9292_v25, 1 }
 0xcab   :  { %3349 = vrot.lane.b32.xlu1 %v9288_v31, %s10881_s9  ;;  %3351 = vrot.lane.b32.xlu0 %v9284_v10, %s10881_s9 }
 0xcaf   :  { %3589 = vrot.lane.b32.xlu1 %v9292_v25, %s10882_s8  ;;  %3343 = vrot.lane.b32.xlu0 %v9288_v31, %s10883_s30 }
 0xcb3   :  { %3587 = vrot.lane.b32.xlu1 %v9284_v10, %s10882_s8  ;;  %3345 = vrot.lane.b32.xlu0 %v9284_v10, %s10883_s30 }
 0xcb7   :  { %3585 = vrot.lane.b32.xlu1 %v9288_v31, %s10882_s8  ;;  %3347 = vrot.lane.b32.xlu0 %v9292_v25, %s10883_s30 }
 0xcbb   :  { %3825 = vrot.lane.b32.xlu1 %v9292_v25, %s10884_s28  ;;  %3579 = vrot.lane.b32.xlu0 %v9288_v31, %s10885_s29  ;;  %v3116_v53 = vpop.permute.xlu1 %3115 }
 0xcbf   :  { %3823 = vrot.lane.b32.xlu1 %v9284_v10, %s10884_s28  ;;  %3581 = vrot.lane.b32.xlu0 %v9284_v10, %s10885_s29  ;;  %v3114_v23 = vpop.permute.xlu1 %3113 }
 0xcc3   :  { %3821 = vrot.lane.b32.xlu1 %v9288_v31, %s10884_s28  ;;  %3583 = vrot.lane.b32.xlu0 %v9292_v25, %s10885_s29 }
 0xcc7   :  { %3815 = vrot.lane.b32.xlu0 %v9288_v31, %s10886_s1 }
 0xccb   :  { %3817 = vrot.lane.b32.xlu0 %v9284_v10, %s10886_s1 }
 0xccc   :  { %v3101_v0 = vpop.f32.mrf.mxu0 }
 0xccd   :  { %v3102_v27 = vadd.f32 %v6425_v28, %v3101_v0 }
 0xcce   :  { %v7304_v24 = vpop.f32.mrf.mxu0 }
 0xccf   :  { %3819 = vrot.lane.b32.xlu0 %v9292_v25, %s10886_s1  ;;  %v4099_v29 = vrot.slane %v3102_v27, 1 }
 0xcd1   :  { %v9340_v19 = vsel %vm1405_vm4, %v4098_v17, %v4099_v29 }
 0xcd3   :  { %v3106_v13 = vpop.f32.mrf.mxu0 }
 0xcd4   :  { %v3107_v30 = vadd.f32 %v6425_v28, %v3106_v13 }
 0xcd5   :  { %v7307_v38 = vpop.f32.mrf.mxu0 }
 0xcd6   :  { %v9332_v58 = vrot.slane %v3107_v30, 1 }
 0xcd8   :  { %4343 = vrot.lane.b32.xlu0 %v9332_v58, %s10881_s9  ;;  %4107 = vrot.lane.b32.xlu1 %v9332_v58, %s10880_s4  ;;  %v9344_v49 = vsel %vm1405_vm4, %v4099_v29, %v9332_v58 }
 0xcdc   :  { %4339 = vrot.lane.b32.xlu0 %v9340_v19, %s10881_s9  ;;  %4105 = vrot.lane.b32.xlu1 %v9344_v49, %s10880_s4 }
 0xce0   :  { %4579 = vrot.lane.b32.xlu0 %v9332_v58, %s10882_s8  ;;  %4103 = vrot.lane.b32.xlu1 %v9340_v19, %s10880_s4 }
 0xce4   :  { %4577 = vrot.lane.b32.xlu0 %v9344_v49, %s10882_s8  ;;  %4341 = vrot.lane.b32.xlu1 %v9344_v49, %s10881_s9 }
 0xce8   :  { %4575 = vrot.lane.b32.xlu0 %v9340_v19, %s10882_s8  ;;  %4333 = vrot.lane.b32.xlu1 %v9340_v19, %s10883_s30 }
 0xcec   :  { %4815 = vrot.lane.b32.xlu0 %v9332_v58, %s10884_s28  ;;  %4335 = vrot.lane.b32.xlu1 %v9344_v49, %s10883_s30 }
 0xcf0   :  { %4813 = vrot.lane.b32.xlu0 %v9344_v49, %s10884_s28  ;;  %4337 = vrot.lane.b32.xlu1 %v9332_v58, %s10883_s30 }
 0xcf4   :  { %4811 = vrot.lane.b32.xlu0 %v9340_v19, %s10884_s28  ;;  %4569 = vrot.lane.b32.xlu1 %v9340_v19, %s10885_s29 }
 0xcf8   :  { %3248 = vrot.lane.b32.xlu0 %v9292_v25, %s10887_s27  ;;  %4571 = vrot.lane.b32.xlu1 %v9344_v49, %s10885_s29 }
 0xcfc   :  { %3484 = vrot.lane.b32.xlu0 %v9292_v25, %s10888_s0  ;;  %4573 = vrot.lane.b32.xlu1 %v9332_v58, %s10885_s29 }
 0xd00   :  { %3480 = vrot.lane.b32.xlu0 %v9288_v31, %s10888_s0  ;;  %4805 = vrot.lane.b32.xlu1 %v9340_v19, %s10886_s1 }
 0xd04   :  { %3720 = vrot.lane.b32.xlu0 %v9292_v25, %s10889_s3  ;;  %3246 = vrot.lane.b32.xlu1 %v9284_v10, %s10887_s27 }
 0xd08   :  { %3716 = vrot.lane.b32.xlu0 %v9288_v31, %s10889_s3  ;;  %3244 = vrot.lane.b32.xlu1 %v9288_v31, %s10887_s27 }
 0xd0c   :  { %3956 = vrot.lane.b32.xlu0 %v9292_v25, %s10890_s2  ;;  %3482 = vrot.lane.b32.xlu1 %v9284_v10, %s10888_s0 }
 0xd10   :  { %3952 = vrot.lane.b32.xlu0 %v9288_v31, %s10890_s2  ;;  %3718 = vrot.lane.b32.xlu1 %v9284_v10, %s10889_s3 }
 0xd14   :  { %4238 = vrot.lane.b32.xlu0 %v9332_v58, %s10887_s27  ;;  %3954 = vrot.lane.b32.xlu1 %v9284_v10, %s10890_s2 }
 0xd18   :  { %4234 = vrot.lane.b32.xlu0 %v9340_v19, %s10887_s27  ;;  %4236 = vrot.lane.b32.xlu1 %v9344_v49, %s10887_s27 }
 0xd19   :  { %v3118_v42 = vpop.permute.xlu0 %3117  ;;  %v3354_v59 = vpop.permute.xlu1 %3353 }
 0xd1a   :  { %7309 = vmatpush3.xpose.msk.msra.mxu0 %vm420_vm5, %v3118_v42 }
 0xd1b   :  { %7310 = vmatprep.subr.mxu0 %v7963_v1 }
 0xd1c   :  { %4474 = vrot.lane.b32.xlu0 %v9332_v58, %s10888_s0  ;;  %4472 = vrot.lane.b32.xlu1 %v9344_v49, %s10888_s0 }
 0xd1d   :  { %v3352_v20 = vpop.permute.xlu0 %3351  ;;  %v3350_v51 = vpop.permute.xlu1 %3349 }
 0xd1e   :  { %7311 = vmatpush3.xpose.msk.msra.mxu0 %vm420_vm5, %v3116_v53 }
 0xd1f   :  { %7312 = vmatprep.subr.mxu0 %v7963_v1 }
 0xd21   :  { %v3344_v57 = vpop.permute.xlu0 %3343  ;;  %v3590_v5 = vpop.permute.xlu1 %3589 }
 0xd22   :  { %7313 = vmatpush3.xpose.msk.msra.mxu0 %vm420_vm5, %v3114_v23 }
 0xd23   :  { %7338 = vmatprep.subr.mxu0 %v7963_v1 }
 0xd25   :  { %7315 = vmatmul.mubr.msk.f32.vlgmr.msra.gmra.mxu0 %vm420_vm5, %v9288_v31  ;;  %v3346_v35 = vpop.permute.xlu0 %3345  ;;  %v3588_v63 = vpop.permute.xlu1 %3587 }
 0xd26   :  { %7339 = vmatpush3.xpose.msk.msra.mxu0 %vm420_vm5, %v3354_v59  ;;  %7317 = vmatprep.mubr.msk.f32.mxu0 %vm7964_vm0, %v7963_v1 }
 0xd27   :  { %7340 = vmatprep.subr.mxu0 %v7963_v1 }
 0xd29   :  { %7318 = vmatmul.mubr.msk.f32.gmra.mxu0 %vm420_vm5, %v9284_v10  ;;  %v3348_v39 = vpop.permute.xlu0 %3347  ;;  %v3586_v11 = vpop.permute.xlu1 %3585 }
 0xd2a   :  { %7341 = vmatpush3.xpose.msk.msra.mxu0 %vm420_vm5, %v3352_v20  ;;  %7320 = vmatprep.mubr.msk.f32.mxu0 %vm7964_vm0, %v7963_v1 }
 0xd2b   :  { %7342 = vmatprep.subr.mxu0 %v7963_v1 }
 0xd2d   :  { %7321 = vmatmul.mubr.msk.f32.gmra.mxu0 %vm420_vm5, %v9292_v25  ;;  %v3580_v43 = vpop.permute.xlu0 %3579  ;;  %v3826_v34 = vpop.permute.xlu1 %3825 }
 0xd2e   :  { %7343 = vmatpush3.xpose.msk.msra.mxu0 %vm420_vm5, %v3350_v51  ;;  %7344 = vmatprep.mubr.msk.f32.mxu0 %vm7964_vm0, %v7963_v1 }
 0xd2f   :  { %7368 = vmatprep.subr.mxu0 %v7963_v1 }
 0xd31   :  { %7345 = vmatmul.mubr.msk.f32.vlgmr.msra.gmra.mxu0 %vm420_vm5, %v3344_v57  ;;  %v3582_v45 = vpop.permute.xlu0 %3581  ;;  %v3824_v44 = vpop.permute.xlu1 %3823 }
 0xd32   :  { %7369 = vmatpush3.xpose.msk.msra.mxu0 %vm420_vm5, %v3590_v5  ;;  %7347 = vmatprep.mubr.msk.f32.mxu0 %vm7964_vm0, %v7963_v1 }
 0xd33   :  { %7370 = vmatprep.subr.mxu0 %v7963_v1 }
 0xd35   :  { %7348 = vmatmul.mubr.msk.f32.gmra.mxu0 %vm420_vm5, %v3346_v35  ;;  %v3584_v46 = vpop.permute.xlu0 %3583  ;;  %v3822_v36 = vpop.permute.xlu1 %3821 }
 0xd36   :  { %7371 = vmatpush3.xpose.msk.msra.mxu0 %vm420_vm5, %v3588_v63  ;;  %7350 = vmatprep.mubr.msk.f32.mxu0 %vm7964_vm0, %v7963_v1 }
 0xd37   :  { %7372 = vmatprep.subr.mxu0 %v7963_v1 }
 0xd39   :  { %7351 = vmatmul.mubr.msk.f32.gmra.mxu0 %vm420_vm5, %v3348_v39  ;;  %v3816_v4 = vpop.permute.xlu0 %3815 }
 0xd3a   :  { %7373 = vmatpush3.xpose.msk.msra.mxu0 %vm420_vm5, %v3586_v11  ;;  %7374 = vmatprep.mubr.msk.f32.mxu0 %vm7964_vm0, %v7963_v1 }
 0xd3b   :  { %7398 = vmatprep.subr.mxu0 %v7963_v1 }
 0xd3d   :  { %7375 = vmatmul.mubr.msk.f32.vlgmr.msra.gmra.mxu0 %vm420_vm5, %v3580_v43  ;;  %v3818_v33 = vpop.permute.xlu0 %3817 }
 0xd3e   :  { %7399 = vmatpush3.xpose.msk.msra.mxu0 %vm420_vm5, %v3826_v34  ;;  %7377 = vmatprep.mubr.msk.f32.mxu0 %vm7964_vm0, %v7963_v1 }
 0xd3f   :  { %7400 = vmatprep.subr.mxu0 %v7963_v1 }
 0xd41   :  { %7378 = vmatmul.mubr.msk.f32.gmra.mxu0 %vm420_vm5, %v3582_v45  ;;  %v3820_v60 = vpop.permute.xlu0 %3819 }
 0xd42   :  { %7401 = vmatpush3.xpose.msk.msra.mxu0 %vm420_vm5, %v3824_v44  ;;  %7380 = vmatprep.mubr.msk.f32.mxu0 %vm7964_vm0, %v7963_v1 }
 0xd43   :  { %7402 = vmatprep.subr.mxu0 %v7963_v1 }
 0xd45   :  { %7381 = vmatmul.mubr.msk.f32.gmra.mxu0 %vm420_vm5, %v3584_v46 }
 0xd46   :  { %7403 = vmatpush3.xpose.msk.msra.mxu0 %vm420_vm5, %v3822_v36  ;;  %7404 = vmatprep.mubr.msk.f32.mxu0 %vm7964_vm0, %v7963_v1 }
 0xd47   :  { %7428 = vmatprep.subr.mxu0 %v7963_v1 }
 0xd49   :  { %7405 = vmatmul.mubr.msk.f32.vlgmr.msra.gmra.mxu0 %vm420_vm5, %v3816_v4 }
 0xd4a   :  { %v4344_v7 = vpop.permute.xlu0 %4343  ;;  %v4108_v3 = vpop.permute.xlu1 %4107  ;;  %7407 = vmatprep.mubr.msk.f32.mxu0 %vm7964_vm0, %v7963_v1 }
 0xd4b   :  { %7429 = vmatpush3.xpose.msk.msra.mxu0 %vm420_vm5, %v4108_v3 }
 0xd4c   :  { %7430 = vmatprep.subr.mxu0 %v7963_v1 }
 0xd4d   :  { %7408 = vmatmul.mubr.msk.f32.gmra.mxu0 %vm420_vm5, %v3818_v33 }
 0xd4e   :  { %v4340_v47 = vpop.permute.xlu0 %4339  ;;  %v4106_v15 = vpop.permute.xlu1 %4105  ;;  %7410 = vmatprep.mubr.msk.f32.mxu0 %vm7964_vm0, %v7963_v1 }
 0xd4f   :  { %7431 = vmatpush3.xpose.msk.msra.mxu0 %vm420_vm5, %v4106_v15 }
 0xd50   :  { %7432 = vmatprep.subr.mxu0 %v7963_v1 }
 0xd51   :  { %7411 = vmatmul.mubr.msk.f32.gmra.mxu0 %vm420_vm5, %v3820_v60 }
 0xd52   :  { %v4580_v50 = vpop.permute.xlu0 %4579  ;;  %v4104_v14 = vpop.permute.xlu1 %4103  ;;  %7434 = vmatprep.mubr.msk.f32.mxu0 %vm7964_vm0, %v7963_v1 }
 0xd53   :  { %7433 = vmatpush3.xpose.msk.msra.mxu0 %vm420_vm5, %v4104_v14 }
 0xd54   :  { %7458 = vmatprep.subr.mxu0 %v7963_v1 }
 0xd56   :  { %v4578_v54 = vpop.permute.xlu0 %4577  ;;  %7435 = vmatmul.mubr.msk.f32.vlgmr.msra.gmra.mxu0 %vm420_vm5, %v9340_v19  ;;  %v4342_v52 = vpop.permute.xlu1 %4341 }
 0xd57   :  { %7459 = vmatpush3.xpose.msk.msra.mxu0 %vm420_vm5, %v4344_v7  ;;  %7437 = vmatprep.mubr.msk.f32.mxu0 %vm7964_vm0, %v7963_v1 }
 0xd58   :  { %7460 = vmatprep.subr.mxu0 %v7963_v1 }
 0xd5a   :  { %v4576_v22 = vpop.permute.xlu0 %4575  ;;  %7438 = vmatmul.mubr.msk.f32.gmra.mxu0 %vm420_vm5, %v9344_v49  ;;  %v4334_v55 = vpop.permute.xlu1 %4333 }
 0xd5b   :  { %7461 = vmatpush3.xpose.msk.msra.mxu0 %vm420_vm5, %v4342_v52  ;;  %7440 = vmatprep.mubr.msk.f32.mxu0 %vm7964_vm0, %v7963_v1 }
 0xd5c   :  { %7462 = vmatprep.subr.mxu0 %v7963_v1 }
 0xd5e   :  { %v4816_v48 = vpop.permute.xlu0 %4815  ;;  %7441 = vmatmul.mubr.msk.f32.gmra.mxu0 %vm420_vm5, %v9332_v58  ;;  %v4336_v18 = vpop.permute.xlu1 %4335 }
 0xd5f   :  { %7463 = vmatpush3.xpose.msk.msra.mxu0 %vm420_vm5, %v4340_v47  ;;  %7464 = vmatprep.mubr.msk.f32.mxu0 %vm7964_vm0, %v7963_v1 }
 0xd60   :  { %7488 = vmatprep.subr.mxu0 %v7963_v1 }
 0xd62   :  { %v4814_v21 = vpop.permute.xlu0 %4813  ;;  %7465 = vmatmul.mubr.msk.f32.vlgmr.msra.gmra.mxu0 %vm420_vm5, %v4334_v55  ;;  %v4338_v62 = vpop.permute.xlu1 %4337 }
 0xd63   :  { %7489 = vmatpush3.xpose.msk.msra.mxu0 %vm420_vm5, %v4580_v50  ;;  %7467 = vmatprep.mubr.msk.f32.mxu0 %vm7964_vm0, %v7963_v1 }
 0xd64   :  { %7490 = vmatprep.subr.mxu0 %v7963_v1 }
 0xd66   :  { %v4812_v9 = vpop.permute.xlu0 %4811  ;;  %7468 = vmatmul.mubr.msk.f32.gmra.mxu0 %vm420_vm5, %v4336_v18  ;;  %v4570_v32 = vpop.permute.xlu1 %4569 }
 0xd67   :  { %7491 = vmatpush3.xpose.msk.msra.mxu0 %vm420_vm5, %v4578_v54  ;;  %7470 = vmatprep.mubr.msk.f32.mxu0 %vm7964_vm0, %v7963_v1 }
 0xd68   :  { %7492 = vmatprep.subr.mxu0 %v7963_v1 }
 0xd6a   :  { %v3249_v37 = vpop.permute.xlu0 %3248  ;;  %7471 = vmatmul.mubr.msk.f32.gmra.mxu0 %vm420_vm5, %v4338_v62  ;;  %v4572_v40 = vpop.permute.xlu1 %4571 }
 0xd6b   :  { %7324 = vmatpush3.msk.msra.mxu1 %vm565_vm6, %v3249_v37  ;;  %7493 = vmatpush3.xpose.msk.msra.mxu0 %vm420_vm5, %v4576_v22 }
 0xd6c   :  { %7494 = vmatprep.mubr.msk.f32.mxu0 %vm7964_vm0, %v7963_v1  ;;  %7518 = vmatprep.subr.mxu0 %v7963_v1 }
 0xd6d   :  { %7325 = vmatprep.subr.mxu1 %v7963_v1 }
 0xd6e   :  { %7495 = vmatmul.mubr.msk.f32.vlgmr.msra.gmra.mxu0 %vm420_vm5, %v4570_v32  ;;  %v4574_v28 = vpop.permute.xlu1 %4573 }
 0xd6f   :  { %7519 = vmatpush3.xpose.msk.msra.mxu0 %vm420_vm5, %v4816_v48  ;;  %7497 = vmatprep.mubr.msk.f32.mxu0 %vm7964_vm0, %v7963_v1 }
 0xd70   :  { %7520 = vmatprep.subr.mxu0 %v7963_v1 }
 0xd72   :  { %7498 = vmatmul.mubr.msk.f32.gmra.mxu0 %vm420_vm5, %v4572_v40  ;;  %v4806_v12 = vpop.permute.xlu1 %4805 }
 0xd73   :  { %7521 = vmatpush3.xpose.msk.msra.mxu0 %vm420_vm5, %v4814_v21  ;;  %7500 = vmatprep.mubr.msk.f32.mxu0 %vm7964_vm0, %v7963_v1 }
 0xd74   :  { %7522 = vmatprep.subr.mxu0 %v7963_v1 }
 0xd76   :  { %7501 = vmatmul.mubr.msk.f32.gmra.mxu0 %vm420_vm5, %v4574_v28  ;;  %v3247_v10 = vpop.permute.xlu1 %3246 }
 0xd77   :  { %7326 = vmatpush3.msra.mxu1 %v3247_v10  ;;  %7523 = vmatpush3.xpose.msk.msra.mxu0 %vm420_vm5, %v4812_v9 }
 0xd78   :  { %7524 = vmatprep.mubr.msk.f32.mxu0 %vm7964_vm0, %v7963_v1  ;;  %7327 = vmatprep.subr.mxu1 %v7963_v1 }
 0xd79   :  { %7548 = vmatprep.subr.mxu0 %v7963_v1 }
 0xd7a   :  { %7525 = vmatmul.mubr.msk.f32.vlgmr.msra.gmra.mxu0 %vm420_vm5, %v4806_v12  ;;  %v3245_v56 = vpop.permute.xlu1 %3244 }
 0xd7b   :  { %7328 = vmatpush3.msra.mxu1 %v3245_v56  ;;  %7527 = vmatprep.mubr.msk.f32.mxu0 %vm7964_vm0, %v7963_v1 }
 0xd7c   :  { %7353 = vmatprep.subr.mxu1 %v7963_v1 }
 0xde5   :  { %v9538_v31 = vpop.f32.mrf.mxu0 }
 0xde6   :  { %v3211_v61 = vsel %vm513_vm7, %v9538_v31, -inf }
 0xde7   :  { %3212 = vmax.xlane.f32.xlu0 %v3211_v61  ;;  %v7316_v25 = vpop.f32.mrf.mxu0 }
 0xde9   :  { %v9542_v26 = vpop.f32.mrf.mxu0 }
 0xdea   :  { %v3214_v0 = vsel %vm513_vm7, %v9542_v26, -inf }
 0xdeb   :  { %3215 = vmax.xlane.f32.xlu1 %v3214_v0  ;;  %v7319_v24 = vpop.f32.mrf.mxu0 }
 0xded   :  { %v9546_v27 = vpop.f32.mrf.mxu0 }
 0xdee   :  { %v3217_v13 = vsel %vm520_vm8, %v9546_v27, -inf }
 0xdef   :  { %3218 = vmax.xlane.f32.xlu0 %v3217_v13  ;;  %v7322_v30 = vpop.f32.mrf.mxu0 }
 0xdf1   :  { %v9550_v38 = vpop.f32.mrf.mxu0 }
 0xdf2   :  { %v3447_v29 = vsel %vm513_vm7, %v9550_v38, -inf }
 0xdf3   :  { %3448 = vmax.xlane.f32.xlu0 %v3447_v29  ;;  %v7346_v17 = vpop.f32.mrf.mxu0 }
 0xdf5   :  { %v9554_v53 = vpop.f32.mrf.mxu0 }
 0xdf6   :  { %v3450_v23 = vsel %vm513_vm7, %v9554_v53, -inf }
 0xdf7   :  { %3451 = vmax.xlane.f32.xlu0 %v3450_v23  ;;  %v7349_v42 = vpop.f32.mrf.mxu0  ;;  %v9622_v23 = vpop.permute.xlu0 %3484 }
 0xdf9   :  { %v9558_v59 = vpop.f32.mrf.mxu0 }
 0xdfa   :  { %v3453_v20 = vsel %vm520_vm8, %v9558_v59, -inf }
 0xdfb   :  { %3454 = vmax.xlane.f32.xlu1 %v3453_v20  ;;  %v7352_v51 = vpop.f32.mrf.mxu0  ;;  %v9626_v20 = vpop.permute.xlu0 %3480 }
 0xdfd   :  { %v9562_v57 = vpop.f32.mrf.mxu0 }
 0xdfe   :  { %v3683_v35 = vsel %vm513_vm7, %v9562_v57, -inf }
 0xdff   :  { %3684 = vmax.xlane.f32.xlu0 %v3683_v35  ;;  %v7376_v5 = vpop.f32.mrf.mxu0  ;;  %v9628_v51 = vpop.permute.xlu0 %3720 }
 0xe01   :  { %v9566_v39 = vpop.f32.mrf.mxu0 }
 0xe02   :  { %v3686_v63 = vsel %vm513_vm7, %v9566_v39, -inf }
 0xe03   :  { %3687 = vmax.xlane.f32.xlu1 %v3686_v63  ;;  %v7379_v43 = vpop.f32.mrf.mxu0  ;;  %v9630_v35 = vpop.permute.xlu0 %3716 }
 0xe04   :  { %v9634_v63 = vpop.permute.xlu1 %3482 }
 0xe05   :  { %v9570_v45 = vpop.f32.mrf.mxu0 }
 0xe06   :  { %v3689_v11 = vsel %vm520_vm8, %v9570_v45, -inf }
 0xe07   :  { %3690 = vmax.xlane.f32.xlu0 %v3689_v11  ;;  %v7382_v46 = vpop.f32.mrf.mxu0  ;;  %v9632_v5 = vpop.permute.xlu0 %3956 }
 0xe08   :  { %v9640_v46 = vpop.permute.xlu1 %3718 }
 0xe09   :  { %v9574_v34 = vpop.f32.mrf.mxu0 }
 0xe0a   :  { %v3919_v4 = vsel %vm513_vm7, %v9574_v34, -inf }
 0xe0b   :  { %3920 = vmax.xlane.f32.xlu1 %v3919_v4  ;;  %v7406_v44 = vpop.f32.mrf.mxu0  ;;  %v9636_v43 = vpop.permute.xlu0 %3952 }
 0xe0d   :  { %v9578_v33 = vpop.f32.mrf.mxu0 }
 0xe0e   :  { %v3922_v36 = vsel %vm513_vm7, %v9578_v33, -inf }
 0xe0f   :  { %3923 = vmax.xlane.f32.xlu0 %v3922_v36  ;;  %v7409_v60 = vpop.f32.mrf.mxu0  ;;  %v9642_v4 = vpop.permute.xlu0 %4238 }
 0xe10   :  { %v9646_v36 = vpop.permute.xlu1 %3954 }
 0xe11   :  { %v9582_v7 = vpop.f32.mrf.mxu0 }
 0xe12   :  { %v3925_v3 = vsel %vm520_vm8, %v9582_v7, -inf }
 0xe13   :  { %3926 = vmax.xlane.f32.xlu1 %v3925_v3  ;;  %v7412_v47 = vpop.f32.mrf.mxu0  ;;  %v9648_v60 = vpop.permute.xlu0 %4234 }
 0xe14   :  { %v9650_v3 = vpop.permute.xlu1 %4236 }
 0xe16   :  { %v9586_v15 = vpop.f32.mrf.mxu0 }
 0xe17   :  { %v4201_v50 = vsel %vm513_vm7, %v9586_v15, -inf  ;;  %v9652_v47 = vpop.permute.xlu0 %4474 }
 0xe18   :  { %4202 = vmax.xlane.f32.xlu0 %v4201_v50  ;;  %v7436_v14 = vpop.f32.mrf.mxu0  ;;  %v9654_v50 = vpop.permute.xlu1 %4472 }
 0xe1a   :  { %v9590_v54 = vpop.f32.mrf.mxu0 }
 0xe1b   :  { %v4204_v52 = vsel %vm513_vm7, %v9590_v54, -inf }
 0xe1c   :  { %4205 = vmax.xlane.f32.xlu1 %v4204_v52  ;;  %v7439_v22 = vpop.f32.mrf.mxu0 }
 0xe1e   :  { %v9594_v55 = vpop.f32.mrf.mxu0 }
 0xe1f   :  { %v4207_v48 = vsel %vm520_vm8, %v9594_v55, -inf }
 0xe20   :  { %4208 = vmax.xlane.f32.xlu0 %v4207_v48  ;;  %v7442_v18 = vpop.f32.mrf.mxu0 }
 0xe22   :  { %v9598_v21 = vpop.f32.mrf.mxu0 }
 0xe23   :  { %v4437_v62 = vsel %vm513_vm7, %v9598_v21, -inf }
 0xe24   :  { %4438 = vmax.xlane.f32.xlu1 %v4437_v62  ;;  %v7466_v9 = vpop.f32.mrf.mxu0 }
 0xe26   :  { %v9602_v32 = vpop.f32.mrf.mxu0 }
 0xe27   :  { %v4440_v37 = vsel %vm513_vm7, %v9602_v32, -inf }
 0xe28   :  { %4441 = vmax.xlane.f32.xlu0 %v4440_v37  ;;  %v7469_v40 = vpop.f32.mrf.mxu0 }
 0xe2a   :  { %v9606_v28 = vpop.f32.mrf.mxu0 }
 0xe2b   :  { %v4443_v12 = vsel %vm520_vm8, %v9606_v28, -inf }
 0xe2c   :  { %4444 = vmax.xlane.f32.xlu1 %v4443_v12  ;;  %v7472_v10 = vpop.f32.mrf.mxu0 }
 0xe2e   :  { %v9610_v56 = vpop.f32.mrf.mxu0 }
 0xe2f   :  { %v4673_v11 = vsel %vm513_vm7, %v9610_v56, -inf }
 0xe30   :  { %v7496_v61 = vpop.f32.mrf.mxu0 }
 0xe32   :  { %v9612_v25 = vpop.f32.mrf.mxu0 }
 0xe33   :  { %v4676_v0 = vsel %vm513_vm7, %v9612_v25, -inf }
 0xe34   :  { %4677 = vmax.xlane.f32.xlu1 %v4676_v0  ;;  %v7499_v24 = vpop.f32.mrf.mxu0 }
 0xe36   :  { %v9616_v13 = vpop.f32.mrf.mxu0 }
 0xe37   :  { %v4679_v44 = vsel %vm520_vm8, %v9616_v13, -inf }
 0xe38   :  { %v7502_v30 = vpop.f32.mrf.mxu0 }
 0xe3a   :  { %v9618_v29 = vpop.f32.mrf.mxu0 }
 0xe3b   :  { %v4909_v17 = vsel %vm513_vm7, %v9618_v29, -inf }
 0xe3c   :  { %4910 = vmax.xlane.f32.xlu1 %v4909_v17  ;;  %v7526_v42 = vpop.f32.mrf.mxu0 }
 0xe3e   :  { %4470 = vrot.lane.b32.xlu0 %v9340_v19, %s10888_s0  ;;  %s10892_s0 = smov 16  }
 0xe5d   :  { %4674 = vmax.xlane.f32.xlu0 %v4673_v11 }
 0xe61   :  { %4680 = vmax.xlane.f32.xlu0 %v4679_v44 }
 0xe70   :  { %v3213_v14 = vpop.xlane.xlu0 %3212 }
 0xe71   :  { %v3220_v52 = vsub.f32 %v9538_v31, %v3213_v14 }
 0xe73   :  { %v3223_v22 = vmul.f32 1.442695, %v3220_v52 }
 0xe74   :  { %v3216_v48 = vpop.xlane.xlu1 %3215 }
 0xe75   :  { %7817 = vpow2.f32 %v3223_v22  ;;  %v3221_v18 = vsub.f32 %v9542_v26, %v3216_v48 }
 0xe77   :  { %v3225_v62 = vmul.f32 1.442695, %v3221_v18 }
 0xe78   :  { %v3219_v9 = vpop.xlane.xlu0 %3218 }
 0xe79   :  { %7819 = vpow2.f32 %v3225_v62  ;;  %v3222_v37 = vsub.f32 %v9546_v27, %v3219_v9 }
 0xe7b   :  { %v3227_v40 = vmul.f32 1.442695, %v3222_v37 }
 0xe7c   :  { %v3449_v12 = vpop.xlane.xlu0 %3448 }
 0xe7d   :  { %7821 = vpow2.f32 %v3227_v40  ;;  %v3456_v10 = vsub.f32 %v9550_v38, %v3449_v12 }
 0xe7f   :  { %v3459_v61 = vmul.f32 1.442695, %v3456_v10 }
 0xe80   :  { %v3452_v0 = vpop.xlane.xlu0 %3451 }
 0xe81   :  { %7823 = vpow2.f32 %v3459_v61  ;;  %v3457_v31 = vsub.f32 %v9554_v53, %v3452_v0 }
 0xe82   :  { %v9661_v24 = vpop.eup %7817 }
 0xe83   :  { %v3461_v30 = vmul.f32 1.442695, %v3457_v31  ;;  %v3229_v26 = vsel %vm513_vm7, %v9661_v24, 0.0 }
 0xe84   :  { %v3455_v17 = vpop.xlane.xlu1 %3454  ;;  %3230 = vadd.xlane.f32.xlu0 %v3229_v26 }
 0xe85   :  { %7825 = vpow2.f32 %v3461_v30  ;;  %v3458_v27 = vsub.f32 %v9558_v59, %v3455_v17 }
 0xe86   :  { %v9666_v42 = vpop.eup %7819 }
 0xe87   :  { %v3463_v11 = vmul.f32 1.442695, %v3458_v27  ;;  %v3232_v38 = vsel %vm513_vm7, %v9666_v42, 0.0 }
 0xe88   :  { %v3685_v44 = vpop.xlane.xlu0 %3684  ;;  %3233 = vadd.xlane.f32.xlu1 %v3232_v38 }
 0xe89   :  { %7827 = vpow2.f32 %v3463_v11  ;;  %v3692_v53 = vsub.f32 %v9562_v57, %v3685_v44 }
 0xe8a   :  { %v9671_v14 = vpop.eup %7821 }
 0xe8b   :  { %v3695_v52 = vmul.f32 1.442695, %v3692_v53  ;;  %v3235_v22 = vsel %vm520_vm8, %v9671_v14, 0.0 }
 0xe8c   :  { %v3688_v48 = vpop.xlane.xlu1 %3687  ;;  %3236 = vadd.xlane.f32.xlu0 %v3235_v22 }
 0xe8d   :  { %7829 = vpow2.f32 %v3695_v52  ;;  %v3693_v59 = vsub.f32 %v9566_v39, %v3688_v48 }
 0xe8e   :  { %v9676_v18 = vpop.eup %7823 }
 0xe8f   :  { %v3697_v62 = vmul.f32 1.442695, %v3693_v59  ;;  %v3465_v9 = vsel %vm513_vm7, %v9676_v18, 0.0 }
 0xe90   :  { %v3691_v37 = vpop.xlane.xlu0 %3690  ;;  %3466 = vadd.xlane.f32.xlu1 %v3465_v9 }
 0xe91   :  { %7831 = vpow2.f32 %v3697_v62  ;;  %v3694_v57 = vsub.f32 %v9570_v45, %v3691_v37 }
 0xe92   :  { %v9681_v40 = vpop.eup %7825 }
 0xe93   :  { %v3699_v12 = vmul.f32 1.442695, %v3694_v57  ;;  %v3468_v10 = vsel %vm513_vm7, %v9681_v40, 0.0 }
 0xe94   :  { %v3921_v61 = vpop.xlane.xlu1 %3920  ;;  %3469 = vadd.xlane.f32.xlu0 %v3468_v10 }
 0xe95   :  { %7833 = vpow2.f32 %v3699_v12  ;;  %v3928_v39 = vsub.f32 %v9574_v34, %v3921_v61 }
 0xe96   :  { %v9686_v0 = vpop.eup %7827 }
 0xe97   :  { %v3931_v31 = vmul.f32 1.442695, %v3928_v39  ;;  %v3471_v30 = vsel %vm520_vm8, %v9686_v0, 0.0 }
 0xe98   :  { %v3924_v26 = vpop.xlane.xlu0 %3923  ;;  %3472 = vadd.xlane.f32.xlu1 %v3471_v30 }
 0xe99   :  { %7835 = vpow2.f32 %v3931_v31  ;;  %v3929_v45 = vsub.f32 %v9578_v33, %v3924_v26 }
 0xe9a   :  { %v9691_v17 = vpop.eup %7829 }
 0xe9b   :  { %v3933_v27 = vmul.f32 1.442695, %v3929_v45  ;;  %v3701_v11 = vsel %vm513_vm7, %v9691_v17, 0.0 }
 0xe9c   :  { %v3927_v38 = vpop.xlane.xlu1 %3926  ;;  %3702 = vadd.xlane.f32.xlu1 %v3701_v11 }
 0xe9d   :  { %7837 = vpow2.f32 %v3933_v27  ;;  %v3930_v34 = vsub.f32 %v9582_v7, %v3927_v38 }
 0xe9e   :  { %v9696_v44 = vpop.eup %7831 }
 0xe9f   :  { %v3935_v53 = vmul.f32 1.442695, %v3930_v34  ;;  %v3704_v52 = vsel %vm513_vm7, %v9696_v44, 0.0 }
 0xea0   :  { %3705 = vadd.xlane.f32.xlu0 %v3704_v52 }
 0xea1   :  { %7839 = vpow2.f32 %v3935_v53  ;;  %v4203_v33 = vpop.xlane.xlu0 %4202 }
 0xea2   :  { %v9700_v22 = vpop.eup %7833  ;;  %v4210_v48 = vsub.f32 %v9586_v15, %v4203_v33 }
 0xea3   :  { %v3707_v59 = vsel %vm520_vm8, %v9700_v22, 0.0 }
 0xea4   :  { %v4213_v62 = vmul.f32 1.442695, %v4210_v48  ;;  %3708 = vadd.xlane.f32.xlu1 %v3707_v59 }
 0xea5   :  { %v4206_v9 = vpop.xlane.xlu1 %4205 }
 0xea6   :  { %v9705_v7 = vpop.eup %7835  ;;  %7841 = vpow2.f32 %v4213_v62  ;;  %v4211_v37 = vsub.f32 %v9590_v54, %v4206_v9 }
 0xea7   :  { %v3937_v57 = vsel %vm513_vm7, %v9705_v7, 0.0 }
 0xea8   :  { %v4215_v12 = vmul.f32 1.442695, %v4211_v37  ;;  %3938 = vadd.xlane.f32.xlu1 %v3937_v57 }
 0xea9   :  { %v4209_v45 = vpop.xlane.xlu0 %4208 }
 0xeaa   :  { %v9710_v10 = vpop.eup %7837  ;;  %7843 = vpow2.f32 %v4215_v12  ;;  %v4212_v11 = vsub.f32 %v9594_v55, %v4209_v45 }
 0xeab   :  { %v3940_v15 = vsel %vm513_vm7, %v9710_v10, 0.0 }
 0xeac   :  { %3941 = vadd.xlane.f32.xlu0 %v3940_v15  ;;  %v4217_v52 = vmul.f32 1.442695, %v4212_v11 }
 0xead   :  { %v4439_v27 = vpop.xlane.xlu1 %4438 }
 0xeae   :  { %v9714_v61 = vpop.eup %7839  ;;  %v4446_v53 = vsub.f32 %v9598_v21, %v4439_v27  ;;  %7845 = vpow2.f32 %v4217_v52 }
 0xeaf   :  { %v3943_v39 = vsel %vm520_vm8, %v9714_v61, 0.0 }
 0xeb0   :  { %3944 = vadd.xlane.f32.xlu1 %v3943_v39  ;;  %v4449_v59 = vmul.f32 1.442695, %v4446_v53 }
 0xeb1   :  { %v4442_v38 = vpop.xlane.xlu0 %4441 }
 0xeb2   :  { %v4447_v33 = vsub.f32 %v9602_v32, %v4442_v38  ;;  %7847 = vpow2.f32 %v4449_v59 }
 0xeb3   :  { %v9718_v31 = vpop.eup %7841 }
 0xeb4   :  { %v4219_v54 = vsel %vm513_vm7, %v9718_v31, 0.0  ;;  %v4451_v9 = vmul.f32 1.442695, %v4447_v33 }
 0xeb5   :  { %4220 = vadd.xlane.f32.xlu1 %v4219_v54  ;;  %v4445_v34 = vpop.xlane.xlu1 %4444  ;;  %v9735_v55 = vpop.permute.xlu0 %4470 }
 0xeb6   :  { %v4448_v62 = vsub.f32 %v9606_v28, %v4445_v34  ;;  %7849 = vpow2.f32 %v4451_v9 }
 0xeb7   :  { %v9722_v30 = vpop.eup %7843 }
 0xeb8   :  { %v4222_v26 = vsel %vm513_vm7, %v9722_v30, 0.0  ;;  %v4453_v57 = vmul.f32 1.442695, %v4448_v62 }
 0xeb9   :  { %4223 = vadd.xlane.f32.xlu0 %v4222_v26 }
 0xeba   :  { %7851 = vpow2.f32 %v4453_v57 }
 0xebb   :  { %v9737_v21 = vpop.eup %7845 }
 0xebc   :  { %v4225_v54 = vsel %vm520_vm8, %v9737_v21, 0.0 }
 0xebd   :  { %v4678_v48 = vpop.xlane.xlu1 %4677 }
 0xebe   :  { %v4683_v37 = vsub.f32 %v9612_v25, %v4678_v48 }
 0xebf   :  { %v9740_v39 = vpop.eup %7847 }
 0xec0   :  { %v4687_v12 = vmul.f32 1.442695, %v4683_v37  ;;  %v4455_v27 = vsel %vm513_vm7, %v9740_v39, 0.0 }
 0xec2   :  { %7853 = vpow2.f32 %v4687_v12 }
 0xec3   :  { %v9744_v25 = vpop.eup %7849 }
 0xec4   :  { %v4458_v45 = vsel %vm513_vm7, %v9744_v25, 0.0 }
 0xec5   :  { %v4911_v33 = vpop.xlane.xlu1 %4910 }
 0xec6   :  { %4708 = vrot.lane.b32.xlu1 %v9344_v49, %s10889_s3  ;;  %v4918_v37 = vsub.f32 %v9618_v29, %v4911_v33 }
 0xec7   :  { %v9746_v26 = vpop.eup %7851 }
 0xec8   :  { %v4461_v38 = vsel %vm520_vm8, %v9746_v26, 0.0 }
 0xecf   :  { %4710 = vrot.lane.b32.xlu0 %v9332_v58, %s10889_s3  ;;  %v9752_v11 = vpop.eup %7853 }
 0xee6   :  { %v4675_v15 = vpop.xlane.xlu0 %4674 }
 0xee7   :  { %v4682_v32 = vsub.f32 %v9610_v56, %v4675_v15  ;;  %v4694_v56 = vsel %vm513_vm7, %v9752_v11, 0.0 }
 0xee9   :  { %v4685_v28 = vmul.f32 1.442695, %v4682_v32 }
 0xeea   :  { %4226 = vadd.xlane.f32.xlu1 %v4225_v54  ;;  %v4681_v52 = vpop.xlane.xlu0 %4680 }
 0xeeb   :  { %7855 = vpow2.f32 %v4685_v28  ;;  %v4684_v62 = vsub.f32 %v9616_v13, %v4681_v52  ;;  %v4921_v28 = vmul.f32 1.442695, %v4918_v37 }
 0xeed   :  { %v4689_v57 = vmul.f32 1.442695, %v4684_v62 }
 0xeee   :  { %4459 = vadd.xlane.f32.xlu0 %v4458_v45  ;;  %4456 = vadd.xlane.f32.xlu1 %v4455_v27 }
 0xef2   :  { %4695 = vadd.xlane.f32.xlu0 %v4694_v56  ;;  %4462 = vadd.xlane.f32.xlu1 %v4461_v38 }
 0xef8   :  { %v9758_v34 = vpop.eup %7855 }
 0xef9   :  { %v4691_v53 = vsel %vm513_vm7, %v9758_v34, 0.0 }
 0xefa   :  { %4692 = vadd.xlane.f32.xlu1 %v4691_v53 }
 0xf08   :  { %4706 = vrot.lane.b32.xlu0 %v9340_v19, %s10889_s3  ;;  %s10893_s3 = smov 24  }
 0xf0b   :  { %4946 = vrot.lane.b32.xlu1 %v9332_v58, %s10890_s2 }
 0xf0c   :  { %4944 = vrot.lane.b32.xlu0 %v9344_v49, %s10890_s2 }
 0xf0d   :  { %v3231_v48 = vpop.xlane.xlu0 %3230 }
 0xf0e   :  { %7857 = vrcp.f32 %v3231_v48 }
 0xf10   :  { %4807 = vrot.lane.b32.xlu0 %v9344_v49, %s10886_s1 }
 0xf11   :  { %v3234_v59 = vpop.xlane.xlu1 %3233 }
 0xf12   :  { %7859 = vrcp.f32 %v3234_v59 }
 0xf15   :  { %v3237_v9 = vpop.xlane.xlu0 %3236 }
 0xf16   :  { %7861 = vrcp.f32 %v3237_v9 }
 0xf19   :  { %v3467_v12 = vpop.xlane.xlu1 %3466 }
 0xf1a   :  { %7863 = vrcp.f32 %v3467_v12 }
 0xf1b   :  { %v7858_v15 = vpop.eup %7857  ;;  %7865 = vpow2.f32 %v4689_v57 }
 0xf1c   :  { %v3241_v32 = vmul.f32 %v7858_v15, %v9661_v24 }
 0xf1d   :  { %v3470_v54 = vpop.xlane.xlu0 %3469 }
 0xf1e   :  { %7867 = vrcp.f32 %v3470_v54  ;;  %7330 = vmatmul.mubr.msk.f32.vlgmr.msra.gmra.mxu1 %vm513_vm7, %v3241_v32 }
 0xf1f   :  { %v7860_v49 = vpop.eup %7859  ;;  %7354 = vmatpush3.msk.msra.mxu1 %vm565_vm6, %v9622_v23  ;;  %7332 = vmatprep.mubr.msk.f32.mxu1 %vm7964_vm0, %v7963_v1  ;;  %7869 = vpow2.f32 %v4921_v28 }
 0xf20   :  { %7355 = vmatprep.subr.mxu1 %v7963_v1  ;;  %v3242_v13 = vmul.f32 %v7860_v49, %v9666_v42 }
 0xf21   :  { %7356 = vmatpush3.msra.mxu1 %v9634_v63  ;;  %v3473_v29 = vpop.xlane.xlu1 %3472 }
 0xf22   :  { %7357 = vmatprep.subr.mxu1 %v7963_v1  ;;  %7871 = vrcp.f32 %v3473_v29  ;;  %7333 = vmatmul.mubr.msk.f32.gmra.mxu1 %vm513_vm7, %v3242_v13 }
 0xf23   :  { %v7862_v24 = vpop.eup %7861  ;;  %7358 = vmatpush3.msra.mxu1 %v9626_v20  ;;  %7335 = vmatprep.mubr.msk.f32.mxu1 %vm7964_vm0, %v7963_v1 }
 0xf24   :  { %v3243_v23 = vmul.f32 %v7862_v24, %v9671_v14  ;;  %7383 = vmatprep.subr.mxu1 %v7963_v1 }
 0xf25   :  { %v3703_v42 = vpop.xlane.xlu1 %3702 }
 0xf26   :  { %7873 = vrcp.f32 %v3703_v42  ;;  %7336 = vmatmul.mubr.msk.f32.gmra.mxu1 %vm513_vm7, %v3243_v23 }
 0xf27   :  { %v7864_v63 = vpop.eup %7863  ;;  %7359 = vmatprep.mubr.msk.f32.mxu1 %vm7964_vm0, %v7963_v1 }
 0xf28   :  { %v3477_v45 = vmul.f32 %v7864_v63, %v9676_v18  ;;  %v9792_v56 = vpop.eup %7865 }
 0xf29   :  { %v3706_v27 = vpop.xlane.xlu0 %3705 }
 0xf2a   :  { %7875 = vrcp.f32 %v3706_v27  ;;  %7360 = vmatmul.mubr.msk.f32.vlgmr.msra.gmra.mxu1 %vm513_vm7, %v3477_v45 }
 0xf2b   :  { %v7868_v20 = vpop.eup %7867  ;;  %7384 = vmatpush3.msk.msra.mxu1 %vm565_vm6, %v9628_v51  ;;  %7362 = vmatprep.mubr.msk.f32.mxu1 %vm7964_vm0, %v7963_v1  ;;  %v4697_v51 = vsel %vm520_vm8, %v9792_v56, 0.0 }
 0xf2c   :  { %7385 = vmatprep.subr.mxu1 %v7963_v1  ;;  %v3478_v14 = vmul.f32 %v7868_v20, %v9681_v40  ;;  %v9802_v38 = vpop.eup %7869 }
 0xf2d   :  { %7386 = vmatpush3.msra.mxu1 %v9640_v46  ;;  %v3709_v18 = vpop.xlane.xlu1 %3708  ;;  %v4927_v52 = vsel %vm513_vm7, %v9802_v38, 0.0 }
 0xf2e   :  { %7387 = vmatprep.subr.mxu1 %v7963_v1  ;;  %7877 = vrcp.f32 %v3709_v18  ;;  %7363 = vmatmul.mubr.msk.f32.gmra.mxu1 %vm513_vm7, %v3478_v14 }
 0xf2f   :  { %v7872_v53 = vpop.eup %7871  ;;  %7388 = vmatpush3.msra.mxu1 %v9630_v35  ;;  %4698 = vadd.xlane.f32.xlu1 %v4697_v51 }
 0xf30   :  { %7365 = vmatprep.mubr.msk.f32.mxu1 %vm7964_vm0, %v7963_v1  ;;  %v3479_v46 = vmul.f32 %v7872_v53, %v9686_v0  ;;  %7413 = vmatprep.subr.mxu1 %v7963_v1 }
 0xf31   :  { %v3939_v40 = vpop.xlane.xlu1 %3938 }
 0xf32   :  { %7879 = vrcp.f32 %v3939_v40  ;;  %7366 = vmatmul.mubr.msk.f32.gmra.mxu1 %vm513_vm7, %v3479_v46 }
 0xf33   :  { %v7874_v33 = vpop.eup %7873  ;;  %4928 = vadd.xlane.f32.xlu1 %v4927_v52  ;;  %7389 = vmatprep.mubr.msk.f32.mxu1 %vm7964_vm0, %v7963_v1 }
 0xf34   :  { %v3713_v35 = vmul.f32 %v7874_v33, %v9691_v17 }
 0xf35   :  { %v3942_v48 = vpop.xlane.xlu0 %3941 }
 0xf36   :  { %7881 = vrcp.f32 %v3942_v48  ;;  %7390 = vmatmul.mubr.msk.f32.vlgmr.msra.gmra.mxu1 %vm513_vm7, %v3713_v35 }
 0xf37   :  { %v7876_v0 = vpop.eup %7875  ;;  %7414 = vmatpush3.msk.msra.mxu1 %vm565_vm6, %v9632_v5  ;;  %7392 = vmatprep.mubr.msk.f32.mxu1 %vm7964_vm0, %v7963_v1 }
 0xf38   :  { %7415 = vmatprep.subr.mxu1 %v7963_v1  ;;  %v3714_v59 = vmul.f32 %v7876_v0, %v9696_v44 }
 0xf39   :  { %7416 = vmatpush3.msra.mxu1 %v9646_v36  ;;  %v3945_v62 = vpop.xlane.xlu1 %3944 }
 0xf3a   :  { %7417 = vmatprep.subr.mxu1 %v7963_v1  ;;  %7883 = vrcp.f32 %v3945_v62  ;;  %7393 = vmatmul.mubr.msk.f32.gmra.mxu1 %vm513_vm7, %v3714_v59  ;;  %v6513_v59 = vld [vmem:[%s10877_s6 + $0x30] sm:$0xff] }
 0xf3b   :  { %v7878_v17 = vpop.eup %7877  ;;  %7418 = vmatpush3.msra.mxu1 %v9636_v43  ;;  %7395 = vmatprep.mubr.msk.f32.mxu1 %vm7964_vm0, %v7963_v1 }
 0xf3c   :  { %v3715_v5 = vmul.f32 %v7878_v17, %v9700_v22  ;;  %7443 = vmatprep.subr.mxu1 %v7963_v1  ;;  %v6512_v17 = vld [vmem:[%s10877_s6 + $0x28] sm:$0xff] }
 0xf3e   :  { %7396 = vmatmul.mubr.msk.f32.gmra.mxu1 %vm513_vm7, %v3715_v5  ;;  %v4221_v44 = vpop.xlane.xlu1 %4220 }
 0xf3f   :  { %v7880_v36 = vpop.eup %7879  ;;  %7885 = vrcp.f32 %v4221_v44  ;;  %7419 = vmatprep.mubr.msk.f32.mxu1 %vm7964_vm0, %v7963_v1 }
 0xf40   :  { %v3949_v9 = vmul.f32 %v7880_v36, %v9705_v7 }
 0xf42   :  { %v4224_v37 = vpop.xlane.xlu0 %4223  ;;  %7420 = vmatmul.mubr.msk.f32.vlgmr.msra.gmra.mxu1 %vm513_vm7, %v3949_v9  ;;  %v6511_v9 = vld [vmem:[%s10877_s6 + $0x20] sm:$0xff] }
 0xf43   :  { %v7882_v43 = vpop.eup %7881  ;;  %7887 = vrcp.f32 %v4224_v37  ;;  %7444 = vmatpush3.msk.msra.mxu1 %vm565_vm6, %v9642_v4  ;;  %7422 = vmatprep.mubr.msk.f32.mxu1 %vm7964_vm0, %v7963_v1 }
 0xf44   :  { %7445 = vmatprep.subr.mxu1 %v7963_v1  ;;  %4942 = vrot.lane.b32.xlu1 %v9340_v19, %s10890_s2  ;;  %v3950_v22 = vmul.f32 %v7882_v43, %v9710_v10 }
 0xf45   :  { %7446 = vmatpush3.msra.mxu1 %v9650_v3 }
 0xf46   :  { %7447 = vmatprep.subr.mxu1 %v7963_v1  ;;  %7423 = vmatmul.mubr.msk.f32.gmra.mxu1 %vm513_vm7, %v3950_v22  ;;  %v4711_v10 = vpop.permute.xlu0 %4710 }
 0xf47   :  { %v7884_v7 = vpop.eup %7883  ;;  %7448 = vmatpush3.msra.mxu1 %v9648_v60  ;;  %7425 = vmatprep.mubr.msk.f32.mxu1 %vm7964_vm0, %v7963_v1 }
 0xf48   :  { %4809 = vrot.lane.b32.xlu1 %v9332_v58, %s10886_s1  ;;  %v3951_v4 = vmul.f32 %v7884_v7, %v9714_v61  ;;  %7473 = vmatprep.subr.mxu1 %v7963_v1 }
 0xf4a   :  { %7426 = vmatmul.mubr.msk.f32.gmra.mxu1 %vm513_vm7, %v3951_v4 }
 0xf4b   :  { %7449 = vmatprep.mubr.msk.f32.mxu1 %vm7964_vm0, %v7963_v1 }
 0xf4c   :  { %v7886_v19 = vpop.eup %7885 }
 0xf4d   :  { %v4231_v3 = vmul.f32 %v7886_v19, %v9718_v31 }
 0xf4f   :  { %7450 = vmatmul.mubr.msk.f32.vlgmr.msra.gmra.mxu1 %vm513_vm7, %v4231_v3 }
 0xf50   :  { %v7888_v60 = vpop.eup %7887  ;;  %7474 = vmatpush3.msk.msra.mxu1 %vm565_vm6, %v9652_v47  ;;  %7452 = vmatprep.mubr.msk.f32.mxu1 %vm7964_vm0, %v7963_v1  ;;  %v4709_v47 = vpop.permute.xlu1 %4708 }
 0xf51   :  { %7475 = vmatprep.subr.mxu1 %v7963_v1  ;;  %v4232_v58 = vmul.f32 %v7888_v60, %v9722_v30 }
 0xf52   :  { %7476 = vmatpush3.msra.mxu1 %v9654_v50 }
 0xf53   :  { %7477 = vmatprep.subr.mxu1 %v7963_v1  ;;  %7453 = vmatmul.mubr.msk.f32.gmra.mxu1 %vm513_vm7, %v4232_v58 }
 0xf54   :  { %7478 = vmatpush3.msra.mxu1 %v9735_v55  ;;  %7455 = vmatprep.mubr.msk.f32.mxu1 %vm7964_vm0, %v7963_v1 }
 0xf55   :  { %7503 = vmatprep.subr.mxu1 %v7963_v1 }
 0xf73   :  { %v4227_v61 = vpop.xlane.xlu1 %4226 }
 0xf74   :  { %7889 = vrcp.f32 %v4227_v61 }
 0xf77   :  { %v4460_v31 = vpop.xlane.xlu0 %4459  ;;  %v4457_v57 = vpop.xlane.xlu1 %4456 }
 0xf78   :  { %7891 = vrcp.f32 %v4457_v57 }
 0xf79   :  { %7893 = vrcp.f32 %v4460_v31 }
 0xf7b   :  { %v4696_v50 = vpop.xlane.xlu0 %4695  ;;  %v4463_v30 = vpop.xlane.xlu1 %4462 }
 0xf7c   :  { %7895 = vrcp.f32 %v4463_v30 }
 0xf7f   :  { %v4707_v12 = vpop.permute.xlu0 %4706 }
 0xf81   :  { %v7890_v15 = vpop.eup %7889 }
 0xf82   :  { %v4233_v55 = vmul.f32 %v7890_v15, %v9737_v21 }
 0xf83   :  { %v4945_v32 = vpop.permute.xlu0 %4944  ;;  %v4693_v28 = vpop.xlane.xlu1 %4692 }
 0xf84   :  { %7897 = vrcp.f32 %v4693_v28  ;;  %7456 = vmatmul.mubr.msk.f32.gmra.mxu1 %vm513_vm7, %v4233_v55 }
 0xf85   :  { %7479 = vmatprep.mubr.msk.f32.mxu1 %vm7964_vm0, %v7963_v1  ;;  %v7892_v54 = vpop.eup %7891  ;;  %7899 = vrcp.f32 %v4696_v50 }
 0xf86   :  { %v4467_v49 = vmul.f32 %v7892_v54, %v9740_v39  ;;  %v7894_v29 = vpop.eup %7893 }
 0xf87   :  { %v4808_v13 = vpop.permute.xlu0 %4807  ;;  %v4468_v21 = vmul.f32 %v7894_v29, %v9744_v25  ;;  %v4947_v63 = vpop.permute.xlu1 %4946 }
 0xf88   :  { %7528 = vmatmul.mubr.msk.f32.gmra.mxu0 %vm420_vm5, %v4808_v13  ;;  %7480 = vmatmul.mubr.msk.f32.vlgmr.msra.gmra.mxu1 %vm513_vm7, %v4467_v49 }
 0xf89   :  { %7530 = vmatprep.mubr.msk.f32.mxu0 %vm7964_vm0, %v7963_v1  ;;  %7504 = vmatpush3.msk.msra.mxu1 %vm565_vm6, %v4711_v10  ;;  %v7896_v39 = vpop.eup %7895 }
 0xf8a   :  { %7482 = vmatprep.mubr.msk.f32.mxu1 %vm7964_vm0, %v7963_v1  ;;  %7505 = vmatprep.subr.mxu1 %v7963_v1  ;;  %v4469_v24 = vmul.f32 %v7896_v39, %v9746_v26 }
 0xf8b   :  { %7506 = vmatpush3.msra.mxu1 %v4709_v47 }
 0xf8c   :  { %7507 = vmatprep.subr.mxu1 %v7963_v1  ;;  %7483 = vmatmul.mubr.msk.f32.gmra.mxu1 %vm513_vm7, %v4468_v21 }
 0xf8d   :  { %7508 = vmatpush3.msra.mxu1 %v4707_v12  ;;  %7485 = vmatprep.mubr.msk.f32.mxu1 %vm7964_vm0, %v7963_v1 }
 0xf8e   :  { %7533 = vmatprep.subr.mxu1 %v7963_v1 }
 0xf90   :  { %7486 = vmatmul.mubr.msk.f32.gmra.mxu1 %vm513_vm7, %v4469_v24 }
 0xf91   :  { %v7898_v23 = vpop.eup %7897  ;;  %7509 = vmatprep.mubr.msk.f32.mxu1 %vm7964_vm0, %v7963_v1 }
 0xf92   :  { %v4703_v42 = vmul.f32 %v7898_v23, %v9758_v34  ;;  %v7900_v25 = vpop.eup %7899 }
 0xf93   :  { %v4704_v26 = vmul.f32 %v7900_v25, %v9752_v11 }
 0xf94   :  { %7510 = vmatmul.mubr.msk.f32.vlgmr.msra.gmra.mxu1 %vm513_vm7, %v4703_v42 }
 0xf95   :  { %7534 = vmatpush3.msk.msra.mxu1 %vm565_vm6, %v4947_v63  ;;  %7512 = vmatprep.mubr.msk.f32.mxu1 %vm7964_vm0, %v7963_v1 }
 0xf96   :  { %7535 = vmatprep.subr.mxu1 %v7963_v1 }
 0xf97   :  { %7536 = vmatpush3.msra.mxu1 %v4945_v32 }
 0xf98   :  { %7513 = vmatmul.mubr.msk.f32.gmra.mxu1 %vm513_vm7, %v4704_v26  ;;  %7537 = vmatprep.subr.mxu1 %v7963_v1 }
 0xf99   :  { %7515 = vmatprep.mubr.msk.f32.mxu1 %vm7964_vm0, %v7963_v1 }
 0xfb8   :  { %v4699_v34 = vpop.xlane.xlu1 %4698 }
 0xfb9   :  { %7901 = vrcp.f32 %v4699_v34 }
 0xfbc   :  { %v4929_v45 = vpop.xlane.xlu1 %4928 }
 0xfbd   :  { %7903 = vrcp.f32 %v4929_v45 }
 0xfc0   :  { %v4943_v27 = vpop.permute.xlu1 %4942 }
 0xfc1   :  { %7538 = vmatpush3.msra.mxu1 %v4943_v27 }
 0xfc2   :  { %7571 = vmatprep.subr.mxu1 %v7963_v1 }
 0xfc4   :  { %v4810_v20 = vpop.permute.xlu1 %4809 }
 0xfc5   :  { %7531 = vmatmul.mubr.msk.f32.gmra.mxu0 %vm420_vm5, %v4810_v20 }
 0xfc6   :  { %v7902_v11 = vpop.eup %7901  ;;  %7556 = vmatprep.mubr.msk.f32.mxu0 %vm7964_vm0, %v7963_v1 }
 0xfc7   :  { %v4705_v14 = vmul.f32 %v7902_v11, %v9792_v56 }
 0xfc9   :  { %7516 = vmatmul.mubr.msk.f32.gmra.mxu1 %vm513_vm7, %v4705_v14 }
 0xfca   :  { %v7904_v18 = vpop.eup %7903  ;;  %7539 = vmatprep.mubr.msk.f32.mxu1 %vm7964_vm0, %v7963_v1 }
 0xfcb   :  { %v4939_v51 = vmul.f32 %v7904_v18, %v9802_v38  ;;  %v6514_v38 = vld [vmem:[%s10877_s6 + $0x38] sm:$0xff]  ;;  %s7979_s6 = smov [#allocation2]  }
 0xfcc   :  { %7549 = vmatpush3.msra.mxu0 %v6514_v38  ;;  %s6300_s2 = sshll.u32 %s7979_s6, 4  ;;  %s6301_s2 = int_to_ptr.vmem [resolvable:$true] %s6300_s2 }
 0xfcd   :  { %7540 = vmatmul.mubr.msk.f32.vlgmr.msra.gmra.mxu1 %vm513_vm7, %v4939_v51  ;;  %7550 = vmatprep.subr.mxu0 %v7963_v1  ;;  %p7946_p1 = scmp.lt.s32.totalorder %s6301_s2, %s6301_s2 }
 0xfce   :  { %7542 = vmatprep.mubr.msk.f32.mxu1 %vm7964_vm0, %v7963_v1  ;;  %7551 = vmatpush3.msra.mxu0 %v6513_v59 }
 0xfcf   :  { %7552 = vmatprep.subr.mxu0 %v7963_v1 }
 0xfd0   :  { %7553 = vmatpush3.msra.mxu0 %v6512_v17 }
 0xfd1   :  { %7554 = vmatprep.subr.mxu0 %v7963_v1 }
 0xfd2   :  { %7555 = vmatpush3.msra.mxu0 %v6511_v9 }
 0xfd3   :  { %7594 = vmatprep.subr.mxu0 %v7963_v1 }
 0xfde   :  { %v9921_v53 = vpop.f32.mrf.mxu1 }
 0xfe0   :  { %v7331_v46 = vpop.f32.mrf.mxu1 }
 0xfe2   :  { %v9923_v40 = vpop.f32.mrf.mxu1 }
 0xfe4   :  { %v7334_v52 = vpop.f32.mrf.mxu1 }
 0xfe6   :  { %v9925_v56 = vpop.f32.mrf.mxu1 }
 0xfe8   :  { %v7337_v33 = vpop.f32.mrf.mxu1 }
 0xfea   :  { %v3565_v35 = vpop.f32.mrf.mxu1 }
 0xfeb   :  { %4054 = vrot.lane.b32.xlu0 %v3565_v35, %s10891_s7 }
 0xfec   :  { %v7361_v48 = vpop.f32.mrf.mxu1 }
 0xfee   :  { %v3570_v0 = vpop.f32.mrf.mxu1 }
 0xfef   :  { %4056 = vrot.lane.b32.xlu1 %v3570_v0, %s10891_s7 }
 0xff0   :  { %v7364_v62 = vpop.f32.mrf.mxu1 }
 0xff2   :  { %v3575_v5 = vpop.f32.mrf.mxu1 }
 0xff3   :  { %4058 = vrot.lane.b32.xlu0 %v3575_v5, %s10891_s7 }
 0xff4   :  { %v7367_v44 = vpop.f32.mrf.mxu1 }
 0xff6   :  { %v3801_v36 = vpop.f32.mrf.mxu1 }
 0xff7   :  { %4066 = vrot.lane.b32.xlu1 %v3801_v36, %s10892_s0 }
 0xff8   :  { %v7391_v37 = vpop.f32.mrf.mxu1 }
 0xffa   :  { %v3806_v43 = vpop.f32.mrf.mxu1 }
 0xffb   :  { %4068 = vrot.lane.b32.xlu0 %v3806_v43, %s10892_s0 }
 0xffc   :  { %v7394_v22 = vpop.f32.mrf.mxu1 }
 0xffe   :  { %v3811_v7 = vpop.f32.mrf.mxu1 }
0x1000   :  { %v7397_v4 = vpop.f32.mrf.mxu1 }
0x1002   :  { %v4037_v19 = vpop.f32.mrf.mxu1 }
0x1003   :  { %4078 = vrot.lane.b32.xlu0 %v4037_v19, %s10893_s3 }
0x1004   :  { %v7421_v3 = vpop.f32.mrf.mxu1 }
0x1006   :  { %v4042_v60 = vpop.f32.mrf.mxu1 }
0x1007   :  { %4080 = vrot.lane.b32.xlu0 %v4042_v60, %s10893_s3 }
0x1008   :  { %v7424_v58 = vpop.f32.mrf.mxu1 }
0x100a   :  { %v4047_v47 = vpop.f32.mrf.mxu1 }
0x100b   :  { %4070 = vrot.lane.b32.xlu0 %v3811_v7, %s10892_s0 }
0x100c   :  { %v7427_v10 = vpop.f32.mrf.mxu1 }
0x100f   :  { %v4319_v61 = vpop.f32.mrf.mxu1 }
0x1011   :  { %v7451_v31 = vpop.f32.mrf.mxu1 }
0x1013   :  { %v9951_v57 = vpop.f32.mrf.mxu1 }
0x1015   :  { %v7454_v50 = vpop.f32.mrf.mxu1 }
0x1044   :  { %v9953_v30 = vpop.f32.mrf.mxu1 }
0x1046   :  { %v7457_v12 = vpop.f32.mrf.mxu1 }
0x1048   :  { %v4900_v15 = vpop.f32.mrf.mxu0  ;;  %v4555_v55 = vpop.f32.mrf.mxu1 }
0x1049   :  { %v4912_v32 = vsel %vm513_vm7, %v4900_v15, -inf  ;;  %5044 = vrot.lane.b32.xlu1 %v4555_v55, %s10891_s7 }
0x104a   :  { %4913 = vmax.xlane.f32.xlu0 %v4912_v32  ;;  %v7529_v28 = vpop.f32.mrf.mxu0  ;;  %v7481_v54 = vpop.f32.mrf.mxu1 }
0x104c   :  { %v9957_v49 = vpop.f32.mrf.mxu1 }
0x104e   :  { %v7484_v13 = vpop.f32.mrf.mxu1 }
0x1050   :  { %v9959_v29 = vpop.f32.mrf.mxu1 }
0x1052   :  { %v7487_v21 = vpop.f32.mrf.mxu1 }
0x1054   :  { %v4791_v39 = vpop.f32.mrf.mxu1 }
0x1055   :  { %5056 = vrot.lane.b32.xlu1 %v4791_v39, %s10892_s0 }
0x1056   :  { %v7511_v24 = vpop.f32.mrf.mxu1 }
0x1058   :  { %v9962_v23 = vpop.f32.mrf.mxu1 }
0x105a   :  { %v7514_v42 = vpop.f32.mrf.mxu1 }
0x105d   :  { %v4055_v25 = vpop.permute.xlu0 %4054 }
0x105e   :  { %v4087_v27 = vsel %vm420_vm5, %v9921_v53, %v4055_v25 }
0x1061   :  { %v4057_v26 = vpop.permute.xlu1 %4056 }
0x1062   :  { %v4088_v18 = vsel %vm420_vm5, %v9923_v40, %v4057_v26 }
0x1065   :  { %v4059_v63 = vpop.permute.xlu0 %4058 }
0x1066   :  { %v4089_v19 = vsel %vm420_vm5, %v9925_v56, %v4059_v63  ;;  %v10003_v56 = vld [vmem:[%s10878_s5 + $0x1] ss:$0 sm:$0xff] }
0x1069   :  { %v4067_v45 = vpop.permute.xlu1 %4066 }
0x106a   :  { %v4090_v20 = vsel %vm1395_vm9, %v4087_v27, %v4067_v45 }
0x106d   :  { %v4069_v34 = vpop.permute.xlu0 %4068 }
0x106e   :  { %v4091_v51 = vsel %vm1395_vm9, %v4088_v18, %v4069_v34 }
0x1075   :  { %v4079_v11 = vpop.permute.xlu0 %4078 }
0x1076   :  { %v4093_v14 = vsel %vm1399_vm10, %v4090_v20, %v4079_v11 }
0x1077   :  { %7557 = vmatmul.mubr.msk.f32.vlgmr.msra.gmra.mxu0 %vm205_vm2, %v4093_v14 }
0x1078   :  { %7559 = vmatprep.mubr.msk.f32.mxu0 %vm7964_vm0, %v7963_v1 }
0x1079   :  { %v4081_v46 = vpop.permute.xlu0 %4080 }
0x107a   :  { %v4094_v52 = vsel %vm1399_vm10, %v4091_v51, %v4081_v46 }
0x107b   :  { %7560 = vmatmul.mubr.msk.f32.gmra.mxu0 %vm205_vm2, %v4094_v52 }
0x107c   :  { %7562 = vmatprep.mubr.msk.f32.mxu0 %vm7964_vm0, %v7963_v1 }
0x107d   :  { %v4071_v59 = vpop.permute.xlu0 %4070 }
0x107e   :  { %v4092_v3 = vsel %vm1395_vm9, %v4089_v19, %v4071_v59 }
0x1085   :  { %v4905_v53 = vpop.f32.mrf.mxu0 }
0x1086   :  { %v4915_v38 = vsel %vm520_vm8, %v4905_v53, -inf }
0x1087   :  { %v7532_v33 = vpop.f32.mrf.mxu0 }
0x1089   :  { %v9978_v35 = vpop.f32.mrf.mxu1 }
0x108b   :  { %v7517_v48 = vpop.f32.mrf.mxu1 }
0x108d   :  { %v5027_v0 = vpop.f32.mrf.mxu1 }
0x108e   :  { %5068 = vrot.lane.b32.xlu1 %v5027_v0, %s10893_s3  ;;  %v6529_v0 = vld [vmem:[%s10807_s11 + $0x38] sm:$0xff] }
0x108f   :  { %v7541_v40 = vpop.f32.mrf.mxu1  ;;  %7572 = vmatpush3.msra.mxu1 %v6529_v0 }
0x1090   :  { %7573 = vmatprep.subr.mxu1 %v7963_v1  ;;  %v6528_v40 = vld [vmem:[%s10807_s11 + $0x30] sm:$0xff] }
0x1091   :  { %7574 = vmatpush3.msra.mxu1 %v6528_v40 }
0x1092   :  { %4082 = vrot.lane.b32.xlu1 %v4047_v47, %s10893_s3  ;;  %7575 = vmatprep.subr.mxu1 %v7963_v1 }
0x10b6   :  { %4916 = vmax.xlane.f32.xlu1 %v4915_v38  ;;  %v6527_v38 = vld [vmem:[%s10807_s11 + $0x28] sm:$0xff] }
0x10b7   :  { %7576 = vmatpush3.msra.mxu1 %v6527_v38  ;;  %v6538_v38 = vld [vmem:[%s10809_s13 + $0x88] sm:$0xff] }
0x10b8   :  { %7577 = vmatprep.subr.mxu1 %v7963_v1 }
0x10bb   :  { %v5045_v9 = vpop.permute.xlu1 %5044 }
0x10bc   :  { %v5077_v43 = vsel %vm420_vm5, %v4319_v61, %v5045_v9 }
0x10c7   :  { %v5057_v37 = vpop.permute.xlu1 %5056 }
0x10c8   :  { %v5080_v22 = vsel %vm1395_vm9, %v5077_v43, %v5057_v37 }
0x10d3   :  { %v4914_v62 = vpop.xlane.xlu0 %4913 }
0x10d4   :  { %v4919_v17 = vsub.f32 %v4900_v15, %v4914_v62 }
0x10d6   :  { %v4923_v5 = vmul.f32 1.442695, %v4919_v17 }
0x10d8   :  { %7905 = vpow2.f32 %v4923_v5 }
0x10e5   :  { %v7906_v44 = vpop.eup %7905 }
0x10e6   :  { %v4930_v36 = vsel %vm513_vm7, %v7906_v44, 0.0 }
0x10e7   :  { %4931 = vadd.xlane.f32.xlu1 %v4930_v36 }
0x1100   :  { %v5069_v7 = vpop.permute.xlu1 %5068 }
0x1101   :  { %v9987_v4 = vsel %vm1399_vm10, %v5080_v22, %v5069_v7 }
0x1102   :  { %v5089_v60 = vrot.slane %v9987_v4, 7  ;;  %v6540_v4 = vld [vmem:[%s10809_s13 + $0x98] sm:$0xff] }
0x1104   :  { %v4083_v58 = vpop.permute.xlu1 %4082 }
0x1105   :  { %v4095_v47 = vsel %vm1399_vm10, %v4092_v3, %v4083_v58 }
0x1106   :  { %v5095_v10 = vsel %vm565_vm6, %v4095_v47, %v5089_v60 }
0x1107   :  { %7563 = vmatmul.mubr.msk.f32.gmra.mxu0 %vm205_vm2, %v5095_v10  ;;  %v10056_v10 = vld [vmem:[%s10879_s26 + $0x1] ss:$0 sm:$0xff] }
0x1108   :  { %7565 = vmatprep.mubr.msk.f32.mxu0 %vm7964_vm0, %v7963_v1 }
0x1137   :  { %v5180_v61 = vpop.f32.mrf.mxu0 }
0x1138   :  { %v5204_v31 = vadd.f32 %v5180_v61, %v9210_v8 }
0x1139   :  { %v7558_v50 = vpop.f32.mrf.mxu0 }
0x113a   :  { %v10007_v12 = vadd.f32 %v10003_v56, %v5204_v31  ;;  %v10061_v50 = vld [vmem:[%s10806_s10 + $0x1] ss:$0 sm:$0xff]  ;;  %s7941_s10 = scalar_lea.vmem %s6301_s2, 32 }
0x113b   :  { %v5185_v15 = vpop.f32.mrf.mxu0  ;;  %p7942_p0 = scmp.ne.s32.totalorder %s6301_s2, %s7941_s10  ;;  %p7947_p2 = scmp.lt.s32.totalorder %s7941_s10, %s7941_s10 }
0x113c   :  { %v5205_v55 = vadd.f32 %v5185_v15, %v9215_v2  ;;  %v5226_v32 = vsel %vm205_vm2, %v10007_v12, 0.0 }
0x113d   :  { %5227 = vadd.xlane.f32.xlu0 %v5226_v32  ;;  %v7561_v28 = vpop.f32.mrf.mxu0  ;;  %p7948_p3 = por %p7947_p2, %p7946_p1 }
0x113e   :  { %v5218_v54 = vadd.f32 %v10003_v56, %v5205_v55 }
0x113f   :  { %v4917_v21 = vpop.xlane.xlu1 %4916  ;;  %p7949_p4 = pnand %p7948_p3, %p7942_p0 }
0x1140   :  { %v5229_v13 = vsel %vm205_vm2, %v5218_v54, 0.0  ;;  %v4920_v2 = vsub.f32 %v4905_v53, %v4917_v21  ;;  %v6551_v21 = vld [vmem:[%s10809_s13 + $0xf0] sm:$0xff] }
0x1141   :  { %5230 = vadd.xlane.f32.xlu0 %v5229_v13 }
0x1142   :  { %v4925_v42 = vmul.f32 1.442695, %v4920_v2  ;;  %v6546_v2 = vld [vmem:[%s10809_s13 + $0xc8] sm:$0xff] }
0x1170   :  { %v4932_v39 = vpop.xlane.xlu1 %4931 }
0x1171   :  { %7907 = vrcp.f32 %v4932_v39  ;;  %v6549_v39 = vld [vmem:[%s10809_s13 + $0xe0] sm:$0xff] }
0x1172   :  { %7909 = vpow2.f32 %v4925_v42  ;;  %v6545_v42 = vld [vmem:[%s10809_s13 + $0xc0] sm:$0xff] }
0x117e   :  { %v7908_v8 = vpop.eup %7907 }
0x117f   :  { %v4940_v24 = vmul.f32 %v7908_v8, %v7906_v44  ;;  %v7910_v46 = vpop.eup %7909  ;;  %v6548_v8 = vld [vmem:[%s10809_s13 + $0xd8] sm:$0xff] }
0x1181   :  { %7543 = vmatmul.mubr.msk.f32.gmra.mxu1 %vm513_vm7, %v4940_v24  ;;  %v6547_v24 = vld [vmem:[%s10809_s13 + $0xd0] sm:$0xff] }
0x1182   :  { %7545 = vmatprep.mubr.msk.f32.mxu1 %vm7964_vm0, %v7963_v1 }
0x11c6   :  { %v5228_v25 = vpop.xlane.xlu0 %5227 }
0x11c7   :  { %v5241_v63 = vmul.f32 0.03125, %v5228_v25  ;;  %v5190_v26 = vpop.f32.mrf.mxu0  ;;  %v6544_v25 = vld [vmem:[%s10809_s13 + $0xb8] sm:$0xff] }
0x11c8   :  { %v5206_v34 = vadd.f32 %v5190_v26, %v9220_v41  ;;  %v4933_v41 = vsel %vm520_vm8, %v7910_v46, 0.0  ;;  %v6542_v26 = vld [vmem:[%s10809_s13 + $0xa8] sm:$0xff] }
0x11c9   :  { %v5246_v45 = vsub.f32 %v10007_v12, %v5241_v63  ;;  %v7564_v27 = vpop.f32.mrf.mxu0  ;;  %v6543_v63 = vld [vmem:[%s10809_s13 + $0xb0] sm:$0xff] }
0x11ca   :  { %v10020_v20 = vadd.f32 %v10003_v56, %v5206_v34  ;;  %v5231_v11 = vpop.xlane.xlu0 %5230  ;;  %v6541_v34 = vld [vmem:[%s10809_s13 + $0xa0] sm:$0xff] }
0x11cb   :  { %v5242_v14 = vmul.f32 0.03125, %v5231_v11  ;;  %v5251_v18 = vmul.f32 %v5246_v45, %v5246_v45 }
0x11cc   :  { %v5232_v51 = vsel %vm205_vm2, %v10020_v20, 0.0 }
0x11cd   :  { %v5247_v52 = vsub.f32 %v5218_v54, %v5242_v14  ;;  %5233 = vadd.xlane.f32.xlu0 %v5232_v51  ;;  %v5256_v53 = vsel %vm205_vm2, %v5251_v18, 0.0 }
0x11ce   :  { %5257 = vadd.xlane.f32.xlu1 %v5256_v53 }
0x11cf   :  { %v5252_v33 = vmul.f32 %v5247_v52, %v5247_v52 }
0x11d1   :  { %4934 = vadd.xlane.f32.xlu0 %v4933_v41  ;;  %v5259_v48 = vsel %vm205_vm2, %v5252_v33, 0.0 }
0x11d5   :  { %5260 = vadd.xlane.f32.xlu0 %v5259_v48 }
0x11eb   :  { %5046 = vrot.lane.b32.xlu0 %v9957_v49, %s10891_s7  ;;  %v6526_v49 = vld [vmem:[%s10807_s11 + $0x20] sm:$0xff] }
0x11ec   :  { %7578 = vmatpush3.msra.mxu1 %v6526_v49  ;;  %v6537_v49 = vld [vmem:[%s10809_s13 + $0x80] sm:$0xff] }
0x11ed   :  { %7641 = vmatprep.subr.mxu1 %v7963_v1 }
0x11ef   :  { %5060 = vrot.lane.b32.xlu0 %v9978_v35, %s10892_s0 }
0x1241   :  { %v5032_v59 = vpop.f32.mrf.mxu1 }
0x1243   :  { %v7544_v62 = vpop.f32.mrf.mxu1 }
0x1256   :  { %v5234_v17 = vpop.xlane.xlu0 %5233 }
0x1257   :  { %v5243_v5 = vmul.f32 0.03125, %v5234_v17  ;;  %v5258_v44 = vpop.xlane.xlu1 %5257 }
0x1258   :  { %v5271_v36 = vmul.f32 0.03125, %v5258_v44 }
0x1259   :  { %v10048_v9 = vsub.f32 %v10020_v20, %v5243_v5 }
0x125a   :  { %v5276_v35 = vadd.f32 1e-06, %v5271_v36  ;;  %v4935_v37 = vpop.xlane.xlu0 %4934 }
0x125b   :  { %7911 = vrcp.f32 %v4935_v37  ;;  %v5253_v43 = vmul.f32 %v10048_v9, %v10048_v9 }
0x125c   :  { %7913 = vrsqrt.f32 %v5276_v35 }
0x125d   :  { %v5262_v22 = vsel %vm205_vm2, %v5253_v43, 0.0 }
0x125e   :  { %5263 = vadd.xlane.f32.xlu1 %v5262_v22  ;;  %v5261_v7 = vpop.xlane.xlu0 %5260 }
0x125f   :  { %v5272_v19 = vmul.f32 0.03125, %v5261_v7 }
0x1261   :  { %v5277_v3 = vadd.f32 1e-06, %v5272_v19 }
0x1262   :  { %v5047_v14 = vpop.permute.xlu0 %5046 }
0x1263   :  { %7915 = vrsqrt.f32 %v5277_v3  ;;  %v5078_v51 = vsel %vm420_vm5, %v9951_v57, %v5047_v14 }
0x1268   :  { %v7912_v58 = vpop.eup %7911 }
0x1269   :  { %v7914_v47 = vpop.eup %7913  ;;  %v4941_v61 = vmul.f32 %v7912_v58, %v7910_v46 }
0x126a   :  { %v5286_v31 = vmul.f32 %v7914_v47, %v5246_v45 }
0x126b   :  { %7546 = vmatmul.mubr.msk.f32.gmra.mxu1 %vm513_vm7, %v4941_v61 }
0x126c   :  { %v5297_v15 = vmul.f32 %v10056_v10, %v5286_v31  ;;  %7579 = vmatprep.mubr.msk.f32.mxu1 %vm7964_vm0, %v7963_v1 }
0x126e   :  { %v5308_v55 = vadd.f32 %v10061_v50, %v5297_v15 }
0x126f   :  { %5058 = vrot.lane.b32.xlu1 %v9962_v23, %s10892_s0  ;;  %v6552_v23 = vld [vmem:[%s10809_s13 + $0xf8] sm:$0xff] }
0x1270   :  { %v7916_v32 = vpop.eup %7915  ;;  %7580 = vmatmul.mubr.msk.f32.vlgmr.msra.gmra.mxu1 %vm205_vm2, %v5308_v55  ;;  %7595 = vmatpush3.msra.mxu0 %v6552_v23 }
0x1271   :  { %v5287_v28 = vmul.f32 %v7916_v32, %v5247_v52  ;;  %7582 = vmatprep.mubr.msk.f32.mxu1 %vm7964_vm0, %v7963_v1  ;;  %7596 = vmatprep.subr.mxu0 %v7963_v1 }
0x1272   :  { %7597 = vmatpush3.msra.mxu0 %v6551_v21 }
0x1273   :  { %5070 = vrot.lane.b32.xlu1 %v5032_v59, %s10893_s3  ;;  %v5298_v54 = vmul.f32 %v10056_v10, %v5287_v28  ;;  %7598 = vmatprep.subr.mxu0 %v7963_v1 }
0x1275   :  { %v5309_v13 = vadd.f32 %v10061_v50, %v5298_v54  ;;  %v5061_v54 = vpop.permute.xlu0 %5060 }
0x1277   :  { %5048 = vrot.lane.b32.xlu1 %v9959_v29, %s10891_s7  ;;  %7583 = vmatmul.mubr.msk.f32.gmra.mxu1 %vm205_vm2, %v5309_v13  ;;  %v6550_v29 = vld [vmem:[%s10809_s13 + $0xe8] sm:$0xff] }
0x1278   :  { %7585 = vmatprep.mubr.msk.f32.mxu1 %vm7964_vm0, %v7963_v1  ;;  %7599 = vmatpush3.msra.mxu0 %v6550_v29 }
0x1279   :  { %7600 = vmatprep.subr.mxu0 %v7963_v1 }
0x127a   :  { %7601 = vmatpush3.msra.mxu0 %v6549_v39 }
0x127b   :  { %7602 = vmatprep.subr.mxu0 %v7963_v1 }
0x127c   :  { %7603 = vmatpush3.msra.mxu0 %v6548_v8 }
0x127d   :  { %7604 = vmatprep.subr.mxu0 %v7963_v1 }
0x127e   :  { %7605 = vmatpush3.msra.mxu0 %v6547_v24 }
0x127f   :  { %7606 = vmatprep.subr.mxu0 %v7963_v1 }
0x1280   :  { %7607 = vmatpush3.msra.mxu0 %v6546_v2 }
0x1281   :  { %7608 = vmatprep.subr.mxu0 %v7963_v1 }
0x1282   :  { %7609 = vmatpush3.msra.mxu0 %v6545_v42 }
0x1283   :  { %7610 = vmatprep.subr.mxu0 %v7963_v1 }
0x1284   :  { %7611 = vmatpush3.msra.mxu0 %v6544_v25 }
0x1285   :  { %7612 = vmatprep.subr.mxu0 %v7963_v1 }
0x1286   :  { %7613 = vmatpush3.msra.mxu0 %v6543_v63 }
0x1287   :  { %7614 = vmatprep.subr.mxu0 %v7963_v1 }
0x1288   :  { %7615 = vmatpush3.msra.mxu0 %v6542_v26 }
0x1289   :  { %7616 = vmatprep.subr.mxu0 %v7963_v1 }
0x128a   :  { %7617 = vmatpush3.msra.mxu0 %v6541_v34 }
0x128b   :  { %7618 = vmatprep.subr.mxu0 %v7963_v1 }
0x128c   :  { %7619 = vmatpush3.msra.mxu0 %v6540_v4 }
0x128d   :  { %7620 = vmatprep.subr.mxu0 %v7963_v1 }
0x12e7   :  { %v5264_v45 = vpop.xlane.xlu1 %5263 }
0x12e8   :  { %v5273_v27 = vmul.f32 0.03125, %v5264_v45 }
0x12ea   :  { %v5278_v11 = vadd.f32 1e-06, %v5273_v27 }
0x12eb   :  { %v5059_v18 = vpop.permute.xlu1 %5058 }
0x12ec   :  { %7917 = vrsqrt.f32 %v5278_v11  ;;  %v5081_v46 = vsel %vm1395_vm9, %v5078_v51, %v5059_v18 }
0x12ef   :  { %v5071_v52 = vpop.permute.xlu1 %5070 }
0x12f0   :  { %v5084_v53 = vsel %vm1399_vm10, %v5081_v46, %v5071_v52 }
0x12f1   :  { %v5090_v41 = vrot.slane %v5084_v53, 7 }
0x12f3   :  { %v5091_v33 = vsel %vm565_vm6, %v5089_v60, %v5090_v41  ;;  %v6539_v60 = vld [vmem:[%s10809_s13 + $0x90] sm:$0xff]  ;;  %v5049_v55 = vpop.permute.xlu1 %5048 }
0x12f4   :  { %7566 = vmatmul.mubr.msk.f32.gmra.mxu0 %vm205_vm2, %v5091_v33  ;;  %v5079_v28 = vsel %vm420_vm5, %v9953_v30, %v5049_v55 }
0x12f5   :  { %7568 = vmatprep.mubr.msk.f32.mxu0 %vm7964_vm0, %v7963_v1  ;;  %7621 = vmatpush3.msra.mxu0 %v6539_v60  ;;  %v5082_v29 = vsel %vm1395_vm9, %v5079_v28, %v5061_v54 }
0x12f6   :  { %7622 = vmatprep.subr.mxu0 %v7963_v1 }
0x12f7   :  { %7623 = vmatpush3.msra.mxu0 %v6538_v38 }
0x12f8   :  { %7624 = vmatprep.subr.mxu0 %v7963_v1 }
0x12f9   :  { %v7918_v48 = vpop.eup %7917  ;;  %7625 = vmatpush3.msra.mxu0 %v6537_v49 }
0x12fa   :  { %v5288_v0 = vmul.f32 %v7918_v48, %v10048_v9  ;;  %v10164_v9 = vld [vmem:[%s10808_s12 + $0x1] ss:$0 sm:$0xff] }
0x12fc   :  { %v5299_v57 = vmul.f32 %v10056_v10, %v5288_v0 }
0x12fe   :  { %v5310_v40 = vadd.f32 %v10061_v50, %v5299_v57 }
0x1300   :  { %7586 = vmatmul.mubr.msk.f32.gmra.mxu1 %vm205_vm2, %v5310_v40 }
0x1301   :  { %7588 = vmatprep.mubr.msk.f32.mxu1 %vm7964_vm0, %v7963_v1 }
0x132b   :  { %v5037_v59 = vpop.f32.mrf.mxu1 }
0x132c   :  { %5072 = vrot.lane.b32.xlu1 %v5037_v59, %s10893_s3 }
0x132d   :  { %v7547_v62 = vpop.f32.mrf.mxu1 }
0x1330   :  { %v5407_v17 = vpop.f32.mrf.mxu1 }
0x1331   :  { %v5408_v35 = vadd.f32 %v10164_v9, %v5407_v17 }
0x1332   :  { %v7581_v5 = vpop.f32.mrf.mxu1 }
0x1333   :  { %v5431_v37 = vmul.f32 %v5408_v35, %v5408_v35 }
0x1335   :  { %v5436_v22 = vmul.f32 %v5431_v37, %v5408_v35  ;;  %v6554_v37 = vld [vmem:[%s10810_s14 + $0x1] ss:$0 sm:$0xff] }
0x1337   :  { %v5412_v44 = vpop.f32.mrf.mxu1  ;;  %v5441_v19 = vmul.f32 0.044715, %v5436_v22 }
0x1338   :  { %v5413_v43 = vadd.f32 %v10164_v9, %v5412_v44 }
0x1339   :  { %v7584_v36 = vpop.f32.mrf.mxu1  ;;  %v5446_v58 = vadd.f32 %v5441_v19, %v5408_v35 }
0x133a   :  { %v5432_v7 = vmul.f32 %v5413_v43, %v5413_v43 }
0x133b   :  { %v5451_v61 = vmul.f32 0.7978846, %v5446_v58 }
0x133c   :  { %v5437_v3 = vmul.f32 %v5432_v7, %v5413_v43 }
0x133d   :  { %7919 = vtanh.f32 %v5451_v61 }
0x133e   :  { %v5442_v47 = vmul.f32 0.044715, %v5437_v3 }
0x1340   :  { %v5447_v31 = vadd.f32 %v5442_v47, %v5413_v43 }
0x1342   :  { %v5452_v15 = vmul.f32 0.7978846, %v5447_v31 }
0x1344   :  { %7921 = vtanh.f32 %v5452_v15 }
0x134a   :  { %v7920_v32 = vpop.eup %7919 }
0x134b   :  { %v5461_v13 = vadd.f32 1.0, %v7920_v32 }
0x134d   :  { %v5466_v24 = vmul.f32 0.5, %v5461_v13 }
0x134f   :  { %v5471_v25 = vmul.f32 %v5466_v24, %v5408_v35 }
0x1351   :  { %v7922_v23 = vpop.eup %7921 }
0x1352   :  { %v5462_v2 = vadd.f32 1.0, %v7922_v23 }
0x1354   :  { %v5467_v30 = vmul.f32 0.5, %v5462_v2 }
0x1356   :  { %v5472_v63 = vmul.f32 %v5467_v30, %v5413_v43  ;;  %v5624_v30 = vld [vmem:[%s10813_s17 + $0x10] sm:$0xff] }
0x139e   :  { %v5073_v21 = vpop.permute.xlu1 %5072 }
0x139f   :  { %v5085_v39 = vsel %vm1399_vm10, %v5082_v29, %v5073_v21 }
0x13a0   :  { %v5092_v8 = vrot.slane %v5085_v39, 7 }
0x13a2   :  { %v5093_v42 = vsel %vm565_vm6, %v5090_v41, %v5092_v8 }
0x13a3   :  { %7569 = vmatmul.mubr.msk.f32.gmra.mxu0 %vm205_vm2, %v5093_v42 }
0x13a4   :  { %7626 = vmatprep.mubr.msk.f32.mxu0 %vm7964_vm0, %v7963_v1 }
0x13a7   :  { %7627 = vmatmul.mubr.f32.vlgmr.msra.gmra.mxu0 %v5471_v25  ;;  %v5625_v25 = vld [vmem:[%s10813_s17 + $0x18] sm:$0xff] }
0x13a8   :  { %7629 = vmatprep.mubr.msk.f32.mxu0 %vm7964_vm0, %v7963_v1  ;;  %7642 = vmatpush3.msra.mxu1 %v5625_v25 }
0x13a9   :  { %7643 = vmatprep.subr.mxu1 %v7963_v1 }
0x13aa   :  { %7644 = vmatpush3.msra.mxu1 %v5624_v30 }
0x13ab   :  { %7630 = vmatmul.mubr.f32.gmra.mxu0 %v5472_v63  ;;  %7645 = vmatprep.subr.mxu1 %v7963_v1  ;;  %v5623_v63 = vld [vmem:[%s10813_s17 + $0x8] sm:$0xff] }
0x13ac   :  { %7632 = vmatprep.mubr.msk.f32.mxu0 %vm7964_vm0, %v7963_v1  ;;  %7646 = vmatpush3.msra.mxu1 %v5623_v63 }
0x13ad   :  { %7647 = vmatprep.subr.mxu1 %v7963_v1 }
0x13b4   :  { %v5195_v26 = vpop.f32.mrf.mxu0 }
0x13b5   :  { %v5207_v34 = vadd.f32 %v5195_v26, %v9225_v16  ;;  %v5622_v26 = vld [vmem:[%s10813_s17] sm:$0xff] }
0x13b6   :  { %v7567_v45 = vpop.f32.mrf.mxu0  ;;  %7648 = vmatpush3.msra.mxu1 %v5622_v26  ;;  %v5721_v26 = vld [vmem:[%s10815_s19 + $0x70] sm:$0xff] }
0x13b7   :  { %v5220_v27 = vadd.f32 %v10003_v56, %v5207_v34 }
0x13b9   :  { %v5235_v11 = vsel %vm205_vm2, %v5220_v27, 0.0 }
0x13ba   :  { %5236 = vadd.xlane.f32.xlu0 %v5235_v11 }
0x13c0   :  { %v5417_v14 = vpop.f32.mrf.mxu1 }
0x13c1   :  { %v5418_v18 = vadd.f32 %v10164_v9, %v5417_v14 }
0x13c2   :  { %v7587_v51 = vpop.f32.mrf.mxu1 }
0x13c3   :  { %v5433_v46 = vmul.f32 %v5418_v18, %v5418_v18 }
0x13c5   :  { %v5438_v52 = vmul.f32 %v5433_v46, %v5418_v18 }
0x13c7   :  { %v5443_v53 = vmul.f32 0.044715, %v5438_v52 }
0x13c9   :  { %v5448_v41 = vadd.f32 %v5443_v53, %v5418_v18 }
0x13cb   :  { %v5453_v33 = vmul.f32 0.7978846, %v5448_v41 }
0x13cd   :  { %7923 = vtanh.f32 %v5453_v33  ;;  %v6555_v33 = vld [vmem:[%s10811_s15] ss:$0 sm:$0xff] }
0x13da   :  { %v7924_v48 = vpop.eup %7923 }
0x13db   :  { %v5463_v0 = vadd.f32 1.0, %v7924_v48 }
0x13dd   :  { %v5468_v57 = vmul.f32 0.5, %v5463_v0 }
0x13df   :  { %v5473_v16 = vmul.f32 %v5468_v57, %v5418_v18 }
0x13e1   :  { %7633 = vmatmul.mubr.f32.gmra.mxu0 %v5473_v16 }
0x13e2   :  { %7635 = vmatprep.mubr.msk.f32.mxu0 %vm7964_vm0, %v7963_v1 }
0x1443   :  { %v5237_v44 = vpop.xlane.xlu0 %5236 }
0x1444   :  { %v5244_v36 = vmul.f32 0.03125, %v5237_v44  ;;  %v5715_v44 = vld [vmem:[%s10815_s19 + $0x40] sm:$0xff] }
0x1446   :  { %v5249_v22 = vsub.f32 %v5220_v27, %v5244_v36  ;;  %v5712_v36 = vld [vmem:[%s10815_s19 + $0x28] sm:$0xff] }
0x1448   :  { %v5254_v47 = vmul.f32 %v5249_v22, %v5249_v22 }
0x144a   :  { %v5265_v61 = vsel %vm205_vm2, %v5254_v47, 0.0 }
0x1463   :  { %v5200_v40 = vpop.f32.mrf.mxu0 }
0x1464   :  { %v5208_v4 = vadd.f32 %v5200_v40, %v9231_v6 }
0x1465   :  { %v7570_v60 = vpop.f32.mrf.mxu0 }
0x1466   :  { %v5221_v38 = vadd.f32 %v10003_v56, %v5208_v4 }
0x1467   :  { %v5559_v49 = vpop.f32.mrf.mxu0 }
0x1468   :  { %v5238_v59 = vsel %vm218_vm3, %v5221_v38, 0.0  ;;  %v5580_v35 = vadd.f32 %v5559_v49, %v10007_v12 }
0x1469   :  { %5239 = vadd.xlane.f32.xlu1 %v5238_v59  ;;  %v7628_v62 = vpop.f32.mrf.mxu0 }
0x146a   :  { %v5590_v7 = vadd.f32 %v6554_v37, %v5580_v35  ;;  %v5720_v62 = vld [vmem:[%s10815_s19 + $0x68] sm:$0xff]  ;;  %v5711_v35 = vld [vmem:[%s10815_s19 + $0x20] sm:$0xff] }
0x146b   :  { %v5564_v17 = vpop.f32.mrf.mxu0  ;;  %5772 = vmatprep.subr.mxu1 %v5720_v62  ;;  %v5908_v62 = vld [vmem:[%s10817_s21 + $0x70] sm:$0xff] }
0x146c   :  { %v5719_v17 = vld [vmem:[%s10815_s19 + $0x60] sm:$0xff] }
0x146d   :  { %v7631_v5 = vpop.f32.mrf.mxu0 }
0x146e   :  { %v5716_v5 = vld [vmem:[%s10815_s19 + $0x48] sm:$0xff] }
0x14a1   :  { %v5568_v43 = vpop.f32.mrf.mxu0 }
0x14a2   :  { %v5581_v6 = vadd.f32 %v5568_v43, %v10020_v20  ;;  %v5707_v43 = vld [vmem:[%s10815_s19] sm:$0xff] }
0x14a3   :  { %v7634_v56 = vpop.f32.mrf.mxu0 }
0x14a4   :  { %v5591_v19 = vadd.f32 %v6554_v37, %v5581_v6  ;;  %v5708_v37 = vld [vmem:[%s10815_s19 + $0x8] sm:$0xff]  ;;  %v5722_v6 = vld [vmem:[%s10815_s19 + $0x78] sm:$0xff] }
0x14a6   :  { %v5592_v3 = vsel %vm565_vm6, %v5590_v7, %v5591_v19 }
0x14a7   :  { %v5595_v58 = vsel %vm218_vm3, %v5592_v3, 0.0 }
0x14a8   :  { %5596 = vadd.xlane.f32.xlu0 %v5595_v58 }
0x14ac   :  { %5266 = vadd.xlane.f32.xlu0 %v5265_v61 }
0x14f2   :  { %v5240_v12 = vpop.xlane.xlu1 %5239 }
0x14f3   :  { %v5245_v31 = vmul.f32 0.03125, %v5240_v12 }
0x14f5   :  { %v5250_v15 = vsub.f32 %v5221_v38, %v5245_v31 }
0x14f7   :  { %v5255_v55 = vmul.f32 %v5250_v15, %v5250_v15 }
0x14f9   :  { %v5268_v32 = vsel %vm218_vm3, %v5255_v55, 0.0 }
0x14fa   :  { %5269 = vadd.xlane.f32.xlu0 %v5268_v32  ;;  %v5925_v32 = vld [vmem:[%s10817_s21 + $0xf8] sm:$0xff] }
0x14fb   :  { %6034 = vmatprep.subr.mxu0 %v5925_v32  ;;  %v5969_v32 = vld [vmem:[%s10817_s21 + $0x258] sm:$0xff] }
0x1531   :  { %v5597_v20 = vpop.xlane.xlu0 %5596 }
0x1532   :  { %v5598_v28 = vmul.f32 0.03125, %v5597_v20  ;;  %v5924_v20 = vld [vmem:[%s10817_s21 + $0xf0] sm:$0xff] }
0x1533   :  { %6035 = vmatpush1.msra.mxu0 %v5924_v20  ;;  %v5897_v20 = vld [vmem:[%s10817_s21 + $0x18] sm:$0xff] }
0x1534   :  { %v5599_v54 = vsub.f32 %v5592_v3, %v5598_v28  ;;  %v5923_v28 = vld [vmem:[%s10817_s21 + $0xe8] sm:$0xff] }
0x1535   :  { %v5267_v13 = vpop.xlane.xlu0 %5266  ;;  %6036 = vmatprep.subr.mxu0 %v5923_v28  ;;  %v5968_v28 = vld [vmem:[%s10817_s21 + $0x250] sm:$0xff] }
0x1536   :  { %v5274_v23 = vmul.f32 0.03125, %v5267_v13  ;;  %v5600_v21 = vmul.f32 %v5599_v54, %v5599_v54  ;;  %v5920_v13 = vld [vmem:[%s10817_s21 + $0xd0] sm:$0xff] }
0x1538   :  { %v5279_v29 = vadd.f32 1e-06, %v5274_v23  ;;  %v5601_v39 = vsel %vm218_vm3, %v5600_v21, 0.0  ;;  %v5919_v23 = vld [vmem:[%s10817_s21 + $0xc8] sm:$0xff] }
0x1539   :  { %5602 = vadd.xlane.f32.xlu1 %v5601_v39 }
0x153a   :  { %7925 = vrsqrt.f32 %v5279_v29  ;;  %v5918_v29 = vld [vmem:[%s10817_s21 + $0xc0] sm:$0xff] }
0x1547   :  { %v7926_v8 = vpop.eup %7925 }
0x1548   :  { %v5289_v24 = vmul.f32 %v7926_v8, %v5249_v22  ;;  %v5917_v8 = vld [vmem:[%s10817_s21 + $0xb8] sm:$0xff] }
0x154a   :  { %v5300_v2 = vmul.f32 %v10056_v10, %v5289_v24 }
0x154c   :  { %v5311_v42 = vadd.f32 %v10061_v50, %v5300_v2 }
0x154e   :  { %7589 = vmatmul.mubr.msk.f32.gmra.mxu1 %vm205_vm2, %v5311_v42  ;;  %v6557_v42 = vld [vmem:[%s10814_s18] ss:$0 sm:$0xff] }
0x154f   :  { %7591 = vmatprep.mubr.msk.f32.mxu1 %vm7964_vm0, %v7963_v1 }
0x1583   :  { %v5270_v34 = vpop.xlane.xlu0 %5269 }
0x1584   :  { %v5275_v45 = vmul.f32 0.03125, %v5270_v34 }
0x1586   :  { %v5280_v27 = vadd.f32 1e-06, %v5275_v45  ;;  %v5718_v45 = vld [vmem:[%s10815_s19 + $0x58] sm:$0xff] }
0x1588   :  { %7927 = vrsqrt.f32 %v5280_v27  ;;  %v5717_v27 = vld [vmem:[%s10815_s19 + $0x50] sm:$0xff] }
0x1595   :  { %v7928_v11 = vpop.eup %7927 }
0x1596   :  { %v5290_v14 = vmul.f32 %v7928_v11, %v5250_v15  ;;  %v5714_v11 = vld [vmem:[%s10815_s19 + $0x38] sm:$0xff] }
0x1598   :  { %v5301_v18 = vmul.f32 %v10056_v10, %v5290_v14  ;;  %v6556_v10 = vld [vmem:[%s10812_s16] ss:$0 sm:$0xff]  ;;  %v5713_v14 = vld [vmem:[%s10815_s19 + $0x30] sm:$0xff] }
0x159a   :  { %v5312_v51 = vadd.f32 %v10061_v50, %v5301_v18  ;;  %v5710_v18 = vld [vmem:[%s10815_s19 + $0x18] sm:$0xff] }
0x159c   :  { %7592 = vmatmul.mubr.msk.f32.gmra.mxu1 %vm205_vm2, %v5312_v51  ;;  %v5709_v51 = vld [vmem:[%s10815_s19 + $0x10] sm:$0xff] }
0x159d   :  { %7649 = vmatprep.mubr.msk.f32.mxu1 %vm7964_vm0, %v7963_v1 }
0x15c2   :  { %v5603_v46 = vpop.xlane.xlu1 %5602 }
0x15c3   :  { %v5604_v52 = vmul.f32 0.03125, %v5603_v46  ;;  %v5988_v46 = vld [vmem:[%s10817_s21 + $0x2f0] sm:$0xff] }
0x15c5   :  { %v5605_v53 = vadd.f32 1e-06, %v5604_v52  ;;  %v5916_v52 = vld [vmem:[%s10817_s21 + $0xb0] sm:$0xff] }
0x15c7   :  { %7929 = vrsqrt.f32 %v5605_v53  ;;  %v5987_v53 = vld [vmem:[%s10817_s21 + $0x2e8] sm:$0xff] }
0x15d4   :  { %v7930_v41 = vpop.eup %7929 }
0x15d5   :  { %v5607_v48 = vmul.f32 %v7930_v41, %v5599_v54  ;;  %v5921_v54 = vld [vmem:[%s10817_s21 + $0xd8] sm:$0xff]  ;;  %v5915_v41 = vld [vmem:[%s10817_s21 + $0xa8] sm:$0xff] }
0x15d7   :  { %v5614_v50 = vmul.f32 %v6555_v33, %v5607_v48  ;;  %v5986_v33 = vld [vmem:[%s10817_s21 + $0x2e0] sm:$0xff] }
0x15d8   :  { %v5914_v48 = vld [vmem:[%s10817_s21 + $0xa0] sm:$0xff] }
0x15d9   :  { %v5621_v0 = vadd.f32 %v6556_v10, %v5614_v50  ;;  %v5985_v10 = vld [vmem:[%s10817_s21 + $0x2d8] sm:$0xff] }
0x15da   :  { %v5913_v50 = vld [vmem:[%s10817_s21 + $0x98] sm:$0xff] }
0x15db   :  { %7650 = vmatmul.mubr.msk.f32.vlgmr.msra.gmra.mxu1 %vm205_vm2, %v5621_v0  ;;  %v5984_v0 = vld [vmem:[%s10817_s21 + $0x2d0] sm:$0xff] }
0x15dc   :  { %5812 = vmatprep.mubr.f32.mxu1 %v7963_v1  ;;  %5773 = vmatpush1.msra.mxu1 %v5719_v17  ;;  %v5979_v17 = vld [vmem:[%s10817_s21 + $0x2a8] sm:$0xff] }
0x15dd   :  { %5774 = vmatprep.subr.mxu1 %v5716_v5  ;;  %v5907_v5 = vld [vmem:[%s10817_s21 + $0x68] sm:$0xff] }
0x15de   :  { %5775 = vmatpush1.msra.mxu1 %v5715_v44  ;;  %v5978_v44 = vld [vmem:[%s10817_s21 + $0x2a0] sm:$0xff] }
0x15df   :  { %5776 = vmatprep.subr.mxu1 %v5712_v36  ;;  %v5906_v36 = vld [vmem:[%s10817_s21 + $0x60] sm:$0xff] }
0x15e0   :  { %5777 = vmatpush1.msra.mxu1 %v5711_v35  ;;  %v5977_v35 = vld [vmem:[%s10817_s21 + $0x298] sm:$0xff] }
0x15e1   :  { %5778 = vmatprep.subr.mxu1 %v5708_v37  ;;  %v5905_v37 = vld [vmem:[%s10817_s21 + $0x58] sm:$0xff] }
0x15e2   :  { %5779 = vmatpush1.msra.mxu1 %v5707_v43  ;;  %v5976_v43 = vld [vmem:[%s10817_s21 + $0x290] sm:$0xff] }
0x15e3   :  { %5843 = vmatprep.subr.mxu1 %v5722_v6  ;;  %v5904_v6 = vld [vmem:[%s10817_s21 + $0x50] sm:$0xff] }
0x160e   :  { %v5422_v57 = vpop.f32.mrf.mxu1 }
0x160f   :  { %v5423_v16 = vadd.f32 %v10164_v9, %v5422_v57  ;;  %v5912_v57 = vld [vmem:[%s10817_s21 + $0x90] sm:$0xff] }
0x1610   :  { %v7590_v40 = vpop.f32.mrf.mxu1 }
0x1611   :  { %v5434_v4 = vmul.f32 %v5423_v16, %v5423_v16  ;;  %v5911_v40 = vld [vmem:[%s10817_s21 + $0x88] sm:$0xff] }
0x1613   :  { %v5439_v60 = vmul.f32 %v5434_v4, %v5423_v16  ;;  %v5982_v4 = vld [vmem:[%s10817_s21 + $0x2c0] sm:$0xff] }
0x1615   :  { %v5444_v38 = vmul.f32 0.044715, %v5439_v60  ;;  %v5910_v60 = vld [vmem:[%s10817_s21 + $0x80] sm:$0xff] }
0x1617   :  { %v5449_v49 = vadd.f32 %v5444_v38, %v5423_v16  ;;  %v5981_v38 = vld [vmem:[%s10817_s21 + $0x2b8] sm:$0xff] }
0x1619   :  { %v5454_v59 = vmul.f32 0.7978846, %v5449_v49  ;;  %v5909_v49 = vld [vmem:[%s10817_s21 + $0x78] sm:$0xff] }
0x161b   :  { %7931 = vtanh.f32 %v5454_v59  ;;  %v5980_v59 = vld [vmem:[%s10817_s21 + $0x2b0] sm:$0xff] }
0x1628   :  { %v7932_v22 = vpop.eup %7931 }
0x1629   :  { %v5464_v56 = vadd.f32 1.0, %v7932_v22  ;;  %v5975_v22 = vld [vmem:[%s10817_s21 + $0x288] sm:$0xff] }
0x162b   :  { %v5469_v7 = vmul.f32 0.5, %v5464_v56  ;;  %v5903_v56 = vld [vmem:[%s10817_s21 + $0x48] sm:$0xff] }
0x162d   :  { %v5474_v19 = vmul.f32 %v5469_v7, %v5423_v16  ;;  %v5983_v16 = vld [vmem:[%s10817_s21 + $0x2c8] sm:$0xff]  ;;  %v5974_v7 = vld [vmem:[%s10817_s21 + $0x280] sm:$0xff] }
0x162f   :  { %7636 = vmatmul.mubr.f32.gmra.mxu0 %v5474_v19  ;;  %v5902_v19 = vld [vmem:[%s10817_s21 + $0x40] sm:$0xff] }
0x1630   :  { %7638 = vmatprep.mubr.msk.f32.mxu0 %vm7964_vm0, %v7963_v1 }
0x165c   :  { %v5427_v3 = vpop.f32.mrf.mxu1 }
0x165d   :  { %v5428_v58 = vadd.f32 %v10164_v9, %v5427_v3  ;;  %v5922_v9 = vld [vmem:[%s10817_s21 + $0xe0] sm:$0xff]  ;;  %v5973_v3 = vld [vmem:[%s10817_s21 + $0x278] sm:$0xff] }
0x165e   :  { %v7593_v47 = vpop.f32.mrf.mxu1  ;;  %6037 = vmatpush1.msra.mxu0 %v5922_v9  ;;  %v5896_v9 = vld [vmem:[%s10817_s21 + $0x10] sm:$0xff] }
0x165f   :  { %v5435_v61 = vmul.f32 %v5428_v58, %v5428_v58  ;;  %6038 = vmatprep.subr.mxu0 %v5921_v54  ;;  %v5972_v47 = vld [vmem:[%s10817_s21 + $0x270] sm:$0xff]  ;;  %v5967_v54 = vld [vmem:[%s10817_s21 + $0x248] sm:$0xff] }
0x1660   :  { %6039 = vmatpush1.msra.mxu0 %v5920_v13  ;;  %v5895_v13 = vld [vmem:[%s10817_s21 + $0x8] sm:$0xff] }
0x1661   :  { %v5440_v12 = vmul.f32 %v5435_v61, %v5428_v58  ;;  %6040 = vmatprep.subr.mxu0 %v5919_v23  ;;  %v5900_v61 = vld [vmem:[%s10817_s21 + $0x30] sm:$0xff]  ;;  %v5966_v23 = vld [vmem:[%s10817_s21 + $0x240] sm:$0xff] }
0x1662   :  { %6041 = vmatpush1.msra.mxu0 %v5918_v29  ;;  %v5965_v29 = vld [vmem:[%s10817_s21 + $0x238] sm:$0xff] }
0x1663   :  { %v5445_v31 = vmul.f32 0.044715, %v5440_v12  ;;  %6042 = vmatprep.subr.mxu0 %v5917_v8  ;;  %v5971_v12 = vld [vmem:[%s10817_s21 + $0x268] sm:$0xff]  ;;  %v5964_v8 = vld [vmem:[%s10817_s21 + $0x230] sm:$0xff] }
0x1664   :  { %6043 = vmatpush1.msra.mxu0 %v5916_v52  ;;  %v5948_v52 = vld [vmem:[%s10817_s21 + $0x1b0] sm:$0xff] }
0x1665   :  { %v5450_v15 = vadd.f32 %v5445_v31, %v5428_v58  ;;  %6044 = vmatprep.subr.mxu0 %v5915_v41  ;;  %v5899_v31 = vld [vmem:[%s10817_s21 + $0x28] sm:$0xff] }
0x1666   :  { %6045 = vmatpush1.msra.mxu0 %v5914_v48  ;;  %v5947_v41 = vld [vmem:[%s10817_s21 + $0x1a8] sm:$0xff]  ;;  %v5946_v48 = vld [vmem:[%s10817_s21 + $0x1a0] sm:$0xff] }
0x1667   :  { %v5455_v55 = vmul.f32 0.7978846, %v5450_v15  ;;  %6046 = vmatprep.subr.mxu0 %v5913_v50  ;;  %v5970_v15 = vld [vmem:[%s10817_s21 + $0x260] sm:$0xff]  ;;  %v5945_v50 = vld [vmem:[%s10817_s21 + $0x198] sm:$0xff] }
0x1668   :  { %6047 = vmatpush1.msra.mxu0 %v5912_v57  ;;  %v5944_v57 = vld [vmem:[%s10817_s21 + $0x190] sm:$0xff] }
0x1669   :  { %7933 = vtanh.f32 %v5455_v55  ;;  %6048 = vmatprep.subr.mxu0 %v5911_v40  ;;  %v5898_v55 = vld [vmem:[%s10817_s21 + $0x20] sm:$0xff]  ;;  %v5943_v40 = vld [vmem:[%s10817_s21 + $0x188] sm:$0xff] }
0x166a   :  { %6049 = vmatpush1.msra.mxu0 %v5910_v60  ;;  %v5942_v60 = vld [vmem:[%s10817_s21 + $0x180] sm:$0xff] }
0x166b   :  { %6050 = vmatprep.subr.mxu0 %v5909_v49  ;;  %v5941_v49 = vld [vmem:[%s10817_s21 + $0x178] sm:$0xff] }
0x166c   :  { %6051 = vmatpush1.msra.mxu0 %v5908_v62  ;;  %v5940_v62 = vld [vmem:[%s10817_s21 + $0x170] sm:$0xff] }
0x166d   :  { %6052 = vmatprep.subr.mxu0 %v5907_v5  ;;  %v5939_v5 = vld [vmem:[%s10817_s21 + $0x168] sm:$0xff] }
0x166e   :  { %6053 = vmatpush1.msra.mxu0 %v5906_v36  ;;  %v5938_v36 = vld [vmem:[%s10817_s21 + $0x160] sm:$0xff] }
0x166f   :  { %6054 = vmatprep.subr.mxu0 %v5905_v37  ;;  %v5937_v37 = vld [vmem:[%s10817_s21 + $0x158] sm:$0xff] }
0x1670   :  { %6055 = vmatpush1.msra.mxu0 %v5904_v6  ;;  %v5936_v6 = vld [vmem:[%s10817_s21 + $0x150] sm:$0xff] }
0x1671   :  { %6056 = vmatprep.subr.mxu0 %v5903_v56  ;;  %v5935_v56 = vld [vmem:[%s10817_s21 + $0x148] sm:$0xff] }
0x1672   :  { %6057 = vmatpush1.msra.mxu0 %v5902_v19  ;;  %v5934_v19 = vld [vmem:[%s10817_s21 + $0x140] sm:$0xff] }
0x1676   :  { %v7934_v21 = vpop.eup %7933 }
0x1677   :  { %v5465_v39 = vadd.f32 1.0, %v7934_v21  ;;  %v5894_v21 = vld [vmem:[%s10817_s21] sm:$0xff] }
0x1679   :  { %v5470_v24 = vmul.f32 0.5, %v5465_v39  ;;  %v5957_v39 = vld [vmem:[%s10817_s21 + $0x1f8] sm:$0xff] }
0x167b   :  { %v5475_v2 = vmul.f32 %v5470_v24, %v5428_v58  ;;  %v5901_v58 = vld [vmem:[%s10817_s21 + $0x38] sm:$0xff]  ;;  %v5956_v24 = vld [vmem:[%s10817_s21 + $0x1f0] sm:$0xff] }
0x167c   :  { %6058 = vmatprep.subr.mxu0 %v5901_v58  ;;  %v5933_v58 = vld [vmem:[%s10817_s21 + $0x138] sm:$0xff] }
0x167d   :  { %7639 = vmatmul.mubr.f32.gmra.mxu0 %v5475_v2  ;;  %v5963_v2 = vld [vmem:[%s10817_s21 + $0x228] sm:$0xff] }
0x167e   :  { %6059 = vmatpush1.msra.mxu0 %v5900_v61  ;;  %v5932_v61 = vld [vmem:[%s10817_s21 + $0x130] sm:$0xff] }
0x167f   :  { %6060 = vmatprep.subr.mxu0 %v5899_v31 }
0x1680   :  { %6061 = vmatpush1.msra.mxu0 %v5898_v55  ;;  %v6002_v55 = vld [vmem:[%s10817_s21 + $0x360] sm:$0xff] }
0x1681   :  { %6062 = vmatprep.subr.mxu0 %v5897_v20  ;;  %v6001_v20 = vld [vmem:[%s10817_s21 + $0x358] sm:$0xff] }
0x1682   :  { %6063 = vmatpush1.msra.mxu0 %v5896_v9  ;;  %v5929_v9 = vld [vmem:[%s10817_s21 + $0x118] sm:$0xff] }
0x1683   :  { %6064 = vmatprep.subr.mxu0 %v5895_v13  ;;  %v5928_v13 = vld [vmem:[%s10817_s21 + $0x110] sm:$0xff] }
0x1684   :  { %6065 = vmatpush1.msra.mxu0 %v5894_v21  ;;  %v5927_v21 = vld [vmem:[%s10817_s21 + $0x108] sm:$0xff] }
0x1685   :  { %6066 = vmatprep.subr.mxu0 %v5957_v39  ;;  %v5926_v39 = vld [vmem:[%s10817_s21 + $0x100] sm:$0xff] }
0x1686   :  { %6067 = vmatpush2.msra.mxu0 %v5956_v24  ;;  %v5996_v24 = vld [vmem:[%s10817_s21 + $0x330] sm:$0xff] }
0x169b   :  { %v5702_v25 = vpop.f32.mrf.mxu1 }
0x169c   :  { %v5703_v30 = vadd.f32 %v6557_v42, %v5702_v25  ;;  %v5955_v42 = vld [vmem:[%s10817_s21 + $0x1e8] sm:$0xff]  ;;  %v5962_v25 = vld [vmem:[%s10817_s21 + $0x220] sm:$0xff] }
0x169d   :  { %v7651_v63 = vpop.f32.mrf.mxu1  ;;  %6068 = vmatprep.subr.mxu0 %v5955_v42  ;;  %v5994_v42 = vld [vmem:[%s10817_s21 + $0x320] sm:$0xff] }
0x169e   :  { %7935 = vtanh.f32 %v5703_v30  ;;  %v5954_v30 = vld [vmem:[%s10817_s21 + $0x1e0] sm:$0xff]  ;;  %v5961_v63 = vld [vmem:[%s10817_s21 + $0x218] sm:$0xff] }
0x169f   :  { %6069 = vmatpush2.msra.mxu0 %v5954_v30  ;;  %v5992_v30 = vld [vmem:[%s10817_s21 + $0x310] sm:$0xff] }
0x16ab   :  { %v7936_v34 = vpop.eup %7935 }
0x16ac   :  { %6559 = vmatmul.mubr.msk.f32.vlgmr.msra.gmra.mxu1 %vm205_vm2, %v7936_v34 }
0x16ad   :  { %5844 = vmatpush1.msra.mxu1 %v5721_v26  ;;  %5883 = vmatprep.mubr.f32.mxu1 %v7963_v1  ;;  %v5989_v1 = vld [vmem:[%s10817_s21 + $0x2f8] sm:$0xff] }
0x16ae   :  { %5845 = vmatprep.subr.mxu1 %v5718_v45  ;;  %v5953_v26 = vld [vmem:[%s10817_s21 + $0x1d8] sm:$0xff]  ;;  %v5952_v45 = vld [vmem:[%s10817_s21 + $0x1d0] sm:$0xff] }
0x16af   :  { %5846 = vmatpush1.msra.mxu1 %v5717_v27  ;;  %v5959_v27 = vld [vmem:[%s10817_s21 + $0x208] sm:$0xff]  ;;  %6070 = vmatprep.subr.mxu0 %v5953_v26  ;;  %v5990_v26 = vld [vmem:[%s10817_s21 + $0x300] sm:$0xff] }
0x16b0   :  { %5847 = vmatprep.subr.mxu1 %v5714_v11  ;;  %v5951_v11 = vld [vmem:[%s10817_s21 + $0x1c8] sm:$0xff]  ;;  %6071 = vmatpush2.msra.mxu0 %v5952_v45 }
0x16b1   :  { %5848 = vmatpush1.msra.mxu1 %v5713_v14  ;;  %v5958_v14 = vld [vmem:[%s10817_s21 + $0x200] sm:$0xff]  ;;  %6072 = vmatprep.subr.mxu0 %v5951_v11  ;;  %v5725_v11 = vlaneseq }
0x16b2   :  { %5849 = vmatprep.subr.mxu1 %v5710_v18  ;;  %v5950_v18 = vld [vmem:[%s10817_s21 + $0x1c0] sm:$0xff] }
0x16b3   :  { %5850 = vmatpush1.msra.mxu1 %v5709_v51  ;;  %v6021_v51 = vld [vmem:[%s10817_s21 + $0x3f8] sm:$0xff]  ;;  %6073 = vmatpush2.msra.mxu0 %v5950_v18 }
0x16b4   :  { %6560 = vmatmul.mubr.msk.f32.vlgmr.msra.gmra.mxu1 %vm205_vm2, %v7936_v34  ;;  %6105 = vmatprep.subr.mxu1 %v5989_v1  ;;  %v5960_v34 = vld [vmem:[%s10817_s21 + $0x210] sm:$0xff]  ;;  %v5949_v1 = vld [vmem:[%s10817_s21 + $0x1b8] sm:$0xff] }
0x16b5   :  { %6106 = vmatpush1.msra.mxu1 %v5988_v46  ;;  %v6020_v46 = vld [vmem:[%s10817_s21 + $0x3f0] sm:$0xff]  ;;  %6074 = vmatprep.subr.mxu0 %v5949_v1 }
0x16b6   :  { %6107 = vmatprep.subr.mxu1 %v5987_v53  ;;  %v6019_v53 = vld [vmem:[%s10817_s21 + $0x3e8] sm:$0xff]  ;;  %6075 = vmatpush2.msra.mxu0 %v5948_v52 }
0x16b7   :  { %6108 = vmatpush1.msra.mxu1 %v5986_v33  ;;  %v6018_v33 = vld [vmem:[%s10817_s21 + $0x3e0] sm:$0xff]  ;;  %6076 = vmatprep.subr.mxu0 %v5947_v41 }
0x16b8   :  { %6109 = vmatprep.subr.mxu1 %v5985_v10  ;;  %v6017_v10 = vld [vmem:[%s10817_s21 + $0x3d8] sm:$0xff]  ;;  %6077 = vmatpush2.msra.mxu0 %v5946_v48 }
0x16b9   :  { %6110 = vmatpush1.msra.mxu1 %v5984_v0  ;;  %v6016_v0 = vld [vmem:[%s10817_s21 + $0x3d0] sm:$0xff]  ;;  %6078 = vmatprep.subr.mxu0 %v5945_v50 }
0x16ba   :  { %6111 = vmatprep.subr.mxu1 %v5983_v16  ;;  %v6015_v16 = vld [vmem:[%s10817_s21 + $0x3c8] sm:$0xff]  ;;  %6079 = vmatpush2.msra.mxu0 %v5944_v57 }
0x16bb   :  { %6112 = vmatpush1.msra.mxu1 %v5982_v4  ;;  %v6014_v4 = vld [vmem:[%s10817_s21 + $0x3c0] sm:$0xff]  ;;  %6080 = vmatprep.subr.mxu0 %v5943_v40  ;;  %v6193_v40 = vld [vmem:[%s10819_s23 + $0x78] sm:$0xff] }
0x16bc   :  { %6113 = vmatprep.subr.mxu1 %v5981_v38  ;;  %v6013_v38 = vld [vmem:[%s10817_s21 + $0x3b8] sm:$0xff]  ;;  %6081 = vmatpush2.msra.mxu0 %v5942_v60  ;;  %v6208_v60 = vld [vmem:[%s10819_s23 + $0xf0] sm:$0xff] }
0x16bd   :  { %6114 = vmatpush1.msra.mxu1 %v5980_v59  ;;  %v6012_v59 = vld [vmem:[%s10817_s21 + $0x3b0] sm:$0xff]  ;;  %6082 = vmatprep.subr.mxu0 %v5941_v49 }
0x16be   :  { %6115 = vmatprep.subr.mxu1 %v5979_v17  ;;  %v6011_v17 = vld [vmem:[%s10817_s21 + $0x3a8] sm:$0xff]  ;;  %6083 = vmatpush2.msra.mxu0 %v5940_v62  ;;  %v6192_v49 = vld [vmem:[%s10819_s23 + $0x70] sm:$0xff] }
0x16bf   :  { %6116 = vmatpush1.msra.mxu1 %v5978_v44  ;;  %v6010_v44 = vld [vmem:[%s10817_s21 + $0x3a0] sm:$0xff]  ;;  %6084 = vmatprep.subr.mxu0 %v5939_v5  ;;  %v6191_v5 = vld [vmem:[%s10819_s23 + $0x68] sm:$0xff] }
0x16c0   :  { %6117 = vmatprep.subr.mxu1 %v5977_v35  ;;  %v6009_v35 = vld [vmem:[%s10817_s21 + $0x398] sm:$0xff]  ;;  %6085 = vmatpush2.msra.mxu0 %v5938_v36  ;;  %v6206_v36 = vld [vmem:[%s10819_s23 + $0xe0] sm:$0xff] }
0x16c1   :  { %6118 = vmatpush1.msra.mxu1 %v5976_v43  ;;  %v6008_v43 = vld [vmem:[%s10817_s21 + $0x390] sm:$0xff]  ;;  %6086 = vmatprep.subr.mxu0 %v5937_v37 }
0x16c2   :  { %6119 = vmatprep.subr.mxu1 %v5975_v22  ;;  %v6007_v22 = vld [vmem:[%s10817_s21 + $0x388] sm:$0xff]  ;;  %6087 = vmatpush2.msra.mxu0 %v5936_v6 }
0x16c3   :  { %6120 = vmatpush1.msra.mxu1 %v5974_v7  ;;  %v6006_v7 = vld [vmem:[%s10817_s21 + $0x380] sm:$0xff]  ;;  %6088 = vmatprep.subr.mxu0 %v5935_v56  ;;  %v6204_v56 = vld [vmem:[%s10819_s23 + $0xd0] sm:$0xff] }
0x16c4   :  { %6121 = vmatprep.subr.mxu1 %v5973_v3  ;;  %v6005_v3 = vld [vmem:[%s10817_s21 + $0x378] sm:$0xff]  ;;  %6089 = vmatpush2.msra.mxu0 %v5934_v19  ;;  %v6203_v19 = vld [vmem:[%s10819_s23 + $0xc8] sm:$0xff] }
0x16c5   :  { %6122 = vmatpush1.msra.mxu1 %v5972_v47  ;;  %v6004_v47 = vld [vmem:[%s10817_s21 + $0x370] sm:$0xff]  ;;  %6090 = vmatprep.subr.mxu0 %v5933_v58  ;;  %v6202_v58 = vld [vmem:[%s10819_s23 + $0xc0] sm:$0xff] }
0x16c6   :  { %6123 = vmatprep.subr.mxu1 %v5971_v12  ;;  %v6003_v12 = vld [vmem:[%s10817_s21 + $0x368] sm:$0xff]  ;;  %6091 = vmatpush2.msra.mxu0 %v5932_v61  ;;  %v6201_v61 = vld [vmem:[%s10819_s23 + $0xb8] sm:$0xff] }
0x16c7   :  { %6124 = vmatpush1.msra.mxu1 %v5970_v15  ;;  %v5931_v15 = vld [vmem:[%s10817_s21 + $0x128] sm:$0xff] }
0x16c8   :  { %6125 = vmatprep.subr.mxu1 %v5969_v32  ;;  %6092 = vmatprep.subr.mxu0 %v5931_v15  ;;  %v5930_v32 = vld [vmem:[%s10817_s21 + $0x120] sm:$0xff]  ;;  %v6184_v15 = vld [vmem:[%s10819_s23 + $0x30] sm:$0xff] }
0x16c9   :  { %6126 = vmatpush1.msra.mxu1 %v5968_v28  ;;  %6093 = vmatpush2.msra.mxu0 %v5930_v32  ;;  %v6183_v32 = vld [vmem:[%s10819_s23 + $0x28] sm:$0xff] }
0x16ca   :  { %6127 = vmatprep.subr.mxu1 %v5967_v54  ;;  %v6000_v54 = vld [vmem:[%s10817_s21 + $0x350] sm:$0xff]  ;;  %6094 = vmatprep.subr.mxu0 %v5929_v9  ;;  %v6197_v9 = vld [vmem:[%s10819_s23 + $0x98] sm:$0xff] }
0x16cb   :  { %6128 = vmatpush1.msra.mxu1 %v5966_v23  ;;  %v5999_v23 = vld [vmem:[%s10817_s21 + $0x348] sm:$0xff]  ;;  %6095 = vmatpush2.msra.mxu0 %v5928_v13  ;;  %v6196_v13 = vld [vmem:[%s10819_s23 + $0x90] sm:$0xff] }
0x16cc   :  { %6129 = vmatprep.subr.mxu1 %v5965_v29  ;;  %v5998_v29 = vld [vmem:[%s10817_s21 + $0x340] sm:$0xff]  ;;  %6096 = vmatprep.subr.mxu0 %v5927_v21  ;;  %v6195_v21 = vld [vmem:[%s10819_s23 + $0x88] sm:$0xff] }
0x16cd   :  { %6130 = vmatpush1.msra.mxu1 %v5964_v8  ;;  %v5997_v8 = vld [vmem:[%s10817_s21 + $0x338] sm:$0xff]  ;;  %6097 = vmatpush2.msra.mxu0 %v5926_v39  ;;  %v6194_v39 = vld [vmem:[%s10819_s23 + $0x80] sm:$0xff] }
0x16ce   :  { %6131 = vmatprep.subr.mxu1 %v5963_v2  ;;  %v5995_v2 = vld [vmem:[%s10817_s21 + $0x328] sm:$0xff] }
0x16cf   :  { %6132 = vmatpush1.msra.mxu1 %v5962_v25  ;;  %v5993_v25 = vld [vmem:[%s10817_s21 + $0x318] sm:$0xff] }
0x16d0   :  { %6133 = vmatprep.subr.mxu1 %v5961_v63  ;;  %v5991_v63 = vld [vmem:[%s10817_s21 + $0x308] sm:$0xff] }
0x16d1   :  { %6134 = vmatpush1.msra.mxu1 %v5960_v34  ;;  %v6209_v34 = vld [vmem:[%s10819_s23 + $0xf8] sm:$0xff] }
0x16d2   :  { %6135 = vmatprep.subr.mxu1 %v5959_v27  ;;  %6867 = vmatprep.subr.mxu0 %v6209_v34 }
0x16d3   :  { %6136 = vmatpush1.msra.mxu1 %v5958_v14  ;;  %v10677_v14 = vshrl.u32 %v5725_v11, 7 }
0x16d4   :  { %6137 = vmatprep.subr.mxu1 %v6021_v51  ;;  %v5723_v51 = vld [vmem:[%s10816_s20] sm:$0xf] }
0x16d5   :  { %6138 = vmatpush2.msra.mxu1 %v6020_v46  ;;  %v5727_v18 = vsub.s32 0, %v10677_v14  ;;  %v5731_v1 = vsub.s32 1, %v10677_v14  ;;  %v5735_v48 = vsub.s32 2, %v10677_v14  ;;  %v5739_v50 = vsub.s32 3, %v10677_v14 }
0x16d6   :  { %6139 = vmatprep.subr.mxu1 %v6019_v53 }
0x16d7   :  { %6140 = vmatpush2.msra.mxu1 %v6018_v33  ;;  %v5728_v46 = vrot.slane %v5723_v51, %v5727_v18  ;;  %v5732_v52 = vrot.slane %v5723_v51, %v5731_v1 }
0x16d8   :  { %6141 = vmatprep.subr.mxu1 %v6017_v10 }
0x16d9   :  { %6142 = vmatpush2.msra.mxu1 %v6016_v0 }
0x16da   :  { %6143 = vmatprep.subr.mxu1 %v6015_v16  ;;  %v5736_v16 = vrot.slane %v5723_v51, %v5735_v48 }
0x16db   :  { %6144 = vmatpush2.msra.mxu1 %v6014_v4  ;;  %v5740_v4 = vrot.slane %v5723_v51, %v5739_v50 }
0x16dc   :  { %6145 = vmatprep.subr.mxu1 %v6013_v38 }
0x16dd   :  { %6146 = vmatpush2.msra.mxu1 %v6012_v59  ;;  %v6207_v59 = vld [vmem:[%s10819_s23 + $0xe8] sm:$0xff] }
0x16de   :  { %6147 = vmatprep.subr.mxu1 %v6011_v17 }
0x16df   :  { %6148 = vmatpush2.msra.mxu1 %v6010_v44 }
0x16e0   :  { %6149 = vmatprep.subr.mxu1 %v6009_v35  ;;  %v6190_v35 = vld [vmem:[%s10819_s23 + $0x60] sm:$0xff] }
0x16e1   :  { %6150 = vmatpush2.msra.mxu1 %v6008_v43  ;;  %v6205_v43 = vld [vmem:[%s10819_s23 + $0xd8] sm:$0xff] }
0x16e2   :  { %6151 = vmatprep.subr.mxu1 %v6007_v22  ;;  %v6189_v22 = vld [vmem:[%s10819_s23 + $0x58] sm:$0xff] }
0x16e3   :  { %6152 = vmatpush2.msra.mxu1 %v6006_v7  ;;  %v6188_v7 = vld [vmem:[%s10819_s23 + $0x50] sm:$0xff] }
0x16e4   :  { %6153 = vmatprep.subr.mxu1 %v6005_v3  ;;  %v6187_v3 = vld [vmem:[%s10819_s23 + $0x48] sm:$0xff] }
0x16e5   :  { %6154 = vmatpush2.msra.mxu1 %v6004_v47  ;;  %v6186_v47 = vld [vmem:[%s10819_s23 + $0x40] sm:$0xff] }
0x16e6   :  { %6155 = vmatprep.subr.mxu1 %v6003_v12  ;;  %v6185_v12 = vld [vmem:[%s10819_s23 + $0x38] sm:$0xff] }
0x16e7   :  { %6156 = vmatpush2.msra.mxu1 %v6002_v55  ;;  %v6199_v55 = vld [vmem:[%s10819_s23 + $0xa8] sm:$0xff] }
0x16e8   :  { %6157 = vmatprep.subr.mxu1 %v6001_v20  ;;  %v6198_v20 = vld [vmem:[%s10819_s23 + $0xa0] sm:$0xff] }
0x16e9   :  { %6158 = vmatpush2.msra.mxu1 %v6000_v54  ;;  %v6181_v54 = vld [vmem:[%s10819_s23 + $0x18] sm:$0xff] }
0x16ea   :  { %6159 = vmatprep.subr.mxu1 %v5999_v23  ;;  %v6180_v23 = vld [vmem:[%s10819_s23 + $0x10] sm:$0xff] }
0x16eb   :  { %6160 = vmatpush2.msra.mxu1 %v5998_v29  ;;  %v6179_v29 = vld [vmem:[%s10819_s23 + $0x8] sm:$0xff] }
0x16ec   :  { %6161 = vmatprep.subr.mxu1 %v5997_v8  ;;  %v6178_v8 = vld [vmem:[%s10819_s23] sm:$0xff] }
0x16ed   :  { %6162 = vmatpush2.msra.mxu1 %v5996_v24  ;;  %v6022_v24 = vld [vmem:[%s10818_s22] sm:$0x3] }
0x16ee   :  { %6163 = vmatprep.subr.mxu1 %v5995_v2 }
0x16ef   :  { %v5573_v31 = vpop.f32.mrf.mxu0  ;;  %6164 = vmatpush2.msra.mxu1 %v5994_v42  ;;  %v6027_v42 = vrot.slane %v6022_v24, %v5727_v18 }
0x16f0   :  { %6165 = vmatprep.subr.mxu1 %v5993_v25  ;;  %v6200_v31 = vld [vmem:[%s10819_s23 + $0xb0] sm:$0xff]  ;;  %v6031_v25 = vrot.slane %v6022_v24, %v5731_v1 }
0x16f1   :  { %v7637_v28 = vpop.f32.mrf.mxu0  ;;  %6166 = vmatpush2.msra.mxu1 %v5992_v30 }
0x16f2   :  { %6167 = vmatprep.subr.mxu1 %v5991_v63  ;;  %v6182_v28 = vld [vmem:[%s10819_s23 + $0x20] sm:$0xff] }
0x16f3   :  { %6168 = vmatpush2.msra.mxu1 %v5990_v26 }
0x173d   :  { %v5577_v45 = vpop.f32.mrf.mxu0 }
0x173f   :  { %v7640_v27 = vpop.f32.mrf.mxu0 }
0x176c   :  { %v5814_v53 = vpop.f32.mrf.mxu1 }
0x176d   :  { %v5815_v41 = vadd.f32 %v5814_v53, %v5728_v46  ;;  %v6561_v53 = vld [vmem:[%s10820_s24] ss:$0 sm:$0xff] }
0x176e   :  { %v5816_v33 = vpop.f32.mrf.mxu1 }
0x176f   :  { %v5817_v10 = vadd.f32 %v5816_v33, %v5732_v52  ;;  %v5890_v57 = vmax.f32 %v5815_v41, 0.0 }
0x1771   :  { %v5891_v0 = vmax.f32 %v5817_v10, 0.0 }
0x1773   :  { %6098 = vmatprep.mubr.f32.mxu0 %v5891_v0 }
0x1774   :  { %v5885_v38 = vpop.f32.mrf.mxu1  ;;  %6099 = vmatmul.mubr.f32.vlgmr.msra.gmra.mxu0 %v5890_v57 }
0x1775   :  { %6868 = vmatpush3.msra.mxu0 %v6193_v40  ;;  %v5886_v62 = vadd.f32 %v5885_v38, %v5736_v16 }
0x1776   :  { %v5887_v17 = vpop.f32.mrf.mxu1  ;;  %6869 = vmatprep.subr.mxu0 %v6208_v60 }
0x1777   :  { %v5888_v44 = vadd.f32 %v5887_v17, %v5740_v4  ;;  %6870 = vmatpush3.msra.mxu0 %v6192_v49  ;;  %v5892_v6 = vmax.f32 %v5886_v62, 0.0 }
0x1778   :  { %6871 = vmatprep.subr.mxu0 %v6207_v59 }
0x1779   :  { %v5893_v37 = vmax.f32 %v5888_v44, 0.0  ;;  %6872 = vmatpush3.msra.mxu0 %v6191_v5 }
0x177a   :  { %6873 = vmatprep.subr.mxu0 %v6206_v36 }
0x177b   :  { %6169 = vmatprep.mubr.f32.mxu1 %v5893_v37  ;;  %6874 = vmatpush3.msra.mxu0 %v6190_v35 }
0x177c   :  { %6170 = vmatmul.mubr.f32.vlgmr.msra.gmra.mxu1 %v5892_v6  ;;  %6875 = vmatprep.subr.mxu0 %v6205_v43 }
0x177d   :  { %6876 = vmatpush3.msra.mxu0 %v6189_v22 }
0x177e   :  { %6877 = vmatprep.subr.mxu0 %v6204_v56 }
0x177f   :  { %6878 = vmatpush3.msra.mxu0 %v6188_v7 }
0x1780   :  { %6879 = vmatprep.subr.mxu0 %v6203_v19 }
0x1781   :  { %6880 = vmatpush3.msra.mxu0 %v6187_v3 }
0x1782   :  { %6881 = vmatprep.subr.mxu0 %v6202_v58 }
0x1783   :  { %6882 = vmatpush3.msra.mxu0 %v6186_v47 }
0x1784   :  { %6883 = vmatprep.subr.mxu0 %v6201_v61 }
0x1785   :  { %6884 = vmatpush3.msra.mxu0 %v6185_v12 }
0x1786   :  { %6885 = vmatprep.subr.mxu0 %v6200_v31 }
0x1787   :  { %6886 = vmatpush3.msra.mxu0 %v6184_v15 }
0x1788   :  { %6887 = vmatprep.subr.mxu0 %v6199_v55 }
0x1789   :  { %6888 = vmatpush3.msra.mxu0 %v6183_v32 }
0x178a   :  { %6889 = vmatprep.subr.mxu0 %v6198_v20 }
0x178b   :  { %6890 = vmatpush3.msra.mxu0 %v6182_v28 }
0x178c   :  { %6891 = vmatprep.subr.mxu0 %v6197_v9 }
0x178d   :  { %6892 = vmatpush3.msra.mxu0 %v6181_v54 }
0x178e   :  { %6893 = vmatprep.subr.mxu0 %v6196_v13 }
0x178f   :  { %6894 = vmatpush3.msra.mxu0 %v6180_v23 }
0x1790   :  { %6895 = vmatprep.subr.mxu0 %v6195_v21 }
0x1791   :  { %6896 = vmatpush3.msra.mxu0 %v6179_v29 }
0x1792   :  { %6897 = vmatprep.subr.mxu0 %v6194_v39 }
0x1793   :  { %6898 = vmatpush3.msra.mxu0 %v6178_v8 }
0x1834   :  { %v6100_v2 = vpop.f32.mrf.mxu0 }
0x1835   :  { %v6101_v63 = vadd.f32 %v6100_v2, %v6027_v42 }
0x1836   :  { %v6102_v30 = vpop.f32.mrf.mxu0 }
0x1837   :  { %v6103_v34 = vadd.f32 %v6102_v30, %v6031_v25 }
0x183c   :  { %v6171_v26 = vpop.f32.mrf.mxu1 }
0x183d   :  { %v6172_v45 = vadd.f32 %v6171_v26, %v6101_v63 }
0x183e   :  { %v6173_v27 = vpop.f32.mrf.mxu1 }
0x183f   :  { %v6174_v11 = vadd.f32 %v6173_v27, %v6103_v34  ;;  %v6176_v46 = vmax.f32 %v6172_v45, 0.0 }
0x1841   :  { %v6177_v51 = vmax.f32 %v6174_v11, 0.0 }
0x1843   :  { %6281 = vmatprep.mubr.f32.mxu0 %v6177_v51 }
0x1844   :  { %6282 = vmatmul.mubr.f32.vlgmr.msra.gmra.mxu0 %v6176_v46 }
0x1904   :  { %v6899_v52 = vpop.f32.mrf.mxu0 }
0x1906   :  { %v6900_v18 = vpop.f32.mrf.mxu0 }
0x1907   :  { %v6901_v41 = vadd.f32 %v6900_v18, %v6899_v52 }
0x1909   :  { %v6284_v14 = vadd.f32 %v6901_v41, %v6561_v53 }
0x190b   :  { %v6562_v1 = vmul.f32 -1.442695, %v6284_v14 }
0x190d   :  { %7937 = vpow2.f32 %v6562_v1 }
0x191a   :  { %v7938_v33 = vpop.eup %7937 }
0x191b   :  { %v6290_v48 = vadd.f32 1.0, %v7938_v33 }
0x191d   :  { %7939 = vrcp.f32 %v6290_v48 }
0x192a   :  { %v7940_v10 = vpop.eup %7939 }
0x192b   :  { %6293 = vst [vmem:[#allocation2] sm:$0x3] %v7940_v10 }
0x192c   :  { %7952 = shalt.err (!%p7949_p4)
}
0x192d   :  { %6303 = dma.vmem_to_hbm [thread:$0]  %s6301_s2, 32, %s10821_s25, [#allocation3]  }
0x192e   :  { %7961 = dma.done.wait [#allocation3], 32  }
0x192f   :  { %7962 = vsyncadd [#allocation3], 4294967264 }
0x1930   :  { %6307 = vsyncpa [#allocation3], 1 }

</bundles_post_ra>
